<compile_context>
chip_gen: v6e
topology: v6e:2x2x1
jax: 0.10.0
libtpu: 0.0.40
codegen_flags: <defaults>
</compile_context>

<pallas_src>
import functools
import math

import jax
import jax.numpy as jnp
from jax import lax
from jax.experimental import pallas as pl
from jax.experimental.pallas import tpu as pltpu


def _round_up(x, m):
    return ((x + m - 1) // m) * m


def _transformer_kernel(num_heads, batch, seq_len, vocab_offsets, vocab_sizes,
                        idx_ref, emb_ref, wqkv_ref, bqkv_ref, wo_ref, bo_ref,
                        g1_ref, be1_ref, w1_hbm_ref, b1_ref, w2_hbm_ref, b2_ref,
                        g2_ref, be2_ref, wc_ref, bc_ref,
                        out_ref,
                        w1_vmem, w2_vmem, dma_sem):
    f32 = jnp.float32
    bf16 = jnp.bfloat16
    n_rows, _ = idx_ref.shape              # n_rows = B*S, rows b-major (r = b*S + s)
    vocab_p, d_model = emb_ref.shape
    dh = d_model // num_heads

    # ---- kick off the FF-weight DMAs so they overlap the front half ----
    cp_w1 = pltpu.make_async_copy(w1_hbm_ref, w1_vmem, dma_sem.at[0])
    cp_w2 = pltpu.make_async_copy(w2_hbm_ref, w2_vmem, dma_sem.at[1])
    cp_w1.start()
    cp_w2.start()

    # ---- fused embedding lookup: multi-hot (N, Vp) @ table (Vp, D) on the MXU ----
    # Table offsets/sizes are static Python ints baked into the kernel; indices
    # are clipped to their table's range so OOB inputs cannot bleed across tables.
    idx = idx_ref[...]                                                  # (N, F) int32
    vocab_iota = lax.broadcasted_iota(jnp.int32, (n_rows, vocab_p), 1)
    mh = jnp.zeros((n_rows, vocab_p), f32)
    for f, (off, size) in enumerate(zip(vocab_offsets, vocab_sizes)):   # static, F = 3
        col = jnp.clip(idx[:, f:f + 1], 0, size - 1) + off
        mh = mh + (vocab_iota == col).astype(f32)
    e = jnp.dot(mh.astype(bf16), emb_ref[...],
                preferred_element_type=f32)                             # (N, D) f32

    # ---- fused QKV projection (1/sqrt(dh) pre-folded into the Q block) ----
    qkv = jnp.dot(e.astype(bf16), wqkv_ref[...],
                  preferred_element_type=f32) + bqkv_ref[...]           # (N, 3D)

    def heads(t):                                 # (N, D) -> (H, N, dh), bf16
        return jnp.swapaxes(t.reshape(n_rows, num_heads, dh), 0, 1).astype(bf16)

    q_h = heads(qkv[:, 0:d_model])
    k_h = heads(qkv[:, d_model:2 * d_model])
    v_h = heads(qkv[:, 2 * d_model:3 * d_model])

    # ---- multi-head self-attention, batched over heads ----
    # Attention is over the original batch axis (PyTorch batch_first=False quirk).
    # Rows with equal s = r % seq_len attend to each other -> block mask, one
    # batched (H, N, N) softmax instead of per-(s, h) tiny matmuls.
    scores = jnp.einsum('hqd,hkd->hqk', q_h, k_h,
                        preferred_element_type=f32)                     # (H, N, N)
    row_s = lax.broadcasted_iota(jnp.int32, (n_rows, n_rows), 0) % seq_len
    col_s = lax.broadcasted_iota(jnp.int32, (n_rows, n_rows), 1) % seq_len
    scores = scores + jnp.where(row_s == col_s, 0.0, -1e30).astype(f32)

    scores = scores - jnp.max(scores, axis=-1, keepdims=True)
    p = jnp.exp(scores)
    p = p * pl.reciprocal(jnp.sum(p, axis=-1, keepdims=True), approx=True)  # EUP slot

    ctx = jnp.einsum('hqk,hkd->hqd', p.astype(bf16), v_h,
                     preferred_element_type=f32)                        # (H, N, dh)
    attn = jnp.swapaxes(ctx, 0, 1).reshape(n_rows, d_model)             # (N, D)
    attn = jnp.dot(attn.astype(bf16), wo_ref[...],
                   preferred_element_type=f32) + bo_ref[...]

    # ---- residual + LayerNorm (f32 math) ----
    # TODO(synk): dropout layers omitted (eval-mode semantics -> identity).
    def layer_norm(z, g, b):
        mu = jnp.mean(z, axis=-1, keepdims=True)
        var = jnp.mean((z - mu) ** 2, axis=-1, keepdims=True)
        return (z - mu) * lax.rsqrt(var + 1e-5) * g + b

    src = layer_norm(e + attn, g1_ref[...], be1_ref[...])

    # ---- feed-forward (ReLU); weights arrive via the overlapped DMAs ----
    cp_w1.wait()
    h1 = jnp.dot(src.astype(bf16), w1_vmem[...],
                 preferred_element_type=f32) + b1_ref[...]
    h1 = jnp.maximum(h1, 0.0)
    cp_w2.wait()
    h2 = jnp.dot(h1.astype(bf16), w2_vmem[...],
                 preferred_element_type=f32) + b2_ref[...]

    y = layer_norm(src + h2, g2_ref[...], be2_ref[...])                 # (N, D)

    # ---- mean over the sequence axis + classifier (lane-padded output) ----
    # Rows are b-major, so this is a tile-friendly (B, S, D) = (*, 8, 128) reshape.
    pooled = jnp.mean(y.reshape(batch, seq_len, d_model), axis=1)       # (B, D)
    out_ref[...] = jnp.dot(pooled.astype(bf16), wc_ref[...],
                           preferred_element_type=f32) + bc_ref[...]    # (B, Cp)


def prepare_params(params, *, num_heads=4):
    """One-time weight packing (concat / pad / cast / scale-fold).

    Do this once at init; transformer_forward then only launches the kernel.
    """
    tables = params["embeddings"]
    D = tables[0].shape[1]
    dh = D // num_heads
    scale = 1.0 / math.sqrt(dh)

    sizes = tuple(int(t.shape[0]) for t in tables)
    offsets, acc = [], 0
    for sz in sizes:
        offsets.append(acc)
        acc += sz
    V = acc
    Vp = _round_up(V, 128)                        # bf16 tile-friendly vocab padding
    emb_cat = jnp.concatenate(tables, axis=0)
    emb_cat = jnp.pad(emb_cat, ((0, Vp - V), (0, 0))).astype(jnp.bfloat16)   # (Vp, D)

    # Fold 1/sqrt(dh) into the Q block of the fused QKV weight/bias.
    wqkv = jnp.concatenate([params["wq"] * scale, params["wk"], params["wv"]],
                           axis=1).astype(jnp.bfloat16)                      # (D, 3D)
    bqkv = jnp.concatenate([params["bq"] * scale, params["bk"], params["bv"]],
                           axis=1).astype(jnp.float32)                       # (1, 3D)

    C = params["wc"].shape[1]
    Cp = _round_up(max(C, 128), 128)
    wc = jnp.pad(params["wc"], ((0, 0), (0, Cp - C))).astype(jnp.bfloat16)   # (D, Cp)
    bc = jnp.pad(params["bc"], ((0, 0), (0, Cp - C))).astype(jnp.float32)    # (1, Cp)

    packed = {
        "emb": emb_cat, "wqkv": wqkv, "bqkv": bqkv,
        "wo": params["wo"].astype(jnp.bfloat16), "bo": params["bo"].astype(jnp.float32),
        "g1": params["g1"].astype(jnp.float32), "be1": params["be1"].astype(jnp.float32),
        "w1": params["w1"].astype(jnp.bfloat16), "b1": params["b1"].astype(jnp.float32),
        "w2": params["w2"].astype(jnp.bfloat16), "b2": params["b2"].astype(jnp.float32),
        "g2": params["g2"].astype(jnp.float32), "be2": params["be2"].astype(jnp.float32),
        "wc": wc, "bc": bc,
    }
    meta = {"offsets": tuple(offsets), "sizes": sizes,
            "num_classes": C, "num_heads": num_heads}
    return packed, meta


def transformer_forward(x_idx, packed, meta):
    """x_idx: int32 (B, S, num_features); packed/meta from prepare_params."""
    B, S, F = x_idx.shape
    N = B * S
    # Metadata-only flatten; rows are b-major (r = b*S + s). No offset-add or
    # transpose on the host — the offsets are static ints baked into the kernel.
    idx_flat = x_idx.reshape(N, F).astype(jnp.int32)

    D = packed["emb"].shape[1]
    FF = packed["w1"].shape[1]
    Cp = packed["wc"].shape[1]

    kernel = functools.partial(_transformer_kernel, meta["num_heads"], B, S,
                               meta["offsets"], meta["sizes"])

    vmem_spec = pl.BlockSpec(memory_space=pltpu.MemorySpace.VMEM)
    hbm_spec = pl.BlockSpec(memory_space=pl.ANY)   # FF weights: manual overlapped DMA
    in_specs = [
        vmem_spec,   # idx
        vmem_spec,   # emb table (concat, bf16)
        vmem_spec,   # wqkv
        vmem_spec,   # bqkv
        vmem_spec,   # wo
        vmem_spec,   # bo
        vmem_spec,   # g1
        vmem_spec,   # be1
        hbm_spec,    # w1  (DMA'd in-kernel)
        vmem_spec,   # b1
        hbm_spec,    # w2  (DMA'd in-kernel)
        vmem_spec,   # b2
        vmem_spec,   # g2
        vmem_spec,   # be2
        vmem_spec,   # wc
        vmem_spec,   # bc
    ]
    args = (idx_flat, packed["emb"], packed["wqkv"], packed["bqkv"],
            packed["wo"], packed["bo"], packed["g1"], packed["be1"],
            packed["w1"], packed["b1"], packed["w2"], packed["b2"],
            packed["g2"], packed["be2"], packed["wc"], packed["bc"])

    # Single ungridded invocation: at N = 16 rows, per-grid-step overhead and
    # cross-TC splitting (v7x) would exceed the sub-microsecond compute.
    out = pl.pallas_call(
        kernel,
        out_shape=jax.ShapeDtypeStruct((B, Cp), jnp.float32),
        in_specs=in_specs,
        out_specs=vmem_spec,
        scratch_shapes=[pltpu.VMEM((D, FF), jnp.bfloat16),
                        pltpu.VMEM((FF, D), jnp.bfloat16),
                        pltpu.SemaphoreType.DMA((2,))],
    )(*args)
    return out[:, :meta["num_classes"]]


def reference_forward(x_idx, params, *, num_heads=4, mm_dtype=jnp.float32):
    """Pure-JAX reference. mm_dtype=bfloat16 mirrors the kernel's matmul casting."""
    tables = params["embeddings"]

    def table(t):
        return t if mm_dtype == jnp.float32 else t.astype(mm_dtype).astype(jnp.float32)

    e = sum(table(tbl)[x_idx[:, :, i]] for i, tbl in enumerate(tables))
    B, S, D = e.shape
    H = num_heads
    dh = D // H
    scale = 1.0 / math.sqrt(dh)

    def mm(a, w):
        return jnp.dot(a.astype(mm_dtype), w.astype(mm_dtype),
                       preferred_element_type=jnp.float32)

    def ln(z, g, b):
        mu = jnp.mean(z, axis=-1, keepdims=True)
        var = jnp.mean((z - mu) ** 2, axis=-1, keepdims=True)
        return (z - mu) * lax.rsqrt(var + 1e-5) * g + b

    x = e
    # Scale folded into wq/bq (mirrors the kernel; identical math in exact arithmetic).
    q = mm(x, params["wq"] * scale) + params["bq"] * scale
    k = mm(x, params["wk"]) + params["bk"]
    v = mm(x, params["wv"]) + params["bv"]
    qh = q.reshape(B, S, H, dh).astype(mm_dtype)
    kh = k.reshape(B, S, H, dh).astype(mm_dtype)
    vh = v.reshape(B, S, H, dh).astype(mm_dtype)
    # attention over axis 0 (B): PyTorch batch_first=False treats dim 0 as sequence
    sc = jnp.einsum('bshd,cshd->shbc', qh, kh, preferred_element_type=jnp.float32)
    p = jax.nn.softmax(sc, axis=-1)
    attn = jnp.einsum('shbc,cshd->bshd', p.astype(mm_dtype), vh,
                      preferred_element_type=jnp.float32).reshape(B, S, D)
    attn = mm(attn, params["wo"]) + params["bo"]
    src = ln(x + attn, params["g1"], params["be1"])
    h1 = jax.nn.relu(mm(src, params["w1"]) + params["b1"])
    h2 = mm(h1, params["w2"]) + params["b2"]
    y = ln(src + h2, params["g2"], params["be2"])
    pooled = jnp.mean(y, axis=1)
    return mm(pooled, params["wc"]) + params["bc"]


if __name__ == "__main__":
    # batch=2, seq=8, 3 categorical features, embedding_dim=128 (default),
    # num_heads=4 (default), dim_feedforward=2048 (default), num_classes=5.
    B, S, D, H, FF, C = 2, 8, 128, 4, 2048, 5
    emb_sizes = [11, 7, 13]

    key = jax.random.PRNGKey(0)
    keys = jax.random.split(key, 64)
    _ki = iter(keys)

    def nrm(shape, scale=0.05):
        return (scale * jax.random.normal(next(_ki), shape)).astype(jnp.float32)

    params = {
        "embeddings": [nrm((sz, D), 1.0) for sz in emb_sizes],
        "wq": nrm((D, D)), "bq": nrm((1, D)),
        "wk": nrm((D, D)), "bk": nrm((1, D)),
        "wv": nrm((D, D)), "bv": nrm((1, D)),
        "wo": nrm((D, D)), "bo": nrm((1, D)),
        "g1": jnp.ones((1, D), jnp.float32), "be1": jnp.zeros((1, D), jnp.float32),
        "w1": nrm((D, FF)), "b1": nrm((1, FF)),
        "w2": nrm((FF, D)), "b2": nrm((1, D)),
        "g2": jnp.ones((1, D), jnp.float32), "be2": jnp.zeros((1, D), jnp.float32),
        "wc": nrm((D, C)), "bc": nrm((1, C)),
    }

    xkeys = jax.random.split(jax.random.PRNGKey(1), len(emb_sizes))
    cols = [jax.random.randint(xkeys[i], (B, S, 1), 0, sz)
            for i, sz in enumerate(emb_sizes)]
    x_idx = jnp.concatenate(cols, axis=-1).astype(jnp.int32)   # (B, S, num_features)

    # One-time weight packing (hoisted out of the per-call path).
    packed, meta = prepare_params(params, num_heads=H)
    packed = jax.tree_util.tree_map(jax.block_until_ready, packed)

    logits = transformer_forward(x_idx, packed, meta)
    logits = jax.block_until_ready(logits)
    assert logits.shape == (B, C), logits.shape

    # Strict check vs a reference that mirrors the kernel's bf16 matmul casting
    # (approx-reciprocal softmax denominator is the only unmirrored piece).
    ref_bf16 = reference_forward(x_idx, params, num_heads=H, mm_dtype=jnp.bfloat16)
    err_bf16 = float(jnp.max(jnp.abs(logits - ref_bf16)))
    if err_bf16 > 1e-2:
        raise ValueError(f"Pallas kernel mismatch vs bf16-matmul reference: {err_bf16}")

    # Loose sanity check vs the full-f32 reference (covers bf16 weight rounding).
    ref_f32 = reference_forward(x_idx, params, num_heads=H, mm_dtype=jnp.float32)
    err_f32 = float(jnp.max(jnp.abs(logits - ref_f32)))
    if err_f32 > 5e-2:
        raise ValueError(f"Pallas kernel mismatch vs f32 reference: {err_f32}")

    print("KERNEL_OK")
</pallas_src>

<mosaic_0001>
module attributes {stable_mosaic.version = 11 : i64} {
  func.func @_transformer_kernel(%arg0: memref<16x3xi32, #tpu.memory_space<vmem>>, %arg1: memref<128x128xbf16, #tpu.memory_space<vmem>>, %arg2: memref<128x384xbf16, #tpu.memory_space<vmem>>, %arg3: memref<1x384xf32, #tpu.memory_space<vmem>>, %arg4: memref<128x128xbf16, #tpu.memory_space<vmem>>, %arg5: memref<1x128xf32, #tpu.memory_space<vmem>>, %arg6: memref<1x128xf32, #tpu.memory_space<vmem>>, %arg7: memref<1x128xf32, #tpu.memory_space<vmem>>, %arg8: memref<128x2048xbf16, #tpu.memory_space<any>>, %arg9: memref<1x2048xf32, #tpu.memory_space<vmem>>, %arg10: memref<2048x128xbf16, #tpu.memory_space<any>>, %arg11: memref<1x128xf32, #tpu.memory_space<vmem>>, %arg12: memref<1x128xf32, #tpu.memory_space<vmem>>, %arg13: memref<1x128xf32, #tpu.memory_space<vmem>>, %arg14: memref<128x128xbf16, #tpu.memory_space<vmem>>, %arg15: memref<1x128xf32, #tpu.memory_space<vmem>>, %arg16: memref<2x128xf32, #tpu.memory_space<vmem>>, %arg17: memref<128x2048xbf16, #tpu.memory_space<vmem>>, %arg18: memref<2048x128xbf16, #tpu.memory_space<vmem>>, %arg19: memref<2x!tpu.dma_semaphore, #tpu.memory_space<semaphore_mem>>) attributes {dimension_semantics = [], scalar_prefetch = 0 : i64, scratch_operands = 3 : i64, tpu.core_type = #tpu.core_type<tc>} {
    %c0_i32 = arith.constant 0 : i32
    %0 = tpu.memref_slice %arg19[%c0_i32] : memref<2x!tpu.dma_semaphore, #tpu.memory_space<semaphore_mem>> -> memref<1x!tpu.dma_semaphore, #tpu.memory_space<semaphore_mem>>
    %1 = tpu.memref_squeeze %0 : memref<1x!tpu.dma_semaphore, #tpu.memory_space<semaphore_mem>> -> memref<!tpu.dma_semaphore, #tpu.memory_space<semaphore_mem>>
    tpu.enqueue_dma source(%arg8 : memref<128x2048xbf16, #tpu.memory_space<any>>) target(%arg17 : memref<128x2048xbf16, #tpu.memory_space<vmem>>) target_semaphore(%1 : memref<!tpu.dma_semaphore, #tpu.memory_space<semaphore_mem>>)
    %c1_i32 = arith.constant 1 : i32
    %2 = tpu.memref_slice %arg19[%c1_i32] : memref<2x!tpu.dma_semaphore, #tpu.memory_space<semaphore_mem>> -> memref<1x!tpu.dma_semaphore, #tpu.memory_space<semaphore_mem>>
    %3 = tpu.memref_squeeze %2 : memref<1x!tpu.dma_semaphore, #tpu.memory_space<semaphore_mem>> -> memref<!tpu.dma_semaphore, #tpu.memory_space<semaphore_mem>>
    tpu.enqueue_dma source(%arg10 : memref<2048x128xbf16, #tpu.memory_space<any>>) target(%arg18 : memref<2048x128xbf16, #tpu.memory_space<vmem>>) target_semaphore(%3 : memref<!tpu.dma_semaphore, #tpu.memory_space<semaphore_mem>>)
    %c0 = arith.constant 0 : index
    %c0_0 = arith.constant 0 : index
    %4 = vector.load %arg0[%c0, %c0_0] : memref<16x3xi32, #tpu.memory_space<vmem>>, vector<16x3xi32>
    %5 = tpu.iota {dimensions = array<i32: 1>} : vector<16x128xi32>
    %cst = arith.constant 0.000000e+00 : f32
    %6 = vector.broadcast %cst : f32 to vector<16x128xf32>
    %7 = vector.extract_strided_slice %4 {offsets = [0, 0], sizes = [16, 1], strides = [1, 1]} : vector<16x3xi32> to vector<16x1xi32>
    %c0_i32_1 = arith.constant 0 : i32
    %c10_i32 = arith.constant 10 : i32
    %8 = vector.broadcast %c0_i32_1 : i32 to vector<16x1xi32>
    %9 = arith.maxsi %8, %7 : vector<16x1xi32>
    %10 = vector.broadcast %c10_i32 : i32 to vector<16x1xi32>
    %11 = arith.minsi %10, %9 : vector<16x1xi32>
    %c0_i32_2 = arith.constant 0 : i32
    %12 = vector.broadcast %c0_i32_2 : i32 to vector<16x1xi32>
    %13 = arith.addi %11, %12 : vector<16x1xi32>
    %14 = vector.broadcast %13 : vector<16x1xi32> to vector<16x128xi32>
    %15 = arith.cmpi eq, %5, %14 : vector<16x128xi32>
    %16 = arith.extui %15 : vector<16x128xi1> to vector<16x128xi32>
    %17 = arith.sitofp %16 : vector<16x128xi32> to vector<16x128xf32>
    %18 = arith.addf %6, %17 : vector<16x128xf32>
    %19 = vector.extract_strided_slice %4 {offsets = [0, 1], sizes = [16, 1], strides = [1, 1]} : vector<16x3xi32> to vector<16x1xi32>
    %c0_i32_3 = arith.constant 0 : i32
    %c6_i32 = arith.constant 6 : i32
    %20 = vector.broadcast %c0_i32_3 : i32 to vector<16x1xi32>
    %21 = arith.maxsi %20, %19 : vector<16x1xi32>
    %22 = vector.broadcast %c6_i32 : i32 to vector<16x1xi32>
    %23 = arith.minsi %22, %21 : vector<16x1xi32>
    %c11_i32 = arith.constant 11 : i32
    %24 = vector.broadcast %c11_i32 : i32 to vector<16x1xi32>
    %25 = arith.addi %23, %24 : vector<16x1xi32>
    %26 = vector.broadcast %25 : vector<16x1xi32> to vector<16x128xi32>
    %27 = arith.cmpi eq, %5, %26 : vector<16x128xi32>
    %28 = arith.extui %27 : vector<16x128xi1> to vector<16x128xi32>
    %29 = arith.sitofp %28 : vector<16x128xi32> to vector<16x128xf32>
    %30 = arith.addf %18, %29 : vector<16x128xf32>
    %31 = vector.extract_strided_slice %4 {offsets = [0, 2], sizes = [16, 1], strides = [1, 1]} : vector<16x3xi32> to vector<16x1xi32>
    %c0_i32_4 = arith.constant 0 : i32
    %c12_i32 = arith.constant 12 : i32
    %32 = vector.broadcast %c0_i32_4 : i32 to vector<16x1xi32>
    %33 = arith.maxsi %32, %31 : vector<16x1xi32>
    %34 = vector.broadcast %c12_i32 : i32 to vector<16x1xi32>
    %35 = arith.minsi %34, %33 : vector<16x1xi32>
    %c18_i32 = arith.constant 18 : i32
    %36 = vector.broadcast %c18_i32 : i32 to vector<16x1xi32>
    %37 = arith.addi %35, %36 : vector<16x1xi32>
    %38 = vector.broadcast %37 : vector<16x1xi32> to vector<16x128xi32>
    %39 = arith.cmpi eq, %5, %38 : vector<16x128xi32>
    %40 = arith.extui %39 : vector<16x128xi1> to vector<16x128xi32>
    %41 = arith.sitofp %40 : vector<16x128xi32> to vector<16x128xf32>
    %42 = arith.addf %30, %41 : vector<16x128xf32>
    %43 = arith.truncf %42 : vector<16x128xf32> to vector<16x128xbf16>
    %c0_5 = arith.constant 0 : index
    %c0_6 = arith.constant 0 : index
    %44 = vector.load %arg1[%c0_5, %c0_6] : memref<128x128xbf16, #tpu.memory_space<vmem>>, vector<128x128xbf16>
    %cst_7 = arith.constant dense<0.000000e+00> : vector<16x128xf32>
    %45 = tpu.matmul %43, %44, %cst_7 {dimension_numbers = #tpu.dot_dimension_numbers<[1], [0], [0], [1], [0, 0, 1, 1], [], []>} : vector<16x128xbf16>, vector<128x128xbf16>, vector<16x128xf32> -> vector<16x128xf32>
    %46 = arith.truncf %45 : vector<16x128xf32> to vector<16x128xbf16>
    %c0_8 = arith.constant 0 : index
    %c0_9 = arith.constant 0 : index
    %47 = vector.load %arg2[%c0_8, %c0_9] : memref<128x384xbf16, #tpu.memory_space<vmem>>, vector<128x384xbf16>
    %cst_10 = arith.constant dense<0.000000e+00> : vector<16x384xf32>
    %48 = tpu.matmul %46, %47, %cst_10 {dimension_numbers = #tpu.dot_dimension_numbers<[1], [0], [0], [1], [0, 0, 1, 1], [], []>} : vector<16x128xbf16>, vector<128x384xbf16>, vector<16x384xf32> -> vector<16x384xf32>
    %c0_11 = arith.constant 0 : index
    %c0_12 = arith.constant 0 : index
    %49 = vector.load %arg3[%c0_11, %c0_12] : memref<1x384xf32, #tpu.memory_space<vmem>>, vector<1x384xf32>
    %50 = vector.broadcast %49 : vector<1x384xf32> to vector<16x384xf32>
    %51 = arith.addf %48, %50 : vector<16x384xf32>
    %52 = vector.extract_strided_slice %51 {offsets = [0, 0], sizes = [16, 128], strides = [1, 1]} : vector<16x384xf32> to vector<16x128xf32>
    %53 = vector.shape_cast %52 : vector<16x128xf32> to vector<16x4x32xf32>
    %54 = tpu.transpose %53, [1, 0, 2] : vector<16x4x32xf32> -> vector<4x16x32xf32>
    %55 = arith.truncf %54 : vector<4x16x32xf32> to vector<4x16x32xbf16>
    %56 = vector.extract_strided_slice %51 {offsets = [0, 128], sizes = [16, 128], strides = [1, 1]} : vector<16x384xf32> to vector<16x128xf32>
    %57 = vector.shape_cast %56 : vector<16x128xf32> to vector<16x4x32xf32>
    %58 = tpu.transpose %57, [1, 0, 2] : vector<16x4x32xf32> -> vector<4x16x32xf32>
    %59 = arith.truncf %58 : vector<4x16x32xf32> to vector<4x16x32xbf16>
    %60 = vector.extract_strided_slice %51 {offsets = [0, 256], sizes = [16, 128], strides = [1, 1]} : vector<16x384xf32> to vector<16x128xf32>
    %61 = vector.shape_cast %60 : vector<16x128xf32> to vector<16x4x32xf32>
    %62 = tpu.transpose %61, [1, 0, 2] : vector<16x4x32xf32> -> vector<4x16x32xf32>
    %63 = arith.truncf %62 : vector<4x16x32xf32> to vector<4x16x32xbf16>
    "tpu.trace_start"() <{level = 10 : i32, message = "hqd,hkd->hqk"}> : () -> ()
    %cst_13 = arith.constant dense<0.000000e+00> : vector<4x16x16xf32>
    %64 = tpu.matmul %55, %59, %cst_13 {dimension_numbers = #tpu.dot_dimension_numbers<[2], [2], [1], [1], [0, 0, 0, 1, 1, 1], [0], [0]>} : vector<4x16x32xbf16>, vector<4x16x32xbf16>, vector<4x16x16xf32> -> vector<4x16x16xf32>
    "tpu.trace_stop"() : () -> ()
    %65 = tpu.iota {dimensions = array<i32: 0>} : vector<16x16xi32>
    %c8_i32 = arith.constant 8 : i32
    %c0_i32_14 = arith.constant 0 : i32
    %66 = arith.cmpi eq, %c8_i32, %c0_i32_14 : i32
    %c1_i32_15 = arith.constant 1 : i32
    %67 = arith.select %66, %c1_i32_15, %c8_i32 : i32
    %68 = vector.broadcast %67 : i32 to vector<16x16xi32>
    %69 = arith.remsi %65, %68 : vector<16x16xi32>
    %c0_i32_16 = arith.constant 0 : i32
    %70 = vector.broadcast %c0_i32_16 : i32 to vector<16x16xi32>
    %71 = arith.cmpi ne, %69, %70 : vector<16x16xi32>
    %c0_i32_17 = arith.constant 0 : i32
    %72 = vector.broadcast %c0_i32_17 : i32 to vector<16x16xi32>
    %73 = arith.cmpi slt, %69, %72 : vector<16x16xi32>
    %c0_i32_18 = arith.constant 0 : i32
    %74 = arith.cmpi slt, %67, %c0_i32_18 : i32
    %75 = vector.broadcast %74 : i1 to vector<16x16xi1>
    %76 = vector.broadcast %75 : vector<16x16xi1> to vector<16x16xi1>
    %77 = arith.xori %73, %76 : vector<16x16xi1>
    %78 = arith.andi %77, %71 : vector<16x16xi1>
    %79 = vector.broadcast %67 : i32 to vector<16x16xi32>
    %80 = arith.addi %69, %79 : vector<16x16xi32>
    %81 = arith.select %78, %80, %69 : vector<16x16xi1>, vector<16x16xi32>
    %82 = tpu.iota {dimensions = array<i32: 1>} : vector<16x16xi32>
    %c8_i32_19 = arith.constant 8 : i32
    %c0_i32_20 = arith.constant 0 : i32
    %83 = arith.cmpi eq, %c8_i32_19, %c0_i32_20 : i32
    %c1_i32_21 = arith.constant 1 : i32
    %84 = arith.select %83, %c1_i32_21, %c8_i32_19 : i32
    %85 = vector.broadcast %84 : i32 to vector<16x16xi32>
    %86 = arith.remsi %82, %85 : vector<16x16xi32>
    %c0_i32_22 = arith.constant 0 : i32
    %87 = vector.broadcast %c0_i32_22 : i32 to vector<16x16xi32>
    %88 = arith.cmpi ne, %86, %87 : vector<16x16xi32>
    %c0_i32_23 = arith.constant 0 : i32
    %89 = vector.broadcast %c0_i32_23 : i32 to vector<16x16xi32>
    %90 = arith.cmpi slt, %86, %89 : vector<16x16xi32>
    %c0_i32_24 = arith.constant 0 : i32
    %91 = arith.cmpi slt, %84, %c0_i32_24 : i32
    %92 = vector.broadcast %91 : i1 to vector<16x16xi1>
    %93 = vector.broadcast %92 : vector<16x16xi1> to vector<16x16xi1>
    %94 = arith.xori %90, %93 : vector<16x16xi1>
    %95 = arith.andi %94, %88 : vector<16x16xi1>
    %96 = vector.broadcast %84 : i32 to vector<16x16xi32>
    %97 = arith.addi %86, %96 : vector<16x16xi32>
    %98 = arith.select %95, %97, %86 : vector<16x16xi1>, vector<16x16xi32>
    %99 = arith.cmpi eq, %81, %98 : vector<16x16xi32>
    %cst_25 = arith.constant 0.000000e+00 : f32
    %cst_26 = arith.constant -1.000000e+30 : f32
    %100 = vector.broadcast %cst_25 : f32 to vector<16x16xf32>
    %101 = vector.broadcast %cst_26 : f32 to vector<16x16xf32>
    %102 = arith.select %99, %100, %101 : vector<16x16xi1>, vector<16x16xf32>
    %103 = vector.shape_cast %102 : vector<16x16xf32> to vector<1x16x16xf32>
    %104 = vector.broadcast %103 : vector<1x16x16xf32> to vector<4x16x16xf32>
    %105 = arith.addf %64, %104 : vector<4x16x16xf32>
    %cst_27 = arith.constant dense<0xFF800000> : vector<4x16xf32>
    %106 = vector.multi_reduction <maximumf>, %105, %cst_27 [2] : vector<4x16x16xf32> to vector<4x16xf32>
    %107 = vector.shape_cast %106 : vector<4x16xf32> to vector<4x16x1xf32>
    %108 = vector.broadcast %107 : vector<4x16x1xf32> to vector<4x16x16xf32>
    %109 = arith.subf %105, %108 : vector<4x16x16xf32>
    %110 = math.exp %109 : vector<4x16x16xf32>
    %cst_28 = arith.constant dense<0.000000e+00> : vector<4x16xf32>
    %111 = vector.multi_reduction <add>, %110, %cst_28 [2] : vector<4x16x16xf32> to vector<4x16xf32>
    %112 = vector.shape_cast %111 : vector<4x16xf32> to vector<4x16x1xf32>
    %113 = tpu.reciprocal %112 {approx = true} : vector<4x16x1xf32> -> vector<4x16x1xf32>
    %114 = vector.broadcast %113 : vector<4x16x1xf32> to vector<4x16x16xf32>
    %115 = arith.mulf %110, %114 : vector<4x16x16xf32>
    %116 = arith.truncf %115 : vector<4x16x16xf32> to vector<4x16x16xbf16>
    "tpu.trace_start"() <{level = 10 : i32, message = "hqk,hkd->hqd"}> : () -> ()
    %cst_29 = arith.constant dense<0.000000e+00> : vector<4x16x32xf32>
    %117 = tpu.matmul %116, %63, %cst_29 {dimension_numbers = #tpu.dot_dimension_numbers<[2], [1], [1], [2], [0, 0, 0, 1, 1, 2], [0], [0]>} : vector<4x16x16xbf16>, vector<4x16x32xbf16>, vector<4x16x32xf32> -> vector<4x16x32xf32>
    "tpu.trace_stop"() : () -> ()
    %118 = tpu.transpose %117, [1, 0, 2] : vector<4x16x32xf32> -> vector<16x4x32xf32>
    %119 = vector.shape_cast %118 : vector<16x4x32xf32> to vector<16x128xf32>
    %120 = arith.truncf %119 : vector<16x128xf32> to vector<16x128xbf16>
    %c0_30 = arith.constant 0 : index
    %c0_31 = arith.constant 0 : index
    %121 = vector.load %arg4[%c0_30, %c0_31] : memref<128x128xbf16, #tpu.memory_space<vmem>>, vector<128x128xbf16>
    %cst_32 = arith.constant dense<0.000000e+00> : vector<16x128xf32>
    %122 = tpu.matmul %120, %121, %cst_32 {dimension_numbers = #tpu.dot_dimension_numbers<[1], [0], [0], [1], [0, 0, 1, 1], [], []>} : vector<16x128xbf16>, vector<128x128xbf16>, vector<16x128xf32> -> vector<16x128xf32>
    %c0_33 = arith.constant 0 : index
    %c0_34 = arith.constant 0 : index
    %123 = vector.load %arg5[%c0_33, %c0_34] : memref<1x128xf32, #tpu.memory_space<vmem>>, vector<1x128xf32>
    %124 = vector.broadcast %123 : vector<1x128xf32> to vector<16x128xf32>
    %125 = arith.addf %122, %124 : vector<16x128xf32>
    %126 = arith.addf %45, %125 : vector<16x128xf32>
    %c0_35 = arith.constant 0 : index
    %c0_36 = arith.constant 0 : index
    %127 = vector.load %arg6[%c0_35, %c0_36] : memref<1x128xf32, #tpu.memory_space<vmem>>, vector<1x128xf32>
    %c0_37 = arith.constant 0 : index
    %c0_38 = arith.constant 0 : index
    %128 = vector.load %arg7[%c0_37, %c0_38] : memref<1x128xf32, #tpu.memory_space<vmem>>, vector<1x128xf32>
    %cst_39 = arith.constant dense<0.000000e+00> : vector<16xf32>
    %129 = vector.multi_reduction <add>, %126, %cst_39 [1] : vector<16x128xf32> to vector<16xf32>
    %130 = vector.shape_cast %129 : vector<16xf32> to vector<16x1xf32>
    %cst_40 = arith.constant 1.280000e+02 : f32
    %131 = vector.broadcast %cst_40 : f32 to vector<16x1xf32>
    %132 = arith.divf %130, %131 : vector<16x1xf32>
    %133 = vector.broadcast %132 : vector<16x1xf32> to vector<16x128xf32>
    %134 = arith.subf %126, %133 : vector<16x128xf32>
    %135 = arith.mulf %134, %134 : vector<16x128xf32>
    %cst_41 = arith.constant dense<0.000000e+00> : vector<16xf32>
    %136 = vector.multi_reduction <add>, %135, %cst_41 [1] : vector<16x128xf32> to vector<16xf32>
    %137 = vector.shape_cast %136 : vector<16xf32> to vector<16x1xf32>
    %cst_42 = arith.constant 1.280000e+02 : f32
    %138 = vector.broadcast %cst_42 : f32 to vector<16x1xf32>
    %139 = arith.divf %137, %138 : vector<16x1xf32>
    %140 = vector.broadcast %132 : vector<16x1xf32> to vector<16x128xf32>
    %141 = arith.subf %126, %140 : vector<16x128xf32>
    %cst_43 = arith.constant 9.99999974E-6 : f32
    %142 = vector.broadcast %cst_43 : f32 to vector<16x1xf32>
    %143 = arith.addf %139, %142 : vector<16x1xf32>
    %144 = math.rsqrt %143 : vector<16x1xf32>
    %145 = vector.broadcast %144 : vector<16x1xf32> to vector<16x128xf32>
    %146 = arith.mulf %141, %145 : vector<16x128xf32>
    %147 = vector.broadcast %127 : vector<1x128xf32> to vector<16x128xf32>
    %148 = arith.mulf %146, %147 : vector<16x128xf32>
    %149 = vector.broadcast %128 : vector<1x128xf32> to vector<16x128xf32>
    %150 = arith.addf %148, %149 : vector<16x128xf32>
    %c0_i32_44 = arith.constant 0 : i32
    %151 = tpu.memref_slice %arg19[%c0_i32_44] : memref<2x!tpu.dma_semaphore, #tpu.memory_space<semaphore_mem>> -> memref<1x!tpu.dma_semaphore, #tpu.memory_space<semaphore_mem>>
    %152 = tpu.memref_squeeze %151 : memref<1x!tpu.dma_semaphore, #tpu.memory_space<semaphore_mem>> -> memref<!tpu.dma_semaphore, #tpu.memory_space<semaphore_mem>>
    tpu.wait_dma2 semaphore(%152 : memref<!tpu.dma_semaphore, #tpu.memory_space<semaphore_mem>>) src(%arg8 : memref<128x2048xbf16, #tpu.memory_space<any>>) dst(%arg17 : memref<128x2048xbf16, #tpu.memory_space<vmem>>)
    %153 = arith.truncf %150 : vector<16x128xf32> to vector<16x128xbf16>
    %c0_45 = arith.constant 0 : index
    %c0_46 = arith.constant 0 : index
    %154 = vector.load %arg17[%c0_45, %c0_46] : memref<128x2048xbf16, #tpu.memory_space<vmem>>, vector<128x2048xbf16>
    %cst_47 = arith.constant dense<0.000000e+00> : vector<16x2048xf32>
    %155 = tpu.matmul %153, %154, %cst_47 {dimension_numbers = #tpu.dot_dimension_numbers<[1], [0], [0], [1], [0, 0, 1, 1], [], []>} : vector<16x128xbf16>, vector<128x2048xbf16>, vector<16x2048xf32> -> vector<16x2048xf32>
    %c0_48 = arith.constant 0 : index
    %c0_49 = arith.constant 0 : index
    %156 = vector.load %arg9[%c0_48, %c0_49] : memref<1x2048xf32, #tpu.memory_space<vmem>>, vector<1x2048xf32>
    %157 = vector.broadcast %156 : vector<1x2048xf32> to vector<16x2048xf32>
    %158 = arith.addf %155, %157 : vector<16x2048xf32>
    %cst_50 = arith.constant 0.000000e+00 : f32
    %159 = vector.broadcast %cst_50 : f32 to vector<16x2048xf32>
    %160 = arith.maximumf %158, %159 : vector<16x2048xf32>
    %c1_i32_51 = arith.constant 1 : i32
    %161 = tpu.memref_slice %arg19[%c1_i32_51] : memref<2x!tpu.dma_semaphore, #tpu.memory_space<semaphore_mem>> -> memref<1x!tpu.dma_semaphore, #tpu.memory_space<semaphore_mem>>
    %162 = tpu.memref_squeeze %161 : memref<1x!tpu.dma_semaphore, #tpu.memory_space<semaphore_mem>> -> memref<!tpu.dma_semaphore, #tpu.memory_space<semaphore_mem>>
    tpu.wait_dma2 semaphore(%162 : memref<!tpu.dma_semaphore, #tpu.memory_space<semaphore_mem>>) src(%arg10 : memref<2048x128xbf16, #tpu.memory_space<any>>) dst(%arg18 : memref<2048x128xbf16, #tpu.memory_space<vmem>>)
    %163 = arith.truncf %160 : vector<16x2048xf32> to vector<16x2048xbf16>
    %c0_52 = arith.constant 0 : index
    %c0_53 = arith.constant 0 : index
    %164 = vector.load %arg18[%c0_52, %c0_53] : memref<2048x128xbf16, #tpu.memory_space<vmem>>, vector<2048x128xbf16>
    %cst_54 = arith.constant dense<0.000000e+00> : vector<16x128xf32>
    %165 = tpu.matmul %163, %164, %cst_54 {dimension_numbers = #tpu.dot_dimension_numbers<[1], [0], [0], [1], [0, 0, 1, 1], [], []>} : vector<16x2048xbf16>, vector<2048x128xbf16>, vector<16x128xf32> -> vector<16x128xf32>
    %c0_55 = arith.constant 0 : index
    %c0_56 = arith.constant 0 : index
    %166 = vector.load %arg11[%c0_55, %c0_56] : memref<1x128xf32, #tpu.memory_space<vmem>>, vector<1x128xf32>
    %167 = vector.broadcast %166 : vector<1x128xf32> to vector<16x128xf32>
    %168 = arith.addf %165, %167 : vector<16x128xf32>
    %169 = arith.addf %150, %168 : vector<16x128xf32>
    %c0_57 = arith.constant 0 : index
    %c0_58 = arith.constant 0 : index
    %170 = vector.load %arg12[%c0_57, %c0_58] : memref<1x128xf32, #tpu.memory_space<vmem>>, vector<1x128xf32>
    %c0_59 = arith.constant 0 : index
    %c0_60 = arith.constant 0 : index
    %171 = vector.load %arg13[%c0_59, %c0_60] : memref<1x128xf32, #tpu.memory_space<vmem>>, vector<1x128xf32>
    %cst_61 = arith.constant dense<0.000000e+00> : vector<16xf32>
    %172 = vector.multi_reduction <add>, %169, %cst_61 [1] : vector<16x128xf32> to vector<16xf32>
    %173 = vector.shape_cast %172 : vector<16xf32> to vector<16x1xf32>
    %cst_62 = arith.constant 1.280000e+02 : f32
    %174 = vector.broadcast %cst_62 : f32 to vector<16x1xf32>
    %175 = arith.divf %173, %174 : vector<16x1xf32>
    %176 = vector.broadcast %175 : vector<16x1xf32> to vector<16x128xf32>
    %177 = arith.subf %169, %176 : vector<16x128xf32>
    %178 = arith.mulf %177, %177 : vector<16x128xf32>
    %cst_63 = arith.constant dense<0.000000e+00> : vector<16xf32>
    %179 = vector.multi_reduction <add>, %178, %cst_63 [1] : vector<16x128xf32> to vector<16xf32>
    %180 = vector.shape_cast %179 : vector<16xf32> to vector<16x1xf32>
    %cst_64 = arith.constant 1.280000e+02 : f32
    %181 = vector.broadcast %cst_64 : f32 to vector<16x1xf32>
    %182 = arith.divf %180, %181 : vector<16x1xf32>
    %183 = vector.broadcast %175 : vector<16x1xf32> to vector<16x128xf32>
    %184 = arith.subf %169, %183 : vector<16x128xf32>
    %cst_65 = arith.constant 9.99999974E-6 : f32
    %185 = vector.broadcast %cst_65 : f32 to vector<16x1xf32>
    %186 = arith.addf %182, %185 : vector<16x1xf32>
    %187 = math.rsqrt %186 : vector<16x1xf32>
    %188 = vector.broadcast %187 : vector<16x1xf32> to vector<16x128xf32>
    %189 = arith.mulf %184, %188 : vector<16x128xf32>
    %190 = vector.broadcast %170 : vector<1x128xf32> to vector<16x128xf32>
    %191 = arith.mulf %189, %190 : vector<16x128xf32>
    %192 = vector.broadcast %171 : vector<1x128xf32> to vector<16x128xf32>
    %193 = arith.addf %191, %192 : vector<16x128xf32>
    %194 = vector.shape_cast %193 : vector<16x128xf32> to vector<2x8x128xf32>
    %cst_66 = arith.constant dense<0.000000e+00> : vector<2x128xf32>
    %195 = vector.multi_reduction <add>, %194, %cst_66 [1] : vector<2x8x128xf32> to vector<2x128xf32>
    %cst_67 = arith.constant 8.000000e+00 : f32
    %196 = vector.broadcast %cst_67 : f32 to vector<2x128xf32>
    %197 = arith.divf %195, %196 : vector<2x128xf32>
    %198 = arith.truncf %197 : vector<2x128xf32> to vector<2x128xbf16>
    %c0_68 = arith.constant 0 : index
    %c0_69 = arith.constant 0 : index
    %199 = vector.load %arg14[%c0_68, %c0_69] : memref<128x128xbf16, #tpu.memory_space<vmem>>, vector<128x128xbf16>
    %cst_70 = arith.constant dense<0.000000e+00> : vector<2x128xf32>
    %200 = tpu.matmul %198, %199, %cst_70 {dimension_numbers = #tpu.dot_dimension_numbers<[1], [0], [0], [1], [0, 0, 1, 1], [], []>} : vector<2x128xbf16>, vector<128x128xbf16>, vector<2x128xf32> -> vector<2x128xf32>
    %c0_71 = arith.constant 0 : index
    %c0_72 = arith.constant 0 : index
    %201 = vector.load %arg15[%c0_71, %c0_72] : memref<1x128xf32, #tpu.memory_space<vmem>>, vector<1x128xf32>
    %202 = vector.broadcast %201 : vector<1x128xf32> to vector<2x128xf32>
    %203 = arith.addf %200, %202 : vector<2x128xf32>
    %c0_73 = arith.constant 0 : index
    %c0_74 = arith.constant 0 : index
    %204 = vector.load %arg16[%c0_73, %c0_74] : memref<2x128xf32, #tpu.memory_space<vmem>>, vector<2x128xf32>
    tpu.vector_store %arg16[%c0_73, %c0_74], %203 {strides = array<i32>} : memref<2x128xf32, #tpu.memory_space<vmem>>, vector<2x128xf32>,
    return
  }
}

</mosaic_0001>

<bundles_post_ra>
// kernel: tpu_custom_call.1
= control target key start
LH: loop header
LB: loop body
LE: loop exit
PB: predicated region body
PF: predicated region fallthrough
CT: control target
= control target key end

     0   :  { %s7113_s0 = inlined_call_operand.vmem [shape: s32[16,3], index: 0, kind: input, shape index: {}]   ;;  %s7114_s1 = inlined_call_operand.hbm [shape: bf16[128,128], index: 1, kind: input, shape index: {}]   ;;  %s7115_s2 = inlined_call_operand.hbm [shape: bf16[128,384], index: 2, kind: input, shape index: {}]   ;;  %s7116_s3 = inlined_call_operand.vmem [shape: f32[1,384], index: 3, kind: input, shape index: {}]   ;;  %s7117_s4 = inlined_call_operand.hbm [shape: bf16[128,128], index: 4, kind: input, shape index: {}]   ;;  %s7118_s5 = inlined_call_operand.vmem [shape: f32[1,128], index: 5, kind: input, shape index: {}]   ;;  %s7119_s6 = inlined_call_operand.vmem [shape: f32[1,128], index: 6, kind: input, shape index: {}]   ;;  %s7120_s7 = inlined_call_operand.vmem [shape: f32[1,128], index: 7, kind: input, shape index: {}]   ;;  %s7121_s8 = inlined_call_operand.hbm [shape: bf16[128,2048], index: 8, kind: input, shape index: {}]   ;;  %s7122_s9 = inlined_call_operand.vmem [shape: f32[1,2048], index: 9, kind: input, shape index: {}]   ;;  %s7123_s10 = inlined_call_operand.hbm [shape: bf16[2048,128], index: 10, kind: input, shape index: {}]   ;;  %s7124_s11 = inlined_call_operand.vmem [shape: f32[1,128], index: 11, kind: input, shape index: {}]   ;;  %s7125_s12 = inlined_call_operand.vmem [shape: f32[1,128], index: 12, kind: input, shape index: {}]   ;;  %s7126_s13 = inlined_call_operand.vmem [shape: f32[1,128], index: 13, kind: input, shape index: {}]   ;;  %s7127_s14 = inlined_call_operand.hbm [shape: bf16[128,128], index: 14, kind: input, shape index: {}]   ;;  %s7128_s15 = inlined_call_operand.vmem [shape: f32[1,128], index: 15, kind: input, shape index: {}]   ;;  %s7129_s16 = inlined_call_operand.hbm [shape: f32[2,128], index: 16, kind: output, shape index: {}]  }
   0x1   :  { %7133 = sst [smem:[#allocation26_spill]] %s7113_s0 }
   0x2   :  { %21 = vsyncpa [#allocation6], 0 }
   0x3   :  { %22 = vsyncpa [#allocation9], 0 }
   0x4   :  { %23 = vsyncpa [#allocation12], 0 }
   0x5   :  { %24 = vsyncpa [#allocation7], 0  ;;  %s6348_s21 = smov [#allocation8]  }
   0x6   :  { %s44_s22 = sshll.u32 %s6348_s21, 4  ;;  %s45_s22 = int_to_ptr.vmem [resolvable:$true] %s44_s22 }
   0x7   :  { %s6204_s23 = scalar_lea.vmem %s45_s22, 3072  ;;  %p6209_p1 = scmp.lt.s32.totalorder %s45_s22, %s45_s22 }
   0x8   :  { %p6205_p0 = scmp.ne.s32.totalorder %s45_s22, %s6204_s23  ;;  %p6210_p2 = scmp.lt.s32.totalorder %s6204_s23, %s6204_s23 }
   0xa   :  { %p6211_p3 = por %p6210_p2, %p6209_p1 }
   0xc   :  { %p6212_p4 = pnand %p6211_p3, %p6205_p0 }
   0xe   :  { %6215 = shalt.err (!%p6212_p4)
}
   0xf   :  { %s6349_s24 = smov 192   ;;  %s6350_s25 = smov 12  }
  0x10   :  { %50 = dma.hbm_to_vmem [thread:$0]  %s7115_s2, 3072, %s45_s22, [#allocation9], %s6349_s24, %s6349_s24, %s6350_s25  }
  0x11   :  { %s6351_s28 = smov [#allocation5]  }
  0x12   :  { %s32_s29 = sshll.u32 %s6351_s28, 4  ;;  %s33_s29 = int_to_ptr.vmem [resolvable:$true] %s32_s29 }
  0x13   :  { %s6224_s30 = scalar_lea.vmem %s33_s29, 1024  ;;  %p6229_p6 = scmp.lt.s32.totalorder %s33_s29, %s33_s29 }
  0x14   :  { %p6225_p5 = scmp.ne.s32.totalorder %s33_s29, %s6224_s30  ;;  %p6230_p7 = scmp.lt.s32.totalorder %s6224_s30, %s6224_s30 }
  0x16   :  { %p6231_p8 = por %p6230_p7, %p6229_p6 }
  0x18   :  { %p6232_p9 = pnand %p6231_p8, %p6225_p5 }
  0x1a   :  { %6235 = shalt.err (!%p6232_p9)
}
  0x1b   :  { %s6352_s0 = smov 64   ;;  %s6353_s17 = smov 4  }
  0x1c   :  { %38 = dma.hbm_to_vmem [thread:$0]  %s7114_s1, 1024, %s33_s29, [#allocation6], %s6352_s0, %s6352_s0, %s6353_s17  }
  0x1d   :  { %s6354_s20 = smov [#allocation10]   ;;  %s6355_s21 = smov [#allocation11]  }
  0x1e   :  { %s58_s2 = sshll.u32 %s6354_s20, 4  ;;  %s84_s22 = sshll.u32 %s6355_s21, 4  ;;  %s59_s2 = int_to_ptr.vmem [resolvable:$true] %s58_s2  ;;  %s85_s22 = int_to_ptr.vmem [resolvable:$true] %s84_s22 }
  0x1f   :  { %s6244_s23 = scalar_lea.vmem %s59_s2, 1024  ;;  %p6249_p11 = scmp.lt.s32.totalorder %s59_s2, %s59_s2 }
  0x20   :  { %p6245_p10 = scmp.ne.s32.totalorder %s59_s2, %s6244_s23  ;;  %p6250_p12 = scmp.lt.s32.totalorder %s6244_s23, %s6244_s23 }
  0x22   :  { %p6251_p13 = por %p6250_p12, %p6249_p11 }
  0x24   :  { %p6252_p0 = pnand %p6251_p13, %p6245_p10 }
  0x26   :  { %6255 = shalt.err (!%p6252_p0)
}
  0x27   :  { %64 = dma.hbm_to_vmem [thread:$0]  %s7117_s4, 1024, %s59_s2, [#allocation9], %s6352_s0, %s6352_s0, %s6353_s17  }
  0x28   :  { %s6264_s1 = scalar_lea.vmem %s85_s22, 1024  ;;  %p6269_p2 = scmp.lt.s32.totalorder %s85_s22, %s85_s22 }
  0x29   :  { %p6265_p1 = scmp.ne.s32.totalorder %s85_s22, %s6264_s1  ;;  %p6270_p3 = scmp.lt.s32.totalorder %s6264_s1, %s6264_s1 }
  0x2b   :  { %p6271_p4 = por %p6270_p3, %p6269_p2 }
  0x2d   :  { %p6272_p5 = pnand %p6271_p4, %p6265_p1 }
  0x2f   :  { %6275 = shalt.err (!%p6272_p5)
}
  0x30   :  { %90 = dma.hbm_to_vmem [thread:$0]  %s7127_s14, 1024, %s85_s22, [#allocation12], %s6352_s0, %s6352_s0, %s6353_s17  }
  0x31   :  { %6336 = dma.done.wait [#allocation6], 1024  }
  0x32   :  { %6337 = vsyncadd [#allocation6], 4294966272 }
  0x33   :  { %6338 = dma.done.wait [#allocation9], 4096  }
  0x34   :  { %6339 = vsyncadd [#allocation9], 4294963200 }
  0x35   :  { %6340 = dma.done.wait [#allocation12], 1024  }
  0x36   :  { %6341 = vsyncadd [#allocation12], 4294966272  ;;  %v6356_v0 = vmov 0   ;;  %v6357_v1 = vmov 1   ;;  %v7131_v2 = vmov 0.0   ;;  %s7134_s29 = sld [smem:[#allocation26_spill]]  ;;  %v131_v39 = vlaneseq }
  0x37   :  { %5953 = vset.pattern.permute.xlu0 %v6356_v0  ;;  %5954 = vset.pattern.permute.xlu1 %v6357_v1  ;;  %v5972_v5 = vld [vmem:[#allocation5 + $0x38] sm:$0xff]   ;;  %v5973_v6 = vld [vmem:[#allocation5 + $0x30] sm:$0xff]   ;;  %v5974_v16 = vld [vmem:[#allocation5 + $0x28] sm:$0xff]   ;;  %v6359_v21 = vmov 2   ;;  %vm6360_vm8 = vmmov 0   ;;  %s6361_s19 = smov 96  }
  0x38   :  { %5804 = vmatprep.subr.bf16.mxu0 %v7131_v2  ;;  %511 = vmatprep.mubr.bf16.mxu1 %v6356_v0  ;;  %v5975_v19 = vld [vmem:[#allocation5 + $0x20] sm:$0xff]   ;;  %v5976_v22 = vld [vmem:[#allocation5 + $0x18] sm:$0xff]   ;;  %v5977_v23 = vld [vmem:[#allocation5 + $0x10] sm:$0xff]   ;;  %v6492_v41 = vand.u32 127, %v131_v39  ;;  %vm1494_vm15 = vcmask 261120   ;;  %s6367_s21 = smov [#allocation3]  }
  0x39   :  { %5805 = vmatpush3.bf16.msra.mxu0 %v5972_v5  ;;  %5820 = vmatprep.mubr.msk.bf16.mxu0 %vm6360_vm8, %v7131_v2  ;;  %v5980_v24 = vld [vmem:[#allocation8 + $0xac] ss:$12 sps:$4 sm:$0xff]   ;;  %v5982_v25 = vld [vmem:[#allocation8 + $0xa8] ss:$12 sps:$4 sm:$0xff]   ;;  %v5986_v27 = vld [vmem:[#allocation8 + $0x90] ss:$12 sps:$4 sm:$0xff]  }
  0x3a   :  { %5806 = vmatprep.subr.bf16.mxu0 %v7131_v2  ;;  %v5984_v26 = vld [vmem:[#allocation8 + $0x94] ss:$12 sps:$4 sm:$0xff]   ;;  %479 = vmatprep.subr.bf16.mxu1 %v5980_v24  ;;  %v5978_v28 = vld [vmem:[#allocation5 + $0x8] sm:$0xff]   ;;  %v5990_v30 = vld [vmem:[#allocation8 + $0x78] ss:$12 sps:$4 sm:$0xff]   ;;  %s125_s22 = sshll.u32 %s6367_s21, 4  ;;  %s126_s22 = int_to_ptr.vmem [resolvable:$true] %s125_s22 }
  0x3b   :  { %480 = vmatpush1.bf16.msra.mxu1 %v5982_v25  ;;  %v5988_v29 = vld [vmem:[#allocation8 + $0x7c] ss:$12 sps:$4 sm:$0xff]   ;;  %v5979_v31 = vld [vmem:[#allocation5] sm:$0xff]   ;;  %v5996_v34 = vld [vmem:[#allocation8 + $0x4c] ss:$12 sps:$4 sm:$0xff]  }
  0x3c   :  { %v129_v3 = vld [vmem:[%s7134_s29] sm:$0xff]  ;;  %v130_v4 = vld [vmem:[%s7134_s29 + $0x8] sm:$0xff]  ;;  %481 = vmatprep.subr.bf16.mxu1 %v5984_v26  ;;  %v6002_v37 = vld [vmem:[#allocation8 + $0x30] ss:$12 sps:$4 sm:$0xff]  }
  0x3d   :  { %vm133_vm0 = vcmp.gt.s32.totalorder %v129_v3, 0  ;;  %vm135_vm1 = vcmp.gt.s32.totalorder %v130_v4, 0  ;;  %5807 = vmatpush3.bf16.msra.mxu0 %v5973_v6  ;;  %v5992_v32 = vld [vmem:[#allocation8 + $0x64] ss:$12 sps:$4 sm:$0xff]   ;;  %v5994_v33 = vld [vmem:[#allocation8 + $0x60] ss:$12 sps:$4 sm:$0xff]  }
  0x3e   :  { %v134_v7 = vsel %vm133_vm0, %v129_v3, 0  ;;  %v136_v8 = vsel %vm135_vm1, %v130_v4, 0  ;;  %5808 = vmatprep.subr.bf16.mxu0 %v7131_v2  ;;  %v5998_v35 = vld [vmem:[#allocation8 + $0x48] ss:$12 sps:$4 sm:$0xff]   ;;  %v5983_v57 = vld [vmem:[#allocation8 + $0xb0] ss:$12 sps:$4 sm:$0xff]  }
  0x3f   :  { %vm137_vm2 = vcmp.lt.s32.totalorder %v134_v7, 10  ;;  %vm155_vm3 = vcmp.lt.s32.totalorder %v134_v7, 6  ;;  %vm139_vm4 = vcmp.lt.s32.totalorder %v136_v8, 10  ;;  %vm157_vm5 = vcmp.lt.s32.totalorder %v136_v8, 6  ;;  %482 = vmatpush1.bf16.msra.mxu1 %v5986_v27  ;;  %v6000_v36 = vld [vmem:[#allocation8 + $0x34] ss:$12 sps:$4 sm:$0xff]  }
  0x40   :  { %v138_v9 = vsel %vm137_vm2, %v134_v7, 10  ;;  %v156_v10 = vsel %vm155_vm3, %v134_v7, 6  ;;  %v158_v11 = vsel %vm157_vm5, %v136_v8, 6  ;;  %v140_v13 = vsel %vm139_vm4, %v136_v8, 10  ;;  %483 = vmatprep.subr.bf16.mxu1 %v5988_v29  ;;  %v6004_v38 = vld [vmem:[#allocation8 + $0x1c] ss:$12 sps:$4 sm:$0xff]  }
  0x41   :  { %142 = vperm.xlu0 %5953, %v138_v9   ;;  %v159_v12 = vadd.s32 11, %v156_v10  ;;  %vm175_vm6 = vcmp.lt.s32.totalorder %v134_v7, 12  ;;  %v160_v14 = vadd.s32 11, %v158_v11  ;;  %vm177_vm7 = vcmp.lt.s32.totalorder %v136_v8, 12  ;;  %5809 = vmatpush3.bf16.msra.mxu0 %v5974_v16  ;;  %v5987_v59 = vld [vmem:[#allocation8 + $0x98] ss:$12 sps:$4 sm:$0xff]  }
  0x42   :  { %v176_v15 = vsel %vm175_vm6, %v134_v7, 12  ;;  %v178_v17 = vsel %vm177_vm7, %v136_v8, 12  ;;  %5810 = vmatprep.subr.bf16.mxu0 %v7131_v2  ;;  %v5991_v60 = vld [vmem:[#allocation8 + $0x80] ss:$12 sps:$4 sm:$0xff]   ;;  %v5995_v61 = vld [vmem:[#allocation8 + $0x68] ss:$12 sps:$4 sm:$0xff]  }
  0x43   :  { %162 = vperm.xlu1 %5954, %v159_v12   ;;  %v179_v18 = vadd.s32 18, %v176_v15  ;;  %v180_v20 = vadd.s32 18, %v178_v17  ;;  %484 = vmatpush1.bf16.msra.mxu1 %v5990_v30  ;;  %v5999_v62 = vld [vmem:[#allocation8 + $0x50] ss:$12 sps:$4 sm:$0xff]   ;;  %v6003_v63 = vld [vmem:[#allocation8 + $0x38] ss:$12 sps:$4 sm:$0xff]  }
  0x44   :  { %485 = vmatprep.subr.bf16.mxu1 %v5992_v32  ;;  %v6006_v1 = vld [vmem:[#allocation8 + $0x18] ss:$12 sps:$4 sm:$0xff]   ;;  %v6007_v3 = vld [vmem:[#allocation8 + $0x20] ss:$12 sps:$4 sm:$0xff]   ;;  %v6011_v6 = vld [vmem:[#allocation8 + $0x8] ss:$12 sps:$4 sm:$0xff]  }
  0x45   :  { %145 = vperm.xlu0 %5953, %v140_v13   ;;  %5811 = vmatpush3.bf16.msra.mxu0 %v5975_v19  ;;  %v6008_v4 = vld [vmem:[#allocation8 + $0x4] ss:$12 sps:$4 sm:$0xff]   ;;  %v6010_v5 = vld [vmem:[#allocation8] ss:$12 sps:$4 sm:$0xff]   ;;  %v6528_v12 = vshrl.u32 %v131_v39, 7  ;;  %vm1683_vm2 = vcmask 130048  }
  0x46   :  { %5812 = vmatprep.subr.bf16.mxu0 %v7131_v2  ;;  %vm2250_vm3 = vcmask 523264   ;;  %vm2253_vm4 = vcmask 785408  }
  0x47   :  { %165 = vperm.xlu1 %5954, %v160_v14   ;;  %486 = vmatpush1.bf16.msra.mxu1 %v5994_v33  ;;  %v6531_v13 = vsub.s32 0, %v6528_v12  ;;  %v6536_v14 = vld [vmem:[%s7116_s3] sm:$0x7]  ;;  %v6541_v16 = vsub.s32 1, %v6528_v12  ;;  %s6362_s3 = smov 32  }
  0x48   :  { %487 = vmatprep.subr.bf16.mxu1 %v5996_v34 }
  0x49   :  { %5955 = vset.pattern.permute.xlu0 %v6359_v21  ;;  %5813 = vmatpush3.bf16.msra.mxu0 %v5976_v22  ;;  %v339_v15 = vrot.slane %v6536_v14, %v6531_v13 }
  0x4a   :  { %182 = vperm.xlu0 %5955, %v179_v18   ;;  %5814 = vmatprep.subr.bf16.mxu0 %v7131_v2 }
  0x4b   :  { %5956 = vset.pattern.permute.xlu1 %v6359_v21  ;;  %488 = vmatpush1.bf16.msra.mxu1 %v5998_v35  ;;  %v6364_v35 = vmov 1934713408  }
  0x4c   :  { %185 = vperm.xlu1 %5956, %v180_v20   ;;  %489 = vmatprep.subr.bf16.mxu1 %v6000_v36  ;;  %v343_v20 = vrot.slane %v6536_v14, %v6541_v16  ;;  %v618_v36 = vunpack.c.l.s4 %v6364_v35 }
  0x4d   :  { %5815 = vmatpush3.bf16.msra.mxu0 %v5977_v23 }
  0x4e   :  { %5816 = vmatprep.subr.bf16.mxu0 %v7131_v2 }
  0x4f   :  { %490 = vmatpush1.bf16.msra.mxu1 %v6002_v37 }
  0x50   :  { %491 = vmatprep.subr.bf16.mxu1 %v6004_v38 }
  0x51   :  { %5817 = vmatpush3.bf16.msra.mxu0 %v5978_v28 }
  0x52   :  { %5818 = vmatprep.subr.bf16.mxu0 %v7131_v2 }
  0x53   :  { %492 = vmatpush1.bf16.msra.mxu1 %v6006_v1 }
  0x54   :  { %493 = vmatprep.subr.bf16.mxu1 %v6008_v4 }
  0x55   :  { %5819 = vmatpush3.bf16.msra.mxu0 %v5979_v31  ;;  %v6363_v31 = vmov 1983009808  }
  0x56   :  { %5824 = vmatprep.subr.bf16.mxu0 %v7131_v2  ;;  %v586_v32 = vunpack.c.l.s4 %v6363_v31 }
  0x57   :  { %494 = vmatpush1.bf16.msra.mxu1 %v6010_v5 }
  0x58   :  { %5844 = vmatprep.subr.bf16.mxu1 %v7131_v2  ;;  %v587_v37 = vunpack.c.0.s8 %v586_v32 }
  0xbc   :  { %v143_v40 = vpop.permute.xlu0 %142 }
  0xbd   :  { %vm147_vm9 = vcmp.eq.s32.totalorder %v6492_v41, %v143_v40  ;;  %v619_v40 = vunpack.c.0.s8 %v618_v36 }
  0xbe   :  { %v163_v42 = vpop.permute.xlu1 %162  ;;  %v5233_v45 = vsel %vm147_vm9, 1.0, %v7131_v2 }
  0xbf   :  { %vm167_vm10 = vcmp.eq.s32.totalorder %v6492_v41, %v163_v42  ;;  %v6576_v42 = vsub.s32 %v587_v37, %v6528_v12 }
  0xc0   :  { %v146_v43 = vpop.permute.xlu0 %145  ;;  %v5235_v46 = vsel %vm167_vm10, 1.0, %v7131_v2 }
  0xc1   :  { %vm148_vm12 = vcmp.eq.s32.totalorder %v6492_v41, %v146_v43  ;;  %v173_v52 = vadd.f32 %v5235_v46, %v5233_v45 }
  0xc2   :  { %v166_v44 = vpop.permute.xlu1 %165  ;;  %v5234_v49 = vsel %vm148_vm12, 1.0, %v7131_v2 }
  0xc3   :  { %vm168_vm11 = vcmp.eq.s32.totalorder %v6492_v41, %v166_v44 }
  0xc4   :  { %v5236_v47 = vsel %vm168_vm11, 1.0, %v7131_v2 }
  0xc5   :  { %v183_v48 = vpop.permute.xlu0 %182  ;;  %v174_v53 = vadd.f32 %v5236_v47, %v5234_v49  ;;  %v6579_v49 = vsub.s32 %v619_v40, %v6528_v12 }
  0xc6   :  { %vm187_vm13 = vcmp.eq.s32.totalorder %v6492_v41, %v183_v48 }
  0xc7   :  { %v5237_v50 = vsel %vm187_vm13, 1.0, %v7131_v2  ;;  %v186_v51 = vpop.permute.xlu1 %185 }
  0xc8   :  { %vm188_vm14 = vcmp.eq.s32.totalorder %v6492_v41, %v186_v51  ;;  %v193_v55 = vadd.f32 %v5237_v50, %v173_v52 }
  0xc9   :  { %v5238_v54 = vsel %vm188_vm14, 1.0, %v7131_v2 }
  0xca   :  { %v194_v56 = vadd.f32 %v5238_v54, %v174_v53 }
  0xcc   :  { %v195_v58 = vpack.c.bf16 %v194_v56, %v193_v55 }
  0xce   :  { %5821 = vmatmul.mubr.bf16.vlgmr.msra.gmra.mxu0 %v195_v58 }
  0xcf   :  { %5825 = vmatpush3.bf16.msra.mxu0 %v5983_v57  ;;  %5840 = vmatprep.mubr.msk.bf16.mxu0 %vm6360_vm8, %v7131_v2 }
  0xd0   :  { %5826 = vmatprep.subr.bf16.mxu0 %v7131_v2 }
  0xd3   :  { %5827 = vmatpush3.bf16.msra.mxu0 %v5987_v59 }
  0xd4   :  { %5828 = vmatprep.subr.bf16.mxu0 %v7131_v2 }
  0xd7   :  { %5829 = vmatpush3.bf16.msra.mxu0 %v5991_v60 }
  0xd8   :  { %5830 = vmatprep.subr.bf16.mxu0 %v7131_v2 }
  0xdb   :  { %5831 = vmatpush3.bf16.msra.mxu0 %v5995_v61 }
  0xdc   :  { %5832 = vmatprep.subr.bf16.mxu0 %v7131_v2 }
  0xdf   :  { %5833 = vmatpush3.bf16.msra.mxu0 %v5999_v62 }
  0xe0   :  { %5834 = vmatprep.subr.bf16.mxu0 %v7131_v2 }
  0xe3   :  { %5835 = vmatpush3.bf16.msra.mxu0 %v6003_v63 }
  0xe4   :  { %5836 = vmatprep.subr.bf16.mxu0 %v7131_v2 }
  0xe7   :  { %5837 = vmatpush3.bf16.msra.mxu0 %v6007_v3 }
  0xe8   :  { %5838 = vmatprep.subr.bf16.mxu0 %v7131_v2 }
  0xeb   :  { %5839 = vmatpush3.bf16.msra.mxu0 %v6011_v6 }
  0xec   :  { %5868 = vmatprep.subr.bf16.mxu0 %v7131_v2 }
 0x18e   :  { %v6517_v7 = vpop.f32.mrf.mxu0 }
 0x190   :  { %v5822_v8 = vpop.f32.mrf.mxu0 }
 0x192   :  { %v6519_v9 = vpop.f32.mrf.mxu0 }
 0x193   :  { %v301_v10 = vpack.c.bf16 %v6519_v9, %v6517_v7 }
 0x194   :  { %v5823_v11 = vpop.f32.mrf.mxu0 }
 0x195   :  { %512 = vmatmul.mubr.bf16.vlgmr.msra.gmra.mxu1 %v301_v10  ;;  %5841 = vmatmul.mubr.bf16.vlgmr.msra.gmra.mxu0 %v301_v10 }
 0x196   :  { %5846 = vmatprep.mubr.msk.bf16.mxu1 %vm6360_vm8, %v7131_v2  ;;  %5870 = vmatprep.mubr.msk.bf16.mxu0 %vm6360_vm8, %v7131_v2 }
 0x255   :  { %v513_v17 = vpop.f32.mrf.mxu1  ;;  %v6543_v18 = vpop.f32.mrf.mxu0 }
 0x256   :  { %v6545_v19 = vadd.f32 %v513_v17, %v339_v15 }
 0x257   :  { %v515_v21 = vpop.f32.mrf.mxu1  ;;  %v5842_v22 = vpop.f32.mrf.mxu0 }
 0x258   :  { %565 = vrot.lane.b32.xlu1 %v6545_v19, %s6361_s19  ;;  %v516_v25 = vadd.f32 %v515_v21, %v343_v20 }
 0x259   :  { %v517_v23 = vpop.f32.mrf.mxu1  ;;  %v6551_v24 = vpop.f32.mrf.mxu0 }
 0x25a   :  { %v6553_v26 = vadd.f32 %v517_v23, %v339_v15 }
 0x25b   :  { %v519_v27 = vpop.f32.mrf.mxu1  ;;  %v5843_v28 = vpop.f32.mrf.mxu0 }
 0x25c   :  { %567 = vrot.lane.b32.xlu0 %v6553_v26, %s6361_s19  ;;  %861 = vrot.lane.b32.xlu1 %v516_v25, %s6361_s19  ;;  %v520_v29 = vadd.f32 %v519_v27, %v343_v20 }
 0x260   :  { %863 = vrot.lane.b32.xlu0 %v520_v29, %s6361_s19  ;;  %867 = vrot.lane.b32.xlu1 %v516_v25, %s6352_s0 }
 0x264   :  { %869 = vrot.lane.b32.xlu0 %v520_v29, %s6352_s0  ;;  %873 = vrot.lane.b32.xlu1 %v516_v25, %s6362_s3 }
 0x268   :  { %875 = vrot.lane.b32.xlu0 %v520_v29, %s6362_s3  ;;  %571 = vrot.lane.b32.xlu1 %v6545_v19, %s6352_s0 }
 0x26c   :  { %573 = vrot.lane.b32.xlu0 %v6553_v26, %s6352_s0  ;;  %577 = vrot.lane.b32.xlu1 %v6545_v19, %s6362_s3 }
 0x270   :  { %579 = vrot.lane.b32.xlu0 %v6553_v26, %s6362_s3 }
 0x2ca   :  { %v6571_v30 = vpop.permute.xlu1 %565 }
 0x2ce   :  { %v6573_v33 = vpop.permute.xlu0 %567  ;;  %v862_v34 = vpop.permute.xlu1 %861 }
 0x2d2   :  { %v864_v38 = vpop.permute.xlu0 %863  ;;  %v868_v39 = vpop.permute.xlu1 %867 }
 0x2d3   :  { %v879_v43 = vcombine.low %v516_v25, %v868_v39  ;;  %v880_v44 = vcombine.high %v516_v25, %v868_v39 }
 0x2d5   :  { %v887_v50 = vrot.slane %v879_v43, %v6576_v42  ;;  %v894_v51 = vrot.slane %v880_v44, %v6576_v42 }
 0x2d6   :  { %v870_v45 = vpop.permute.xlu0 %869  ;;  %v874_v46 = vpop.permute.xlu1 %873 }
 0x2d7   :  { %v895_v47 = vcombine.low %v862_v34, %v874_v46  ;;  %v896_v48 = vcombine.high %v862_v34, %v874_v46  ;;  %v947_v54 = vcombine.low %v520_v29, %v870_v45  ;;  %v948_v55 = vcombine.high %v520_v29, %v870_v45 }
 0x2d9   :  { %v903_v52 = vrot.slane %v895_v47, %v6576_v42  ;;  %v910_v53 = vrot.slane %v896_v48, %v6576_v42  ;;  %v955_v4 = vrot.slane %v947_v54, %v6576_v42  ;;  %v962_v5 = vrot.slane %v948_v55, %v6576_v42 }
 0x2da   :  { %v876_v56 = vpop.permute.xlu0 %875  ;;  %v572_v57 = vpop.permute.xlu1 %571 }
 0x2db   :  { %v911_v58 = vcombine.low %v887_v50, %v903_v52  ;;  %v912_v59 = vcombine.high %v887_v50, %v903_v52  ;;  %v927_v60 = vcombine.low %v894_v51, %v910_v53  ;;  %v928_v61 = vcombine.high %v894_v51, %v910_v53 }
 0x2dc   :  { %v963_v62 = vcombine.low %v864_v38, %v876_v56  ;;  %v964_v63 = vcombine.high %v864_v38, %v876_v56  ;;  %v583_v15 = vcombine.low %v6545_v19, %v572_v57  ;;  %v584_v17 = vcombine.high %v6545_v19, %v572_v57 }
 0x2dd   :  { %v919_v1 = vrot.slane %v911_v58, %v6579_v49  ;;  %v926_v3 = vrot.slane %v912_v59, %v6579_v49  ;;  %v935_v10 = vrot.slane %v927_v60, %v6579_v49  ;;  %v942_v11 = vrot.slane %v928_v61, %v6579_v49 }
 0x2de   :  { %v971_v6 = vrot.slane %v963_v62, %v6576_v42  ;;  %v978_v8 = vrot.slane %v964_v63, %v6576_v42  ;;  %v574_v20 = vpop.permute.xlu0 %573  ;;  %v578_v27 = vpop.permute.xlu1 %577  ;;  %v591_v34 = vrot.slane %v583_v15, %v6576_v42  ;;  %v598_v35 = vrot.slane %v584_v17, %v6576_v42 }
 0x2df   :  { %v1015_v21 = vcombine.low %v919_v1, %v926_v3  ;;  %v5275_v22 = vcombine.high %v919_v1, %v926_v3  ;;  %v599_v36 = vcombine.low %v6571_v30, %v578_v27  ;;  %v600_v19 = vcombine.high %v6571_v30, %v578_v27 }
 0x2e0   :  { %v979_v23 = vcombine.low %v955_v4, %v971_v6  ;;  %v980_v25 = vcombine.high %v955_v4, %v971_v6  ;;  %v995_v28 = vcombine.low %v962_v5, %v978_v8  ;;  %v996_v29 = vcombine.high %v962_v5, %v978_v8 }
 0x2e1   :  { %v6602_v37 = vrot.slane %v1015_v21, %v6576_v42  ;;  %v6605_v38 = vrot.slane %v5275_v22, %v6576_v42  ;;  %v1031_v39 = vcombine.low %v935_v10, %v942_v11  ;;  %v5276_v40 = vcombine.high %v935_v10, %v942_v11 }
 0x2e2   :  { %v987_v31 = vrot.slane %v979_v23, %v6579_v49  ;;  %v994_v32 = vrot.slane %v980_v25, %v6579_v49  ;;  %v1003_v43 = vrot.slane %v995_v28, %v6579_v49  ;;  %v1010_v44 = vrot.slane %v996_v29, %v6579_v49  ;;  %v580_v47 = vpop.permute.xlu0 %579 }
 0x2e3   :  { %v607_v45 = vrot.slane %v599_v36, %v6576_v42  ;;  %v614_v46 = vrot.slane %v600_v19, %v6576_v42  ;;  %v651_v30 = vcombine.low %v6553_v26, %v574_v20  ;;  %v652_v51 = vcombine.high %v6553_v26, %v574_v20 }
 0x2e4   :  { %v1083_v48 = vcombine.low %v987_v31, %v994_v32  ;;  %v5277_v50 = vcombine.high %v987_v31, %v994_v32  ;;  %v6614_v56 = vrot.slane %v1031_v39, %v6576_v42  ;;  %v6617_v57 = vrot.slane %v5276_v40, %v6576_v42 }
 0x2e5   :  { %v615_v52 = vcombine.low %v591_v34, %v607_v45  ;;  %v616_v53 = vcombine.high %v591_v34, %v607_v45  ;;  %v631_v54 = vcombine.low %v598_v35, %v614_v46  ;;  %v632_v55 = vcombine.high %v598_v35, %v614_v46 }
 0x2e6   :  { %v667_v58 = vcombine.low %v6573_v33, %v580_v47  ;;  %v668_v59 = vcombine.high %v6573_v33, %v580_v47  ;;  %v659_v63 = vrot.slane %v651_v30, %v6576_v42  ;;  %v666_v1 = vrot.slane %v652_v51, %v6576_v42 }
 0x2e7   :  { %v623_v60 = vrot.slane %v615_v52, %v6579_v49  ;;  %v630_v61 = vrot.slane %v616_v53, %v6579_v49  ;;  %v639_v26 = vrot.slane %v631_v54, %v6579_v49  ;;  %v646_v62 = vrot.slane %v632_v55, %v6579_v49 }
 0x2e8   :  { %v675_v3 = vrot.slane %v667_v58, %v6576_v42  ;;  %v682_v4 = vrot.slane %v668_v59, %v6576_v42  ;;  %v6630_v5 = vrot.slane %v1083_v48, %v6576_v42  ;;  %v6633_v33 = vrot.slane %v5277_v50, %v6576_v42 }
 0x2e9   :  { %v1099_v6 = vcombine.low %v1003_v43, %v1010_v44  ;;  %v5278_v8 = vcombine.high %v1003_v43, %v1010_v44  ;;  %v719_v20 = vcombine.low %v623_v60, %v630_v61  ;;  %v5271_v21 = vcombine.high %v623_v60, %v630_v61 }
 0x2ea   :  { %v683_v10 = vcombine.low %v659_v63, %v675_v3  ;;  %v684_v11 = vcombine.high %v659_v63, %v675_v3  ;;  %v699_v15 = vcombine.low %v666_v1, %v682_v4  ;;  %v700_v17 = vcombine.high %v666_v1, %v682_v4 }
 0x2eb   :  { %v735_v22 = vcombine.low %v639_v26, %v646_v62  ;;  %v5272_v23 = vcombine.high %v639_v26, %v646_v62  ;;  %v1106_v31 = vrot.slane %v1099_v6, %v6576_v42  ;;  %v1114_v32 = vrot.slane %v5278_v8, %v6576_v42 }
 0x2ec   :  { %v691_v25 = vrot.slane %v683_v10, %v6579_v49  ;;  %v698_v27 = vrot.slane %v684_v11, %v6579_v49  ;;  %v707_v28 = vrot.slane %v699_v15, %v6579_v49  ;;  %v714_v29 = vrot.slane %v700_v17, %v6579_v49 }
 0x2ed   :  { %v1047_v34 = vcombine.low %v6602_v37, %v6605_v38  ;;  %v1063_v35 = vcombine.low %v6614_v56, %v6617_v57  ;;  %v726_v43 = vrot.slane %v719_v20, %v6576_v42  ;;  %v734_v44 = vrot.slane %v5271_v21, %v6576_v42 }
 0x2ee   :  { %v787_v36 = vcombine.low %v691_v25, %v698_v27  ;;  %v5273_v19 = vcombine.high %v691_v25, %v698_v27  ;;  %v803_v39 = vcombine.low %v707_v28, %v714_v29  ;;  %v5274_v40 = vcombine.high %v707_v28, %v714_v29 }
 0x2ef   :  { %v742_v45 = vrot.slane %v735_v22, %v6576_v42  ;;  %v750_v46 = vrot.slane %v5272_v23, %v6576_v42  ;;  %v1055_v51 = vrot.slane %v1047_v34, %v6579_v49  ;;  %v1071_v52 = vrot.slane %v1063_v35, %v6579_v49 }
 0x2f0   :  { %v794_v47 = vrot.slane %v787_v36, %v6576_v42  ;;  %v802_v48 = vrot.slane %v5273_v19, %v6576_v42  ;;  %v810_v50 = vrot.slane %v803_v39, %v6576_v42  ;;  %v818_v30 = vrot.slane %v5274_v40, %v6576_v42 }
 0x2f1   :  { %v1115_v53 = vcombine.low %v6630_v5, %v6633_v33  ;;  %v1131_v54 = vcombine.low %v1106_v31, %v1114_v32  ;;  %v751_v59 = vcombine.low %v726_v43, %v734_v44  ;;  %v767_v60 = vcombine.low %v742_v45, %v750_v46 }
 0x2f2   :  { %v819_v55 = vcombine.low %v794_v47, %v802_v48  ;;  %v835_v58 = vcombine.low %v810_v50, %v818_v30  ;;  %v1079_v1 = vcombine.low %v1055_v51, %v1071_v52  ;;  %v1116_v17 = vcombine.high %v6630_v5, %v6633_v33 }
 0x2f3   :  { %v1123_v61 = vrot.slane %v1115_v53, %v6579_v49  ;;  %v1139_v26 = vrot.slane %v1131_v54, %v6579_v49  ;;  %v759_v4 = vrot.slane %v751_v59, %v6579_v49  ;;  %v775_v6 = vrot.slane %v767_v60, %v6579_v49 }
 0x2f4   :  { %v827_v62 = vrot.slane %v819_v55, %v6579_v49  ;;  %v843_v63 = vrot.slane %v835_v58, %v6579_v49  ;;  %v1132_v20 = vcombine.high %v1106_v31, %v1114_v32  ;;  %v1080_v22 = vcombine.high %v1055_v51, %v1071_v52 }
 0x2f5   :  { %v1147_v3 = vcombine.low %v1123_v61, %v1139_v26  ;;  %v1148_v10 = vcombine.high %v1123_v61, %v1139_v26  ;;  %v783_v21 = vcombine.low %v759_v4, %v775_v6  ;;  %v1048_v23 = vcombine.high %v6602_v37, %v6605_v38 }
 0x2f6   :  { %v851_v15 = vcombine.low %v827_v62, %v843_v63  ;;  %v1064_v25 = vcombine.high %v6614_v56, %v6617_v57  ;;  %v1130_v29 = vrot.slane %v1116_v17, %v6579_v49  ;;  %v1146_v34 = vrot.slane %v1132_v20, %v6579_v49 }
 0x2f7   :  { %v1151_v8 = vpack.c.bf16 %v1147_v3, %v1079_v1  ;;  %v1152_v28 = vpack.c.bf16 %v1148_v10, %v1080_v22  ;;  %v1062_v5 = vrot.slane %v1048_v23, %v6579_v49  ;;  %v820_v37 = vcombine.high %v794_v47, %v802_v48 }
 0x2f8   :  { %v855_v27 = vpack.c.bf16 %v851_v15, %v783_v21  ;;  %v1078_v33 = vrot.slane %v1064_v25, %v6579_v49  ;;  %v1149_v32 = vcombine.low %v1130_v29, %v1146_v34  ;;  %v836_v38 = vcombine.high %v810_v50, %v818_v30 }
 0x2f9   :  { %v1499_v11 = vsel %vm1494_vm15, %v1151_v8, 0  ;;  %v1546_v31 = vsel %vm1494_vm15, %v1152_v28, 0  ;;  %v852_v56 = vcombine.high %v827_v62, %v843_v63  ;;  %v752_v35 = vcombine.high %v726_v43, %v734_v44 }
 0x2fa   :  { %5845 = vmatpush3.bf16.xpose.msra.mxu1 %v1499_v11  ;;  %v1081_v57 = vcombine.low %v1062_v5, %v1078_v33  ;;  %v768_v36 = vcombine.high %v742_v45, %v750_v46  ;;  %v784_v19 = vcombine.high %v759_v4, %v775_v6  ;;  %v834_v40 = vrot.slane %v820_v37, %v6579_v49 }
 0x2fb   :  { %5850 = vmatprep.subr.bf16.mxu1 %v7131_v2  ;;  %v850_v51 = vrot.slane %v836_v38, %v6579_v49  ;;  %v766_v53 = vrot.slane %v752_v35, %v6579_v49  ;;  %v1150_v48 = vcombine.high %v1130_v29, %v1146_v34  ;;  %v1082_v44 = vcombine.high %v1062_v5, %v1078_v33 }
 0x2fc   :  { %v1153_v39 = vpack.c.bf16 %v1149_v32, %v1081_v57  ;;  %v856_v52 = vpack.c.bf16 %v852_v56, %v784_v19  ;;  %v782_v54 = vrot.slane %v768_v36, %v6579_v49  ;;  %v1458_v60 = vand.u32 7, %v6528_v12 }
 0x2fd   :  { %v853_v43 = vcombine.low %v834_v40, %v850_v51  ;;  %v1154_v46 = vpack.c.bf16 %v1150_v48, %v1082_v44  ;;  %v854_v55 = vcombine.high %v834_v40, %v850_v51  ;;  %v1482_v61 = vand.u32 7, %v6492_v41 }
 0x2fe   :  { %v1593_v47 = vsel %vm1494_vm15, %v1153_v39, 0  ;;  %v785_v45 = vcombine.low %v766_v53, %v782_v54  ;;  %v786_v58 = vcombine.high %v766_v53, %v782_v54  ;;  %v1453_v26 = vadd.s32 8, %v6528_v12 }
 0x2ff   :  { %v1640_v30 = vsel %vm1494_vm15, %v1154_v46, 0  ;;  %vm1490_vm0 = vcmp.eq.s32.totalorder %v1458_v60, %v1482_v61  ;;  %v6365_v63 = vmov -1e+30   ;;  %v6709_v53 = vsub.s32 2, %v6528_v12 }
 0x300   :  { %v857_v50 = vpack.c.bf16 %v853_v43, %v785_v45  ;;  %v858_v59 = vpack.c.bf16 %v854_v55, %v786_v58  ;;  %v1465_v62 = vand.u32 7, %v1453_v26  ;;  %v1492_v1 = vsel %vm1490_vm0, 0.0, %v6365_v63 }
 0x301   :  { %5847 = vmatmul.mubr.msk.bf16.vlgmr.msra.gmra.mxu1 %vm1494_vm15, %v855_v27  ;;  %v347_v54 = vrot.slane %v6536_v14, %v6709_v53 }
 0x302   :  { %5851 = vmatpush3.bf16.xpose.msra.mxu1 %v1546_v31  ;;  %5852 = vmatprep.mubr.msk.bf16.mxu1 %vm6360_vm8, %v7131_v2  ;;  %vm1491_vm1 = vcmp.eq.s32.totalorder %v1465_v62, %v1482_v61 }
 0x303   :  { %5856 = vmatprep.subr.bf16.mxu1 %v7131_v2  ;;  %v1493_v8 = vsel %vm1491_vm1, 0.0, %v6365_v63  ;;  %v6717_v48 = vadd.f32 %v6543_v18, %v347_v54 }
 0x309   :  { %5853 = vmatmul.mubr.msk.bf16.vlgmr.msra.gmra.mxu1 %vm1494_vm15, %v856_v52 }
 0x30a   :  { %5857 = vmatpush3.bf16.xpose.msra.mxu1 %v1593_v47  ;;  %5858 = vmatprep.mubr.msk.bf16.mxu1 %vm6360_vm8, %v7131_v2  ;;  %v6714_v47 = vadd.f32 %v6551_v24, %v347_v54 }
 0x30b   :  { %5862 = vmatprep.subr.bf16.mxu1 %v7131_v2 }
 0x311   :  { %5859 = vmatmul.mubr.msk.bf16.vlgmr.msra.gmra.mxu1 %vm1494_vm15, %v857_v50 }
 0x312   :  { %5863 = vmatpush3.bf16.xpose.msra.mxu1 %v1640_v30  ;;  %5864 = vmatprep.mubr.msk.bf16.mxu1 %vm6360_vm8, %v7131_v2 }
 0x313   :  { %5874 = vmatprep.subr.bf16.mxu1 %v7131_v2 }
 0x319   :  { %5865 = vmatmul.mubr.msk.bf16.vlgmr.msra.gmra.mxu1 %vm1494_vm15, %v858_v59 }
 0x31a   :  { %5876 = vmatprep.mubr.msk.bf16.mxu1 %vm6360_vm8, %v7131_v2 }
 0x3c1   :  { %v1535_v3 = vpop.f32.mrf.mxu1 }
 0x3c2   :  { %v1536_v4 = vadd.f32 %v1535_v3, %v1492_v1 }
 0x3c3   :  { %v5848_v6 = vpop.f32.mrf.mxu1 }
 0x3c4   :  { %v1684_v10 = vsel %vm1683_vm2, %v1536_v4, -inf }
 0x3c5   :  { %1685 = vmax.xlane.f32.xlu1 %v1684_v10  ;;  %v1538_v11 = vpop.f32.mrf.mxu1 }
 0x3c6   :  { %v1539_v15 = vadd.f32 %v1538_v11, %v1493_v8 }
 0x3c7   :  { %v5849_v17 = vpop.f32.mrf.mxu1 }
 0x3c8   :  { %v1687_v41 = vsel %vm1683_vm2, %v1539_v15, -inf }
 0x3c9   :  { %1688 = vmax.xlane.f32.xlu0 %v1687_v41  ;;  %v1582_v20 = vpop.f32.mrf.mxu1 }
 0x3ca   :  { %v1583_v21 = vadd.f32 %v1582_v20, %v1492_v1 }
 0x3cb   :  { %v5854_v22 = vpop.f32.mrf.mxu1 }
 0x3cc   :  { %v1690_v23 = vsel %vm1683_vm2, %v1583_v21, -inf }
 0x3cd   :  { %1691 = vmax.xlane.f32.xlu0 %v1690_v23  ;;  %v1585_v25 = vpop.f32.mrf.mxu1 }
 0x3ce   :  { %v1586_v27 = vadd.f32 %v1585_v25, %v1493_v8 }
 0x3cf   :  { %v5855_v28 = vpop.f32.mrf.mxu1 }
 0x3d0   :  { %v1693_v29 = vsel %vm1683_vm2, %v1586_v27, -inf }
 0x3d1   :  { %1694 = vmax.xlane.f32.xlu1 %v1693_v29  ;;  %v1629_v34 = vpop.f32.mrf.mxu1 }
 0x3d2   :  { %v1630_v5 = vadd.f32 %v1629_v34, %v1492_v1 }
 0x3d3   :  { %v5860_v33 = vpop.f32.mrf.mxu1 }
 0x3d4   :  { %v1696_v31 = vsel %vm1683_vm2, %v1630_v5, -inf }
 0x3d5   :  { %1697 = vmax.xlane.f32.xlu0 %v1696_v31  ;;  %v1632_v32 = vpop.f32.mrf.mxu1 }
 0x3d6   :  { %v1633_v37 = vadd.f32 %v1632_v32, %v1493_v8 }
 0x3d7   :  { %v5861_v38 = vpop.f32.mrf.mxu1 }
 0x3d8   :  { %v1699_v56 = vsel %vm1683_vm2, %v1633_v37, -inf }
 0x3d9   :  { %1700 = vmax.xlane.f32.xlu1 %v1699_v56  ;;  %v1676_v57 = vpop.f32.mrf.mxu1 }
 0x3da   :  { %v1677_v35 = vadd.f32 %v1676_v57, %v1492_v1 }
 0x3db   :  { %v5866_v36 = vpop.f32.mrf.mxu1 }
 0x3dc   :  { %v1702_v19 = vsel %vm1683_vm2, %v1677_v35, -inf }
 0x3dd   :  { %1703 = vmax.xlane.f32.xlu0 %v1702_v19  ;;  %v1679_v39 = vpop.f32.mrf.mxu1 }
 0x3de   :  { %v1680_v40 = vadd.f32 %v1679_v39, %v1493_v8 }
 0x3df   :  { %v5867_v51 = vpop.f32.mrf.mxu1 }
 0x3e0   :  { %v1705_v52 = vsel %vm1683_vm2, %v1680_v40, -inf }
 0x3e1   :  { %1706 = vmax.xlane.f32.xlu1 %v1705_v52 }
 0x3f2   :  { %1159 = vrot.lane.b32.xlu1 %v6714_v47, %s6361_s19 }
 0x3f3   :  { %1157 = vrot.lane.b32.xlu0 %v6717_v48, %s6361_s19 }
 0x3f6   :  { %1163 = vrot.lane.b32.xlu1 %v6717_v48, %s6352_s0 }
 0x3f7   :  { %1165 = vrot.lane.b32.xlu0 %v6714_v47, %s6352_s0 }
 0x3fa   :  { %1169 = vrot.lane.b32.xlu1 %v6717_v48, %s6362_s3 }
 0x3fb   :  { %1171 = vrot.lane.b32.xlu0 %v6714_v47, %s6362_s3 }
 0x44e   :  { %v1686_v14 = vpop.xlane.xlu1 %1685 }
 0x44f   :  { %v1708_v18 = vsub.f32 %v1536_v4, %v1686_v14 }
 0x451   :  { %v1716_v24 = vmul.f32 1.442695, %v1708_v18 }
 0x452   :  { %v1689_v43 = vpop.xlane.xlu0 %1688 }
 0x453   :  { %6020 = vpow2.f32 %v1716_v24  ;;  %v1709_v44 = vsub.f32 %v1539_v15, %v1689_v43 }
 0x455   :  { %v1718_v45 = vmul.f32 1.442695, %v1709_v44 }
 0x456   :  { %v1692_v46 = vpop.xlane.xlu0 %1691 }
 0x457   :  { %6022 = vpow2.f32 %v1718_v45  ;;  %v1710_v50 = vsub.f32 %v1583_v21, %v1692_v46 }
 0x459   :  { %v1720_v30 = vmul.f32 1.442695, %v1710_v50 }
 0x45a   :  { %v1695_v55 = vpop.xlane.xlu1 %1694 }
 0x45b   :  { %6024 = vpow2.f32 %v1720_v30  ;;  %v1711_v58 = vsub.f32 %v1586_v27, %v1695_v55 }
 0x45d   :  { %v1722_v59 = vmul.f32 1.442695, %v1711_v58 }
 0x45e   :  { %v1698_v60 = vpop.xlane.xlu0 %1697 }
 0x45f   :  { %6026 = vpow2.f32 %v1722_v59  ;;  %v1712_v61 = vsub.f32 %v1630_v5, %v1698_v60 }
 0x460   :  { %v6731_v26 = vpop.eup %6020 }
 0x461   :  { %v1724_v62 = vmul.f32 1.442695, %v1712_v61  ;;  %v1732_v63 = vsel %vm1683_vm2, %v6731_v26, 0.0 }
 0x462   :  { %v1701_v1 = vpop.xlane.xlu1 %1700  ;;  %1733 = vadd.xlane.f32.xlu0 %v1732_v63 }
 0x463   :  { %6028 = vpow2.f32 %v1724_v62  ;;  %v1713_v3 = vsub.f32 %v1633_v37, %v1701_v1 }
 0x464   :  { %v6735_v4 = vpop.eup %6022 }
 0x465   :  { %v1726_v6 = vmul.f32 1.442695, %v1713_v3  ;;  %v1735_v8 = vsel %vm1683_vm2, %v6735_v4, 0.0 }
 0x466   :  { %v1704_v10 = vpop.xlane.xlu0 %1703  ;;  %1736 = vadd.xlane.f32.xlu1 %v1735_v8 }
 0x467   :  { %6030 = vpow2.f32 %v1726_v6  ;;  %v1714_v11 = vsub.f32 %v1677_v35, %v1704_v10 }
 0x468   :  { %v6739_v15 = vpop.eup %6024 }
 0x469   :  { %v1728_v17 = vmul.f32 1.442695, %v1714_v11  ;;  %v1738_v41 = vsel %vm1683_vm2, %v6739_v15, 0.0 }
 0x46a   :  { %v1707_v20 = vpop.xlane.xlu1 %1706  ;;  %v1158_v21 = vpop.permute.xlu0 %1157  ;;  %1739 = vadd.xlane.f32.xlu0 %v1738_v41 }
 0x46b   :  { %6032 = vpow2.f32 %v1728_v17  ;;  %v1715_v22 = vsub.f32 %v1680_v40, %v1707_v20 }
 0x46c   :  { %v6743_v23 = vpop.eup %6026 }
 0x46d   :  { %v1730_v25 = vmul.f32 1.442695, %v1715_v22  ;;  %v1741_v27 = vsel %vm1683_vm2, %v6743_v23, 0.0 }
 0x46e   :  { %v1166_v28 = vpop.permute.xlu0 %1165  ;;  %1742 = vadd.xlane.f32.xlu1 %v1741_v27  ;;  %v1160_v29 = vpop.permute.xlu1 %1159 }
 0x46f   :  { %6034 = vpow2.f32 %v1730_v25  ;;  %v1243_v5 = vcombine.low %v6714_v47, %v1166_v28  ;;  %v1244_v33 = vcombine.high %v6714_v47, %v1166_v28 }
 0x470   :  { %v6747_v34 = vpop.eup %6028 }
 0x471   :  { %v1744_v31 = vsel %vm1683_vm2, %v6747_v34, 0.0  ;;  %v1251_v36 = vrot.slane %v1243_v5, %v6576_v42  ;;  %v1258_v19 = vrot.slane %v1244_v33, %v6576_v42 }
 0x472   :  { %v1172_v32 = vpop.permute.xlu0 %1171  ;;  %1745 = vadd.xlane.f32.xlu1 %v1744_v31  ;;  %v1164_v37 = vpop.permute.xlu1 %1163 }
 0x473   :  { %v1259_v38 = vcombine.low %v1160_v29, %v1172_v32  ;;  %v1260_v56 = vcombine.high %v1160_v29, %v1172_v32  ;;  %v1175_v35 = vcombine.low %v6717_v48, %v1164_v37  ;;  %v1176_v51 = vcombine.high %v6717_v48, %v1164_v37 }
 0x474   :  { %v6753_v57 = vpop.eup %6030 }
 0x475   :  { %v1267_v39 = vrot.slane %v1259_v38, %v6576_v42  ;;  %v1274_v40 = vrot.slane %v1260_v56, %v6576_v42  ;;  %v1747_v52 = vsel %vm1683_vm2, %v6753_v57, 0.0  ;;  %v1183_v44 = vrot.slane %v1175_v35, %v6576_v42 }
 0x476   :  { %v1170_v54 = vpop.permute.xlu1 %1169  ;;  %1748 = vadd.xlane.f32.xlu0 %v1747_v52  ;;  %v1190_v58 = vrot.slane %v1176_v51, %v6576_v42 }
 0x477   :  { %v1275_v47 = vcombine.low %v1251_v36, %v1267_v39  ;;  %v1276_v14 = vcombine.high %v1251_v36, %v1267_v39  ;;  %v1291_v18 = vcombine.low %v1258_v19, %v1274_v40  ;;  %v1292_v24 = vcombine.high %v1258_v19, %v1274_v40 }
 0x478   :  { %v6763_v43 = vpop.eup %6032  ;;  %v1191_v45 = vcombine.low %v1158_v21, %v1170_v54  ;;  %v1192_v46 = vcombine.high %v1158_v21, %v1170_v54 }
 0x479   :  { %v1283_v50 = vrot.slane %v1275_v47, %v6579_v49  ;;  %v1290_v30 = vrot.slane %v1276_v14, %v6579_v49  ;;  %v1299_v48 = vrot.slane %v1291_v18, %v6579_v49  ;;  %v1306_v55 = vrot.slane %v1292_v24, %v6579_v49 }
 0x47a   :  { %v1199_v59 = vrot.slane %v1191_v45, %v6576_v42  ;;  %v1206_v60 = vrot.slane %v1192_v46, %v6576_v42  ;;  %v1750_v61 = vsel %vm1683_vm2, %v6763_v43, 0.0 }
 0x47b   :  { %v1379_v62 = vcombine.low %v1283_v50, %v1290_v30  ;;  %v5281_v63 = vcombine.high %v1283_v50, %v1290_v30  ;;  %v1395_v1 = vcombine.low %v1299_v48, %v1306_v55  ;;  %v5282_v3 = vcombine.high %v1299_v48, %v1306_v55  ;;  %1751 = vadd.xlane.f32.xlu0 %v1750_v61 }
 0x47c   :  { %v6775_v6 = vpop.eup %6034  ;;  %v1207_v8 = vcombine.low %v1183_v44, %v1199_v59  ;;  %v1208_v10 = vcombine.high %v1183_v44, %v1199_v59  ;;  %v1223_v11 = vcombine.low %v1190_v58, %v1206_v60  ;;  %v1224_v17 = vcombine.high %v1190_v58, %v1206_v60 }
 0x47d   :  { %v1386_v41 = vrot.slane %v1379_v62, %v6576_v42  ;;  %v1394_v20 = vrot.slane %v5281_v63, %v6576_v42  ;;  %v1402_v21 = vrot.slane %v1395_v1, %v6576_v42  ;;  %v1410_v22 = vrot.slane %v5282_v3, %v6576_v42 }
 0x47e   :  { %v1215_v25 = vrot.slane %v1207_v8, %v6579_v49  ;;  %v1222_v27 = vrot.slane %v1208_v10, %v6579_v49  ;;  %v1231_v28 = vrot.slane %v1223_v11, %v6579_v49  ;;  %v1238_v29 = vrot.slane %v1224_v17, %v6579_v49 }
 0x47f   :  { %v1753_v5 = vsel %vm1683_vm2, %v6775_v6, 0.0  ;;  %v1411_v33 = vcombine.low %v1386_v41, %v1394_v20  ;;  %v1427_v31 = vcombine.low %v1402_v21, %v1410_v22  ;;  %v1412_v32 = vcombine.high %v1386_v41, %v1394_v20 }
 0x480   :  { %v1311_v37 = vcombine.low %v1215_v25, %v1222_v27  ;;  %v5279_v38 = vcombine.high %v1215_v25, %v1222_v27  ;;  %v1327_v56 = vcombine.low %v1231_v28, %v1238_v29  ;;  %v5280_v35 = vcombine.high %v1231_v28, %v1238_v29  ;;  %1754 = vadd.xlane.f32.xlu1 %v1753_v5 }
 0x481   :  { %v1426_v36 = vrot.slane %v1412_v32, %v6579_v49  ;;  %v1428_v19 = vcombine.high %v1402_v21, %v1410_v22  ;;  %v1419_v54 = vrot.slane %v1411_v33, %v6579_v49  ;;  %v1435_v47 = vrot.slane %v1427_v31, %v6579_v49 }
 0x482   :  { %v1318_v39 = vrot.slane %v1311_v37, %v6576_v42  ;;  %v1326_v40 = vrot.slane %v5279_v38, %v6576_v42  ;;  %v1334_v51 = vrot.slane %v1327_v56, %v6576_v42  ;;  %v1342_v52 = vrot.slane %v5280_v35, %v6576_v42 }
 0x483   :  { %v1442_v14 = vrot.slane %v1428_v19, %v6579_v49  ;;  %v1443_v59 = vcombine.low %v1419_v54, %v1435_v47  ;;  %v1444_v60 = vcombine.high %v1419_v54, %v1435_v47  ;;  %v6012_v47 = vld [vmem:[#allocation10 + $0x38] sm:$0xff]  }
 0x484   :  { %v1343_v18 = vcombine.low %v1318_v39, %v1326_v40  ;;  %v1359_v24 = vcombine.low %v1334_v51, %v1342_v52  ;;  %v1344_v44 = vcombine.high %v1318_v39, %v1326_v40  ;;  %v1360_v45 = vcombine.high %v1334_v51, %v1342_v52 }
 0x485   :  { %v1445_v46 = vcombine.low %v1426_v36, %v1442_v14  ;;  %v1446_v50 = vcombine.high %v1426_v36, %v1442_v14  ;;  %v6015_v14 = vld [vmem:[#allocation10 + $0x20] sm:$0xff]  }
 0x486   :  { %v1351_v30 = vrot.slane %v1343_v18, %v6579_v49  ;;  %v1367_v48 = vrot.slane %v1359_v24, %v6579_v49  ;;  %v1358_v55 = vrot.slane %v1344_v44, %v6579_v49  ;;  %v1374_v58 = vrot.slane %v1360_v45, %v6579_v49 }
 0x488   :  { %v1375_v61 = vcombine.low %v1351_v30, %v1367_v48  ;;  %v1376_v62 = vcombine.high %v1351_v30, %v1367_v48  ;;  %v1377_v63 = vcombine.low %v1358_v55, %v1374_v58  ;;  %v1378_v1 = vcombine.high %v1358_v55, %v1374_v58 }
 0x48a   :  { %v1447_v3 = vpack.c.bf16 %v1443_v59, %v1375_v61  ;;  %v1448_v8 = vpack.c.bf16 %v1444_v60, %v1376_v62  ;;  %v1449_v10 = vpack.c.bf16 %v1445_v46, %v1377_v63  ;;  %v1450_v11 = vpack.c.bf16 %v1446_v50, %v1378_v1 }
 0x48c   :  { %5869 = vmatpush3.bf16.msra.mxu0 %v1447_v3  ;;  %5875 = vmatpush3.bf16.msra.mxu1 %v1448_v8 }
 0x48d   :  { %5880 = vmatprep.subr.bf16.mxu0 %v7131_v2  ;;  %5886 = vmatprep.subr.bf16.mxu1 %v7131_v2 }
 0x4eb   :  { %v1734_v17 = vpop.xlane.xlu0 %1733 }
 0x4ec   :  { %6036 = vrcp.f32 %v1734_v17 }
 0x4ef   :  { %v1737_v41 = vpop.xlane.xlu1 %1736 }
 0x4f0   :  { %6038 = vrcp.f32 %v1737_v41 }
 0x4f3   :  { %v1740_v20 = vpop.xlane.xlu0 %1739 }
 0x4f4   :  { %6040 = vrcp.f32 %v1740_v20 }
 0x4f7   :  { %v1743_v21 = vpop.xlane.xlu1 %1742 }
 0x4f8   :  { %6042 = vrcp.f32 %v1743_v21 }
 0x4f9   :  { %v6037_v22 = vpop.eup %6036 }
 0x4fa   :  { %v1764_v28 = vmul.f32 %v6037_v22, %v6731_v26 }
 0x4fb   :  { %v1746_v25 = vpop.xlane.xlu1 %1745 }
 0x4fc   :  { %6044 = vrcp.f32 %v1746_v25 }
 0x4fd   :  { %v6039_v27 = vpop.eup %6038 }
 0x4fe   :  { %v1765_v29 = vmul.f32 %v6039_v27, %v6735_v4 }
 0x4ff   :  { %v1749_v5 = vpop.xlane.xlu0 %1748 }
 0x500   :  { %v1772_v33 = vpack.c.bf16 %v1765_v29, %v1764_v28  ;;  %6046 = vrcp.f32 %v1749_v5 }
 0x501   :  { %v6041_v31 = vpop.eup %6040 }
 0x502   :  { %5871 = vmatmul.mubr.msk.bf16.vlgmr.msra.gmra.mxu0 %vm1683_vm2, %v1772_v33  ;;  %v1766_v38 = vmul.f32 %v6041_v31, %v6739_v15 }
 0x503   :  { %5881 = vmatpush3.bf16.msra.mxu0 %v1449_v10  ;;  %5882 = vmatprep.mubr.msk.bf16.mxu0 %vm6360_vm8, %v7131_v2 }
 0x504   :  { %5892 = vmatprep.subr.bf16.mxu0 %v7131_v2  ;;  %v1752_v37 = vpop.xlane.xlu0 %1751 }
 0x505   :  { %v6043_v32 = vpop.eup %6042  ;;  %6048 = vrcp.f32 %v1752_v37 }
 0x506   :  { %v1767_v26 = vmul.f32 %v6043_v32, %v6743_v23 }
 0x508   :  { %v1773_v4 = vpack.c.bf16 %v1767_v26, %v1766_v38 }
 0x509   :  { %v1755_v56 = vpop.xlane.xlu1 %1754  ;;  %v6045_v35 = vpop.eup %6044 }
 0x50a   :  { %6050 = vrcp.f32 %v1755_v56  ;;  %5877 = vmatmul.mubr.msk.bf16.vlgmr.msra.gmra.mxu1 %vm1683_vm2, %v1773_v4  ;;  %v1768_v19 = vmul.f32 %v6045_v35, %v6747_v34  ;;  %v6013_v34 = vld [vmem:[#allocation10 + $0x30] sm:$0xff]  }
 0x50b   :  { %5887 = vmatpush3.bf16.msra.mxu1 %v1450_v11  ;;  %5888 = vmatprep.mubr.msk.bf16.mxu1 %vm6360_vm8, %v7131_v2 }
 0x50d   :  { %v6047_v36 = vpop.eup %6046 }
 0x50e   :  { %v1769_v39 = vmul.f32 %v6047_v36, %v6753_v57  ;;  %v6014_v57 = vld [vmem:[#allocation10 + $0x28] sm:$0xff]  }
 0x510   :  { %v1774_v40 = vpack.c.bf16 %v1769_v39, %v1768_v19 }
 0x512   :  { %5883 = vmatmul.mubr.msk.bf16.vlgmr.msra.gmra.mxu0 %vm1683_vm2, %v1774_v40  ;;  %v6049_v15 = vpop.eup %6048 }
 0x513   :  { %5908 = vmatprep.mubr.msk.bf16.mxu0 %vm6360_vm8, %v7131_v2  ;;  %v1770_v51 = vmul.f32 %v6049_v15, %v6763_v43  ;;  %5893 = vmatpush3.bf16.msra.mxu0 %v6012_v47  ;;  %v6016_v43 = vld [vmem:[#allocation10 + $0x18] sm:$0xff]  }
 0x514   :  { %5894 = vmatprep.subr.bf16.mxu0 %v7131_v2 }
 0x517   :  { %v6051_v23 = vpop.eup %6050  ;;  %5895 = vmatpush3.bf16.msra.mxu0 %v6013_v34 }
 0x518   :  { %v1771_v52 = vmul.f32 %v6051_v23, %v6775_v6  ;;  %5896 = vmatprep.subr.bf16.mxu0 %v7131_v2  ;;  %v6017_v6 = vld [vmem:[#allocation10 + $0x10] sm:$0xff]  }
 0x51a   :  { %v1775_v54 = vpack.c.bf16 %v1771_v52, %v1770_v51 }
 0x51b   :  { %5897 = vmatpush3.bf16.msra.mxu0 %v6014_v57 }
 0x51c   :  { %5889 = vmatmul.mubr.msk.bf16.vlgmr.msra.gmra.mxu1 %vm1683_vm2, %v1775_v54  ;;  %5898 = vmatprep.subr.bf16.mxu0 %v7131_v2 }
 0x51f   :  { %5899 = vmatpush3.bf16.msra.mxu0 %v6015_v14 }
 0x520   :  { %5900 = vmatprep.subr.bf16.mxu0 %v7131_v2 }
 0x523   :  { %5901 = vmatpush3.bf16.msra.mxu0 %v6016_v43 }
 0x524   :  { %5902 = vmatprep.subr.bf16.mxu0 %v7131_v2 }
 0x527   :  { %5903 = vmatpush3.bf16.msra.mxu0 %v6017_v6 }
 0x528   :  { %5904 = vmatprep.subr.bf16.mxu0 %v7131_v2 }
 0x5c2   :  { %v1813_v18 = vpop.f32.mrf.mxu0 }
 0x5c4   :  { %v5872_v24 = vpop.f32.mrf.mxu0 }
 0x5c6   :  { %v1816_v44 = vpop.f32.mrf.mxu0 }
 0x5c8   :  { %v5873_v45 = vpop.f32.mrf.mxu0 }
 0x5ca   :  { %v1857_v46 = vpop.f32.mrf.mxu1 }
 0x5cc   :  { %v5878_v50 = vpop.f32.mrf.mxu1 }
 0x5ce   :  { %v1860_v30 = vpop.f32.mrf.mxu1 }
 0x5d0   :  { %v5879_v48 = vpop.f32.mrf.mxu1 }
 0x5d2   :  { %v1901_v55 = vpop.f32.mrf.mxu0 }
 0x5d3   :  { %v1952_v61 = vcombine.low %v1813_v18, %v1901_v55  ;;  %v1953_v62 = vcombine.high %v1813_v18, %v1901_v55 }
 0x5d4   :  { %v5884_v58 = vpop.f32.mrf.mxu0 }
 0x5d5   :  { %v1960_v10 = vrot.slane %v1952_v61, %v6576_v42  ;;  %v1967_v11 = vrot.slane %v1953_v62, %v6576_v42  ;;  %v6018_v61 = vld [vmem:[#allocation10 + $0x8] sm:$0xff]  }
 0x5d6   :  { %v1904_v59 = vpop.f32.mrf.mxu0  ;;  %5905 = vmatpush3.bf16.msra.mxu0 %v6018_v61 }
 0x5d7   :  { %v2020_v20 = vcombine.low %v1816_v44, %v1904_v59  ;;  %v2021_v21 = vcombine.high %v1816_v44, %v1904_v59  ;;  %5906 = vmatprep.subr.bf16.mxu0 %v7131_v2 }
 0x5d8   :  { %v5885_v60 = vpop.f32.mrf.mxu0 }
 0x5d9   :  { %v2028_v4 = vrot.slane %v2020_v20, %v6576_v42  ;;  %v2035_v56 = vrot.slane %v2021_v21, %v6576_v42 }
 0x5dc   :  { %v1945_v63 = vpop.f32.mrf.mxu1 }
 0x5dd   :  { %v1968_v1 = vcombine.low %v1857_v46, %v1945_v63  ;;  %v1969_v3 = vcombine.high %v1857_v46, %v1945_v63 }
 0x5de   :  { %v5890_v8 = vpop.f32.mrf.mxu1 }
 0x5df   :  { %v1976_v17 = vrot.slane %v1968_v1, %v6576_v42  ;;  %v1983_v41 = vrot.slane %v1969_v3, %v6576_v42 }
 0x5e0   :  { %v1948_v22 = vpop.f32.mrf.mxu1 }
 0x5e1   :  { %v1984_v25 = vcombine.low %v1960_v10, %v1976_v17  ;;  %v1985_v27 = vcombine.high %v1960_v10, %v1976_v17  ;;  %v2000_v28 = vcombine.low %v1967_v11, %v1983_v41  ;;  %v2001_v29 = vcombine.high %v1967_v11, %v1983_v41 }
 0x5e2   :  { %v2036_v5 = vcombine.low %v1860_v30, %v1948_v22  ;;  %v2037_v33 = vcombine.high %v1860_v30, %v1948_v22  ;;  %v5891_v31 = vpop.f32.mrf.mxu1 }
 0x5e3   :  { %v1992_v32 = vrot.slane %v1984_v25, %v6579_v49  ;;  %v1999_v37 = vrot.slane %v1985_v27, %v6579_v49  ;;  %v2008_v38 = vrot.slane %v2000_v28, %v6579_v49  ;;  %v2015_v26 = vrot.slane %v2001_v29, %v6579_v49  ;;  %v6019_v28 = vld [vmem:[#allocation10] sm:$0xff]  }
 0x5e4   :  { %v2044_v35 = vrot.slane %v2036_v5, %v6576_v42  ;;  %v2051_v36 = vrot.slane %v2037_v33, %v6576_v42  ;;  %5907 = vmatpush3.bf16.msra.mxu0 %v6019_v28 }
 0x5e5   :  { %v2088_v19 = vcombine.low %v1992_v32, %v1999_v37  ;;  %v5291_v39 = vcombine.high %v1992_v32, %v1999_v37  ;;  %v2104_v40 = vcombine.low %v2008_v38, %v2015_v26  ;;  %v5292_v15 = vcombine.high %v2008_v38, %v2015_v26 }
 0x5e6   :  { %v2052_v23 = vcombine.low %v2028_v4, %v2044_v35  ;;  %v2053_v51 = vcombine.high %v2028_v4, %v2044_v35  ;;  %v2068_v52 = vcombine.low %v2035_v56, %v2051_v36  ;;  %v2069_v54 = vcombine.high %v2035_v56, %v2051_v36 }
 0x5e7   :  { %v2095_v47 = vrot.slane %v2088_v19, %v6576_v42  ;;  %v2103_v34 = vrot.slane %v5291_v39, %v6576_v42  ;;  %v2111_v57 = vrot.slane %v2104_v40, %v6576_v42  ;;  %v2119_v14 = vrot.slane %v5292_v15, %v6576_v42 }
 0x5e8   :  { %v2060_v43 = vrot.slane %v2052_v23, %v6579_v49  ;;  %v2067_v6 = vrot.slane %v2053_v51, %v6579_v49  ;;  %v2076_v18 = vrot.slane %v2068_v52, %v6579_v49  ;;  %v2083_v24 = vrot.slane %v2069_v54, %v6579_v49 }
 0x5e9   :  { %v2121_v44 = vcombine.high %v2095_v47, %v2103_v34  ;;  %v2137_v45 = vcombine.high %v2111_v57, %v2119_v14  ;;  %v2120_v46 = vcombine.low %v2095_v47, %v2103_v34  ;;  %v2136_v50 = vcombine.low %v2111_v57, %v2119_v14 }
 0x5ea   :  { %v2156_v30 = vcombine.low %v2060_v43, %v2067_v6  ;;  %v5293_v48 = vcombine.high %v2060_v43, %v2067_v6  ;;  %v2172_v55 = vcombine.low %v2076_v18, %v2083_v24  ;;  %v5294_v58 = vcombine.high %v2076_v18, %v2083_v24  ;;  %v5295_v6 = vld [vmem:[%s7118_s5] ss:$0 sm:$0xff]  ;;  %s6366_s5 = smov [#allocation2]  }
 0x5eb   :  { %v2128_v59 = vrot.slane %v2120_v46, %v6579_v49  ;;  %v2144_v60 = vrot.slane %v2136_v50, %v6579_v49  ;;  %v2135_v8 = vrot.slane %v2121_v44, %v6579_v49  ;;  %v2151_v10 = vrot.slane %v2137_v45, %v6579_v49  ;;  %s113_s2 = sshll.u32 %s6366_s5, 4  ;;  %s114_s2 = int_to_ptr.vmem [resolvable:$true] %s113_s2 }
 0x5ec   :  { %v2163_v62 = vrot.slane %v2156_v30, %v6576_v42  ;;  %v2171_v63 = vrot.slane %v5293_v48, %v6576_v42  ;;  %v2179_v1 = vrot.slane %v2172_v55, %v6576_v42  ;;  %v2187_v3 = vrot.slane %v5294_v58, %v6576_v42  ;;  %s6284_s23 = scalar_lea.vmem %s114_s2, 16384  ;;  %p6289_p7 = scmp.lt.s32.totalorder %s114_s2, %s114_s2 }
 0x5ed   :  { %v2152_v11 = vcombine.low %v2128_v59, %v2144_v60  ;;  %v2154_v29 = vcombine.low %v2135_v8, %v2151_v10  ;;  %v2153_v33 = vcombine.high %v2128_v59, %v2144_v60  ;;  %v2155_v4 = vcombine.high %v2135_v8, %v2151_v10  ;;  %p6285_p6 = scmp.ne.s32.totalorder %s114_s2, %s6284_s23  ;;  %p6290_p8 = scmp.lt.s32.totalorder %s6284_s23, %s6284_s23 }
 0x5ee   :  { %v2189_v17 = vcombine.high %v2163_v62, %v2171_v63  ;;  %v2205_v41 = vcombine.high %v2179_v1, %v2187_v3  ;;  %v2188_v20 = vcombine.low %v2163_v62, %v2171_v63  ;;  %v2204_v21 = vcombine.low %v2179_v1, %v2187_v3 }
 0x5ef   :  { %p6291_p9 = por %p6290_p8, %p6289_p7 }
 0x5f0   :  { %v2203_v22 = vrot.slane %v2189_v17, %v6579_v49  ;;  %v2219_v25 = vrot.slane %v2205_v41, %v6579_v49  ;;  %v2196_v27 = vrot.slane %v2188_v20, %v6579_v49  ;;  %v2212_v42 = vrot.slane %v2204_v21, %v6579_v49 }
 0x5f1   :  { %p6292_p10 = pnand %p6291_p9, %p6285_p6 }
 0x5f2   :  { %v2222_v5 = vcombine.low %v2203_v22, %v2219_v25  ;;  %v2221_v31 = vcombine.high %v2196_v27, %v2212_v42  ;;  %v2220_v32 = vcombine.low %v2196_v27, %v2212_v42  ;;  %v2223_v26 = vcombine.high %v2203_v22, %v2219_v25 }
 0x5f4   :  { %v5962_v37 = vpack.i.bf16 %v2222_v5, %v2154_v29  ;;  %v5957_v38 = vpack.i.bf16 %v2221_v31, %v2153_v33  ;;  %v5967_v56 = vpack.i.bf16 %v2223_v26, %v2155_v4 }
 0x5f6   :  { %5963 = vrot.lane.b32.xlu1 %v5962_v37, %s6352_s0  ;;  %5958 = vrot.lane.b32.xlu0 %v5957_v38, %s6362_s3 }
 0x5fa   :  { %5968 = vrot.lane.b32.xlu1 %v5967_v56, %s6361_s19 }
 0x668   :  { %v5964_v35 = vpop.permute.xlu1 %5963  ;;  %v5959_v49 = vpop.permute.xlu0 %5958 }
 0x669   :  { %v5961_v36 = vunpack.i.h.bf16 %v5959_v49  ;;  %v5960_v19 = vunpack.i.l.bf16 %v5959_v49  ;;  %v5966_v39 = vunpack.i.h.bf16 %v5964_v35  ;;  %v5965_v40 = vunpack.i.l.bf16 %v5964_v35 }
 0x66b   :  { %v2248_v15 = vsel %vm1494_vm15, %v2152_v11, %v5960_v19  ;;  %v2249_v23 = vsel %vm1494_vm15, %v2220_v32, %v5961_v36 }
 0x66c   :  { %v5969_v51 = vpop.permute.xlu1 %5968  ;;  %v2251_v47 = vsel %vm2250_vm3, %v2248_v15, %v5965_v40  ;;  %v2252_v34 = vsel %vm2250_vm3, %v2249_v23, %v5966_v39 }
 0x66d   :  { %v5971_v52 = vunpack.i.h.bf16 %v5969_v51  ;;  %v5970_v54 = vunpack.i.l.bf16 %v5969_v51 }
 0x66f   :  { %v2254_v57 = vsel %vm2253_vm4, %v2251_v47, %v5970_v54  ;;  %v2255_v14 = vsel %vm2253_vm4, %v2252_v34, %v5971_v52 }
 0x670   :  { %v2256_v43 = vpack.c.bf16 %v2255_v14, %v2254_v57 }
 0x672   :  { %5909 = vmatmul.mubr.bf16.vlgmr.msra.gmra.mxu0 %v2256_v43 }
 0x732   :  { %v2362_v18 = vpop.f32.mrf.mxu0 }
 0x733   :  { %v2363_v24 = vadd.f32 %v5295_v6, %v2362_v18 }
 0x734   :  { %v5910_v44 = vpop.f32.mrf.mxu0 }
 0x735   :  { %v2369_v45 = vadd.f32 %v2363_v24, %v6517_v7 }
 0x736   :  { %v2365_v46 = vpop.f32.mrf.mxu0 }
 0x737   :  { %v2366_v50 = vadd.f32 %v5295_v6, %v2365_v46  ;;  %2373 = vadd.xlane.f32.xlu0 %v2369_v45 }
 0x738   :  { %v5911_v30 = vpop.f32.mrf.mxu0 }
 0x739   :  { %v2370_v48 = vadd.f32 %v2366_v50, %v6519_v9 }
 0x73b   :  { %2375 = vadd.xlane.f32.xlu1 %v2370_v48 }
 0x7c0   :  { %v2374_v55 = vpop.xlane.xlu0 %2373 }
 0x7c1   :  { %v2378_v58 = vmul.f32 0.0078125, %v2374_v55 }
 0x7c3   :  { %v2380_v59 = vsub.f32 %v2369_v45, %v2378_v58 }
 0x7c4   :  { %v2376_v60 = vpop.xlane.xlu1 %2375 }
 0x7c5   :  { %v2379_v61 = vmul.f32 0.0078125, %v2376_v60  ;;  %v2382_v62 = vmul.f32 %v2380_v59, %v2380_v59 }
 0x7c7   :  { %v2381_v63 = vsub.f32 %v2370_v48, %v2379_v61  ;;  %2384 = vadd.xlane.f32.xlu0 %v2382_v62 }
 0x7c9   :  { %v2383_v1 = vmul.f32 %v2381_v63, %v2381_v63 }
 0x7cb   :  { %2386 = vadd.xlane.f32.xlu0 %v2383_v1 }
 0x7cc   :  { %6295 = shalt.err (!%p6292_p10)  }
 0x7cd   :  { %116 = dma.hbm_to_vmem [thread:$0]  %s7121_s8, 16384, %s114_s2, [#allocation4] }
 0x7ce   :  { %s6304_s1 = scalar_lea.vmem %s126_s22, 16384  ;;  %p6309_p12 = scmp.lt.s32.totalorder %s126_s22, %s126_s22 }
 0x7cf   :  { %p6305_p11 = scmp.ne.s32.totalorder %s126_s22, %s6304_s1  ;;  %p6310_p13 = scmp.lt.s32.totalorder %s6304_s1, %s6304_s1 }
 0x7d1   :  { %p6311_p0 = por %p6310_p13, %p6309_p12 }
 0x7d3   :  { %p6312_p1 = pnand %p6311_p0, %p6305_p11 }
 0x7d5   :  { %6315 = shalt.err (!%p6312_p1)  }
 0x7d6   :  { %128 = dma.hbm_to_vmem [thread:$0]  %s7123_s10, 16384, %s126_s22, [#allocation4 + $0x1]  ;;  %v5304_v41 = vld [vmem:[%s7119_s6] ss:$0 sm:$0xff] }
 0x7d7   :  { %v5305_v21 = vld [vmem:[%s7120_s7] ss:$0 sm:$0xff] }
 0x850   :  { %v2385_v7 = vpop.xlane.xlu0 %2384 }
 0x851   :  { %v2388_v9 = vmul.f32 0.0078125, %v2385_v7 }
 0x853   :  { %v2390_v3 = vadd.f32 1e-05, %v2388_v9 }
 0x854   :  { %v2387_v8 = vpop.xlane.xlu0 %2386 }
 0x855   :  { %6052 = vrsqrt.f32 %v2390_v3  ;;  %v2389_v10 = vmul.f32 0.0078125, %v2387_v8 }
 0x857   :  { %v2391_v11 = vadd.f32 1e-05, %v2389_v10 }
 0x859   :  { %6054 = vrsqrt.f32 %v2391_v11 }
 0x862   :  { %v6053_v17 = vpop.eup %6052 }
 0x863   :  { %v2394_v20 = vmul.f32 %v6053_v17, %v2380_v59 }
 0x865   :  { %v2402_v22 = vmul.f32 %v5304_v41, %v2394_v20 }
 0x866   :  { %v6055_v25 = vpop.eup %6054 }
 0x867   :  { %v6881_v27 = vadd.f32 %v5305_v21, %v2402_v22  ;;  %v2395_v42 = vmul.f32 %v6055_v25, %v2381_v63 }
 0x869   :  { %v2403_v28 = vmul.f32 %v5304_v41, %v2395_v42 }
 0x86b   :  { %v6883_v29 = vadd.f32 %v5305_v21, %v2403_v28 }
 0x86c   :  { %6342 = dma.done.wait [#allocation4], 16384 }
 0x86d   :  { %6343 = vsyncadd [#allocation4], 4294950912  ;;  %3301 = vmatprep.mubr.bf16.mxu1 %v6356_v0  ;;  %3344 = vmatprep.mubr.bf16.mxu0 %v6356_v0  ;;  %v2529_v5 = vld [vmem:[#allocation2 + $0x380] sm:$0xff]  ;;  %v2530_v31 = vld [vmem:[#allocation2 + $0x388] sm:$0xff] }
 0x86e   :  { %v2537_v33 = vld [vmem:[#allocation2 + $0x3c0] sm:$0xff]  ;;  %v2538_v37 = vld [vmem:[#allocation2 + $0x3c8] sm:$0xff] }
 0x86f   :  { %v5419_v32 = vcombine.high %v2529_v5, %v2537_v33  ;;  %v5418_v38 = vcombine.low %v2529_v5, %v2537_v33  ;;  %v2513_v26 = vld [vmem:[#allocation2 + $0x300] sm:$0xff]  ;;  %v5421_v56 = vcombine.high %v2530_v31, %v2538_v37  ;;  %v5420_v35 = vcombine.low %v2530_v31, %v2538_v37  ;;  %v2514_v36 = vld [vmem:[#allocation2 + $0x308] sm:$0xff] }
 0x870   :  { %v2521_v4 = vld [vmem:[#allocation2 + $0x340] sm:$0xff]  ;;  %v2522_v19 = vld [vmem:[#allocation2 + $0x348] sm:$0xff] }
 0x871   :  { %v5403_v49 = vcombine.high %v2513_v26, %v2521_v4  ;;  %v2497_v39 = vld [vmem:[#allocation2 + $0x280] sm:$0xff]  ;;  %3269 = vmatprep.subr.bf16.mxu1 %v5419_v32  ;;  %v5405_v40 = vcombine.high %v2514_v36, %v2522_v19  ;;  %v2498_v23 = vld [vmem:[#allocation2 + $0x288] sm:$0xff]  ;;  %3312 = vmatprep.subr.bf16.mxu0 %v5421_v56  ;;  %v5402_v52 = vcombine.low %v2513_v26, %v2521_v4  ;;  %v2531_v26 = vld [vmem:[#allocation2 + $0x390] sm:$0xff] }
 0x872   :  { %v2505_v15 = vld [vmem:[#allocation2 + $0x2c0] sm:$0xff]  ;;  %v2506_v51 = vld [vmem:[#allocation2 + $0x2c8] sm:$0xff]  ;;  %3270 = vmatpush1.bf16.msra.mxu1 %v5418_v38  ;;  %3313 = vmatpush1.bf16.msra.mxu0 %v5420_v35  ;;  %v5404_v54 = vcombine.low %v2514_v36, %v2522_v19  ;;  %v2539_v4 = vld [vmem:[#allocation2 + $0x3d0] sm:$0xff] }
 0x873   :  { %3271 = vmatprep.subr.bf16.mxu1 %v5403_v49  ;;  %v5387_v47 = vcombine.high %v2497_v39, %v2505_v15  ;;  %3314 = vmatprep.subr.bf16.mxu0 %v5405_v40  ;;  %v5389_v34 = vcombine.high %v2498_v23, %v2506_v51  ;;  %v2481_v57 = vld [vmem:[#allocation2 + $0x200] sm:$0xff]  ;;  %v2482_v43 = vld [vmem:[#allocation2 + $0x208] sm:$0xff]  ;;  %v5386_v18 = vcombine.low %v2497_v39, %v2505_v15  ;;  %v2532_v56 = vld [vmem:[#allocation2 + $0x398] sm:$0xff] }
 0x874   :  { %v2489_v14 = vld [vmem:[#allocation2 + $0x240] sm:$0xff]  ;;  %v2490_v6 = vld [vmem:[#allocation2 + $0x248] sm:$0xff]  ;;  %v5388_v24 = vcombine.low %v2498_v23, %v2506_v51  ;;  %v2540_v35 = vld [vmem:[#allocation2 + $0x3d8] sm:$0xff]  ;;  %v5423_v19 = vcombine.high %v2531_v26, %v2539_v4  ;;  %v6889_v23 = vpack.c.bf16 %v6883_v29, %v6881_v27 }
 0x875   :  { %v5371_v44 = vcombine.high %v2481_v57, %v2489_v14  ;;  %v5373_v45 = vcombine.high %v2482_v43, %v2490_v6  ;;  %v2465_v46 = vld [vmem:[#allocation2 + $0x180] sm:$0xff]  ;;  %v2466_v30 = vld [vmem:[#allocation2 + $0x188] sm:$0xff]  ;;  %v5370_v55 = vcombine.low %v2481_v57, %v2489_v14  ;;  %v5372_v58 = vcombine.low %v2482_v43, %v2490_v6  ;;  %v2515_v40 = vld [vmem:[#allocation2 + $0x310] sm:$0xff] }
 0x876   :  { %3272 = vmatpush1.bf16.msra.mxu1 %v5402_v52  ;;  %3315 = vmatpush1.bf16.msra.mxu0 %v5404_v54  ;;  %v2473_v50 = vld [vmem:[#allocation2 + $0x1c0] sm:$0xff]  ;;  %v2474_v48 = vld [vmem:[#allocation2 + $0x1c8] sm:$0xff]  ;;  %v5425_v39 = vcombine.high %v2532_v56, %v2540_v35  ;;  %v2523_v15 = vld [vmem:[#allocation2 + $0x350] sm:$0xff]  ;;  %v5422_v54 = vcombine.low %v2531_v26, %v2539_v4 }
 0x877   :  { %3273 = vmatprep.subr.bf16.mxu1 %v5387_v47  ;;  %3316 = vmatprep.subr.bf16.mxu0 %v5389_v34  ;;  %v5355_v59 = vcombine.high %v2465_v46, %v2473_v50  ;;  %v5357_v60 = vcombine.high %v2466_v30, %v2474_v48  ;;  %v2449_v61 = vld [vmem:[#allocation2 + $0x100] sm:$0xff]  ;;  %v2450_v63 = vld [vmem:[#allocation2 + $0x108] sm:$0xff]  ;;  %v5354_v7 = vcombine.low %v2465_v46, %v2473_v50  ;;  %v2516_v51 = vld [vmem:[#allocation2 + $0x318] sm:$0xff] }
 0x878   :  { %v2457_v62 = vld [vmem:[#allocation2 + $0x140] sm:$0xff]  ;;  %v2458_v1 = vld [vmem:[#allocation2 + $0x148] sm:$0xff]  ;;  %v5356_v9 = vcombine.low %v2466_v30, %v2474_v48  ;;  %v2524_v52 = vld [vmem:[#allocation2 + $0x358] sm:$0xff]  ;;  %v5424_v47 = vcombine.low %v2532_v56, %v2540_v35  ;;  %v5407_v34 = vcombine.high %v2515_v40, %v2523_v15 }
 0x879   :  { %v5339_v3 = vcombine.high %v2449_v61, %v2457_v62  ;;  %v5341_v8 = vcombine.high %v2450_v63, %v2458_v1  ;;  %v2433_v10 = vld [vmem:[#allocation2 + $0x80] sm:$0xff]  ;;  %v2434_v17 = vld [vmem:[#allocation2 + $0x88] sm:$0xff]  ;;  %v5338_v20 = vcombine.low %v2449_v61, %v2457_v62  ;;  %v5340_v21 = vcombine.low %v2450_v63, %v2458_v1  ;;  %v2499_v14 = vld [vmem:[#allocation2 + $0x290] sm:$0xff] }
 0x87a   :  { %3274 = vmatpush1.bf16.msra.mxu1 %v5386_v18  ;;  %3317 = vmatpush1.bf16.msra.mxu0 %v5388_v24  ;;  %v2441_v11 = vld [vmem:[#allocation2 + $0xc0] sm:$0xff]  ;;  %v2442_v41 = vld [vmem:[#allocation2 + $0xc8] sm:$0xff]  ;;  %v5409_v57 = vcombine.high %v2516_v51, %v2524_v52  ;;  %v2507_v43 = vld [vmem:[#allocation2 + $0x2d0] sm:$0xff]  ;;  %v5406_v24 = vcombine.low %v2515_v40, %v2523_v15 }
 0x87b   :  { %3275 = vmatprep.subr.bf16.mxu1 %v5371_v44  ;;  %3318 = vmatprep.subr.bf16.mxu0 %v5373_v45  ;;  %v5323_v22 = vcombine.high %v2433_v10, %v2441_v11  ;;  %v5325_v25 = vcombine.high %v2434_v17, %v2442_v41  ;;  %v2417_v42 = vld [vmem:[#allocation2] sm:$0xff]  ;;  %v2418_v5 = vld [vmem:[#allocation2 + $0x8] sm:$0xff]  ;;  %v5322_v31 = vcombine.low %v2433_v10, %v2441_v11  ;;  %v2500_v6 = vld [vmem:[#allocation2 + $0x298] sm:$0xff] }
 0x87c   :  { %v2425_v28 = vld [vmem:[#allocation2 + $0x40] sm:$0xff]  ;;  %v2426_v33 = vld [vmem:[#allocation2 + $0x48] sm:$0xff]  ;;  %v5324_v32 = vcombine.low %v2434_v17, %v2442_v41  ;;  %v2508_v18 = vld [vmem:[#allocation2 + $0x2d8] sm:$0xff]  ;;  %v5408_v44 = vcombine.low %v2516_v51, %v2524_v52  ;;  %v5391_v45 = vcombine.high %v2499_v14, %v2507_v43 }
 0x87d   :  { %v5307_v37 = vcombine.high %v2417_v42, %v2425_v28  ;;  %v5309_v38 = vcombine.high %v2418_v5, %v2426_v33  ;;  %v5306_v49 = vcombine.low %v2417_v42, %v2425_v28  ;;  %v5308_v36 = vcombine.low %v2418_v5, %v2426_v33  ;;  %v2483_v50 = vld [vmem:[#allocation2 + $0x210] sm:$0xff]  ;;  %v2484_v48 = vld [vmem:[#allocation2 + $0x218] sm:$0xff]  ;;  %v2533_v15 = vld [vmem:[#allocation2 + $0x3a0] sm:$0xff] }
 0x87e   :  { %3276 = vmatpush1.bf16.msra.mxu1 %v5370_v55  ;;  %3319 = vmatpush1.bf16.msra.mxu0 %v5372_v58  ;;  %v5393_v46 = vcombine.high %v2500_v6, %v2508_v18  ;;  %v2491_v30 = vld [vmem:[#allocation2 + $0x250] sm:$0xff]  ;;  %v2492_v55 = vld [vmem:[#allocation2 + $0x258] sm:$0xff]  ;;  %v5390_v58 = vcombine.low %v2499_v14, %v2507_v43  ;;  %v2541_v51 = vld [vmem:[#allocation2 + $0x3e0] sm:$0xff] }
 0x87f   :  { %3277 = vmatprep.subr.bf16.mxu1 %v5355_v59  ;;  %3320 = vmatprep.subr.bf16.mxu0 %v5357_v60  ;;  %v5392_v59 = vcombine.low %v2500_v6, %v2508_v18  ;;  %v5375_v60 = vcombine.high %v2483_v50, %v2491_v30  ;;  %v5377_v61 = vcombine.high %v2484_v48, %v2492_v55  ;;  %v2467_v62 = vld [vmem:[#allocation2 + $0x190] sm:$0xff]  ;;  %v2468_v1 = vld [vmem:[#allocation2 + $0x198] sm:$0xff]  ;;  %v2534_v52 = vld [vmem:[#allocation2 + $0x3a8] sm:$0xff] }
 0x880   :  { %v2475_v63 = vld [vmem:[#allocation2 + $0x1d0] sm:$0xff]  ;;  %v2452_v41 = vld [vmem:[#allocation2 + $0x118] sm:$0xff]  ;;  %v2517_v43 = vld [vmem:[#allocation2 + $0x320] sm:$0xff] }
 0x881   :  { %v2451_v11 = vld [vmem:[#allocation2 + $0x110] sm:$0xff]  ;;  %v2436_v33 = vld [vmem:[#allocation2 + $0x98] sm:$0xff]  ;;  %v2525_v6 = vld [vmem:[#allocation2 + $0x360] sm:$0xff] }
 0x882   :  { %3278 = vmatpush1.bf16.msra.mxu1 %v5354_v7  ;;  %3321 = vmatpush1.bf16.msra.mxu0 %v5356_v9  ;;  %v2476_v7 = vld [vmem:[#allocation2 + $0x1d8] sm:$0xff]  ;;  %v5374_v9 = vcombine.low %v2483_v50, %v2491_v30  ;;  %v2459_v17 = vld [vmem:[#allocation2 + $0x150] sm:$0xff]  ;;  %v2518_v18 = vld [vmem:[#allocation2 + $0x328] sm:$0xff] }
 0x883   :  { %3279 = vmatprep.subr.bf16.mxu1 %v5339_v3  ;;  %3322 = vmatprep.subr.bf16.mxu0 %v5341_v8  ;;  %v5376_v3 = vcombine.low %v2484_v48, %v2492_v55  ;;  %v5359_v8 = vcombine.high %v2467_v62, %v2475_v63  ;;  %v5361_v10 = vcombine.high %v2468_v1, %v2476_v7  ;;  %v2435_v28 = vld [vmem:[#allocation2 + $0x90] sm:$0xff]  ;;  %v2420_v35 = vld [vmem:[#allocation2 + $0x18] sm:$0xff]  ;;  %v2501_v30 = vld [vmem:[#allocation2 + $0x2a0] sm:$0xff] }
 0x884   :  { %v2443_v5 = vld [vmem:[#allocation2 + $0xd0] sm:$0xff]  ;;  %v2509_v48 = vld [vmem:[#allocation2 + $0x2e0] sm:$0xff]  ;;  %v2502_v55 = vld [vmem:[#allocation2 + $0x2a8] sm:$0xff] }
 0x885   :  { %v2419_v4 = vld [vmem:[#allocation2 + $0x10] sm:$0xff] }
 0x886   :  { %3280 = vmatpush1.bf16.msra.mxu1 %v5338_v20  ;;  %3323 = vmatpush1.bf16.msra.mxu0 %v5340_v21  ;;  %v2460_v20 = vld [vmem:[#allocation2 + $0x158] sm:$0xff]  ;;  %v5358_v21 = vcombine.low %v2467_v62, %v2475_v63  ;;  %v2427_v56 = vld [vmem:[#allocation2 + $0x50] sm:$0xff]  ;;  %v2485_v63 = vld [vmem:[#allocation2 + $0x220] sm:$0xff] }
 0x887   :  { %3281 = vmatprep.subr.bf16.mxu1 %v5323_v22  ;;  %3324 = vmatprep.subr.bf16.mxu0 %v5325_v25  ;;  %v5360_v22 = vcombine.low %v2468_v1, %v2476_v7  ;;  %v5343_v25 = vcombine.high %v2451_v11, %v2459_v17  ;;  %v5345_v42 = vcombine.high %v2452_v41, %v2460_v20  ;;  %v2493_v1 = vld [vmem:[#allocation2 + $0x260] sm:$0xff]  ;;  %v2486_v7 = vld [vmem:[#allocation2 + $0x228] sm:$0xff] }
 0x88a   :  { %3282 = vmatpush1.bf16.msra.mxu1 %v5322_v31  ;;  %3325 = vmatpush1.bf16.msra.mxu0 %v5324_v32  ;;  %v2444_v31 = vld [vmem:[#allocation2 + $0xd8] sm:$0xff]  ;;  %v5342_v32 = vcombine.low %v2451_v11, %v2459_v17  ;;  %v2469_v17 = vld [vmem:[#allocation2 + $0x1a0] sm:$0xff] }
 0x88b   :  { %3283 = vmatprep.subr.bf16.mxu1 %v5307_v37  ;;  %3326 = vmatprep.subr.bf16.mxu0 %v5309_v38  ;;  %v5344_v37 = vcombine.low %v2452_v41, %v2460_v20  ;;  %v5327_v38 = vcombine.high %v2435_v28, %v2443_v5  ;;  %v5329_v26 = vcombine.high %v2436_v33, %v2444_v31  ;;  %v2477_v41 = vld [vmem:[#allocation2 + $0x1e0] sm:$0xff]  ;;  %v2470_v20 = vld [vmem:[#allocation2 + $0x1a8] sm:$0xff] }
 0x88e   :  { %3284 = vmatpush1.bf16.msra.mxu1 %v5306_v49  ;;  %3327 = vmatpush1.bf16.msra.mxu0 %v5308_v36  ;;  %v2428_v49 = vld [vmem:[#allocation2 + $0x58] sm:$0xff]  ;;  %v5326_v36 = vcombine.low %v2435_v28, %v2443_v5  ;;  %v2453_v5 = vld [vmem:[#allocation2 + $0x120] sm:$0xff] }
 0x88f   :  { %3355 = vmatprep.subr.bf16.mxu1 %v5423_v19  ;;  %3398 = vmatprep.subr.bf16.mxu0 %v5425_v39  ;;  %v5328_v19 = vcombine.low %v2436_v33, %v2444_v31  ;;  %v5311_v39 = vcombine.high %v2419_v4, %v2427_v56  ;;  %v5313_v40 = vcombine.high %v2420_v35, %v2428_v49  ;;  %v2461_v33 = vld [vmem:[#allocation2 + $0x160] sm:$0xff]  ;;  %v2454_v31 = vld [vmem:[#allocation2 + $0x128] sm:$0xff] }
 0x891   :  { %3302 = vmatmul.mubr.bf16.vlgmr.msra.gmra.mxu1 %v6889_v23  ;;  %3345 = vmatmul.mubr.bf16.vlgmr.msra.gmra.mxu0 %v6889_v23 }
 0x892   :  { %3356 = vmatpush1.bf16.msra.mxu1 %v5422_v54  ;;  %3399 = vmatpush1.bf16.msra.mxu0 %v5424_v47  ;;  %v2542_v54 = vld [vmem:[#allocation2 + $0x3e8] sm:$0xff]  ;;  %v5310_v47 = vcombine.low %v2419_v4, %v2427_v56  ;;  %v2437_v56 = vld [vmem:[#allocation2 + $0xa0] sm:$0xff] }
 0x893   :  { %3357 = vmatprep.subr.bf16.mxu1 %v5407_v34  ;;  %3400 = vmatprep.subr.bf16.mxu0 %v5409_v57  ;;  %v5312_v34 = vcombine.low %v2420_v35, %v2428_v49  ;;  %v5427_v57 = vcombine.high %v2533_v15, %v2541_v51  ;;  %v5429_v14 = vcombine.high %v2534_v52, %v2542_v54  ;;  %v2445_v35 = vld [vmem:[#allocation2 + $0xe0] sm:$0xff]  ;;  %v2438_v49 = vld [vmem:[#allocation2 + $0xa8] sm:$0xff] }
 0x894   :  { %3387 = vmatprep.mubr.bf16.mxu1 %v6356_v0  ;;  %3430 = vmatprep.mubr.bf16.mxu0 %v6356_v0 }
 0x896   :  { %3358 = vmatpush1.bf16.msra.mxu1 %v5406_v24  ;;  %3401 = vmatpush1.bf16.msra.mxu0 %v5408_v44  ;;  %v2526_v24 = vld [vmem:[#allocation2 + $0x368] sm:$0xff]  ;;  %v5426_v44 = vcombine.low %v2533_v15, %v2541_v51  ;;  %v2421_v51 = vld [vmem:[#allocation2 + $0x20] sm:$0xff] }
 0x897   :  { %3359 = vmatprep.subr.bf16.mxu1 %v5391_v45  ;;  %3402 = vmatprep.subr.bf16.mxu0 %v5393_v46  ;;  %v5428_v45 = vcombine.low %v2534_v52, %v2542_v54  ;;  %v5411_v46 = vcombine.high %v2517_v43, %v2525_v6  ;;  %v5413_v50 = vcombine.high %v2518_v18, %v2526_v24  ;;  %v2429_v52 = vld [vmem:[#allocation2 + $0x60] sm:$0xff]  ;;  %v2422_v54 = vld [vmem:[#allocation2 + $0x28] sm:$0xff] }
 0x89a   :  { %3360 = vmatpush1.bf16.msra.mxu1 %v5390_v58  ;;  %3403 = vmatpush1.bf16.msra.mxu0 %v5392_v59  ;;  %v2510_v58 = vld [vmem:[#allocation2 + $0x2e8] sm:$0xff]  ;;  %v5410_v59 = vcombine.low %v2517_v43, %v2525_v6  ;;  %v2535_v6 = vld [vmem:[#allocation2 + $0x3b0] sm:$0xff] }
 0x89b   :  { %3361 = vmatprep.subr.bf16.mxu1 %v5375_v60  ;;  %3404 = vmatprep.subr.bf16.mxu0 %v5377_v61  ;;  %v5412_v60 = vcombine.low %v2518_v18, %v2526_v24  ;;  %v5395_v61 = vcombine.high %v2501_v30, %v2509_v48  ;;  %v5397_v62 = vcombine.high %v2502_v55, %v2510_v58  ;;  %v2543_v18 = vld [vmem:[#allocation2 + $0x3f0] sm:$0xff]  ;;  %v2536_v24 = vld [vmem:[#allocation2 + $0x3b8] sm:$0xff] }
 0x89e   :  { %3362 = vmatpush1.bf16.msra.mxu1 %v5374_v9  ;;  %3405 = vmatpush1.bf16.msra.mxu0 %v5376_v3  ;;  %v2494_v9 = vld [vmem:[#allocation2 + $0x268] sm:$0xff]  ;;  %v5394_v3 = vcombine.low %v2501_v30, %v2509_v48  ;;  %v2519_v48 = vld [vmem:[#allocation2 + $0x330] sm:$0xff] }
 0x89f   :  { %3363 = vmatprep.subr.bf16.mxu1 %v5359_v8  ;;  %3406 = vmatprep.subr.bf16.mxu0 %v5361_v10  ;;  %v5396_v8 = vcombine.low %v2502_v55, %v2510_v58  ;;  %v5379_v10 = vcombine.high %v2485_v63, %v2493_v1  ;;  %v5381_v11 = vcombine.high %v2486_v7, %v2494_v9  ;;  %v2527_v55 = vld [vmem:[#allocation2 + $0x370] sm:$0xff]  ;;  %v2520_v58 = vld [vmem:[#allocation2 + $0x338] sm:$0xff] }
 0x8a2   :  { %3364 = vmatpush1.bf16.msra.mxu1 %v5358_v21  ;;  %3407 = vmatpush1.bf16.msra.mxu0 %v5360_v22  ;;  %v2478_v21 = vld [vmem:[#allocation2 + $0x1e8] sm:$0xff]  ;;  %v5378_v22 = vcombine.low %v2485_v63, %v2493_v1  ;;  %v2503_v1 = vld [vmem:[#allocation2 + $0x2b0] sm:$0xff] }
 0x8a3   :  { %3365 = vmatprep.subr.bf16.mxu1 %v5343_v25  ;;  %3408 = vmatprep.subr.bf16.mxu0 %v5345_v42  ;;  %v5380_v25 = vcombine.low %v2486_v7, %v2494_v9  ;;  %v5363_v42 = vcombine.high %v2469_v17, %v2477_v41  ;;  %v5365_v28 = vcombine.high %v2470_v20, %v2478_v21  ;;  %v2511_v7 = vld [vmem:[#allocation2 + $0x2f0] sm:$0xff]  ;;  %v2504_v9 = vld [vmem:[#allocation2 + $0x2b8] sm:$0xff] }
 0x8a6   :  { %3366 = vmatpush1.bf16.msra.mxu1 %v5342_v32  ;;  %3409 = vmatpush1.bf16.msra.mxu0 %v5344_v37  ;;  %v2462_v32 = vld [vmem:[#allocation2 + $0x168] sm:$0xff]  ;;  %v5362_v37 = vcombine.low %v2469_v17, %v2477_v41  ;;  %v2487_v41 = vld [vmem:[#allocation2 + $0x230] sm:$0xff] }
 0x8a7   :  { %3367 = vmatprep.subr.bf16.mxu1 %v5327_v38  ;;  %3410 = vmatprep.subr.bf16.mxu0 %v5329_v26  ;;  %v5364_v38 = vcombine.low %v2470_v20, %v2478_v21  ;;  %v5347_v26 = vcombine.high %v2453_v5, %v2461_v33  ;;  %v5349_v4 = vcombine.high %v2454_v31, %v2462_v32  ;;  %v2495_v20 = vld [vmem:[#allocation2 + $0x270] sm:$0xff]  ;;  %v2488_v21 = vld [vmem:[#allocation2 + $0x238] sm:$0xff] }
 0x8aa   :  { %3368 = vmatpush1.bf16.msra.mxu1 %v5326_v36  ;;  %3411 = vmatpush1.bf16.msra.mxu0 %v5328_v19  ;;  %v2446_v36 = vld [vmem:[#allocation2 + $0xe8] sm:$0xff]  ;;  %v5346_v19 = vcombine.low %v2453_v5, %v2461_v33  ;;  %v2471_v33 = vld [vmem:[#allocation2 + $0x1b0] sm:$0xff] }
 0x8ab   :  { %3369 = vmatprep.subr.bf16.mxu1 %v5311_v39  ;;  %3412 = vmatprep.subr.bf16.mxu0 %v5313_v40  ;;  %v5348_v39 = vcombine.low %v2454_v31, %v2462_v32  ;;  %v5331_v40 = vcombine.high %v2437_v56, %v2445_v35  ;;  %v5333_v15 = vcombine.high %v2438_v49, %v2446_v36  ;;  %v2479_v31 = vld [vmem:[#allocation2 + $0x1f0] sm:$0xff]  ;;  %v2472_v32 = vld [vmem:[#allocation2 + $0x1b8] sm:$0xff] }
 0x8ae   :  { %3370 = vmatpush1.bf16.msra.mxu1 %v5310_v47  ;;  %3413 = vmatpush1.bf16.msra.mxu0 %v5312_v34  ;;  %v2430_v47 = vld [vmem:[#allocation2 + $0x68] sm:$0xff]  ;;  %v5330_v34 = vcombine.low %v2437_v56, %v2445_v35  ;;  %v2455_v56 = vld [vmem:[#allocation2 + $0x130] sm:$0xff] }
 0x8af   :  { %3441 = vmatprep.subr.bf16.mxu1 %v5427_v57  ;;  %3484 = vmatprep.subr.bf16.mxu0 %v5429_v14  ;;  %v5332_v57 = vcombine.low %v2438_v49, %v2446_v36  ;;  %v5315_v14 = vcombine.high %v2421_v51, %v2429_v52  ;;  %v5317_v43 = vcombine.high %v2422_v54, %v2430_v47  ;;  %v2463_v35 = vld [vmem:[#allocation2 + $0x170] sm:$0xff]  ;;  %v2456_v49 = vld [vmem:[#allocation2 + $0x138] sm:$0xff] }
 0x8b0   :  { %v2464_v36 = vld [vmem:[#allocation2 + $0x178] sm:$0xff] }
 0x8b1   :  { %3388 = vmatmul.mubr.bf16.vlgmr.msra.gmra.mxu1 %v6889_v23  ;;  %3431 = vmatmul.mubr.bf16.vlgmr.msra.gmra.mxu0 %v6889_v23 }
 0x8b2   :  { %3442 = vmatpush1.bf16.msra.mxu1 %v5426_v44  ;;  %3485 = vmatpush1.bf16.msra.mxu0 %v5428_v45  ;;  %v2544_v44 = vld [vmem:[#allocation2 + $0x3f8] sm:$0xff]  ;;  %v5314_v45 = vcombine.low %v2421_v51, %v2429_v52  ;;  %v2439_v51 = vld [vmem:[#allocation2 + $0xb0] sm:$0xff] }
 0x8b3   :  { %3443 = vmatprep.subr.bf16.mxu1 %v5411_v46  ;;  %3486 = vmatprep.subr.bf16.mxu0 %v5413_v50  ;;  %v5316_v46 = vcombine.low %v2422_v54, %v2430_v47  ;;  %v5431_v50 = vcombine.high %v2535_v6, %v2543_v18  ;;  %v5433_v30 = vcombine.high %v2536_v24, %v2544_v44  ;;  %v2447_v52 = vld [vmem:[#allocation2 + $0xf0] sm:$0xff]  ;;  %v2440_v54 = vld [vmem:[#allocation2 + $0xb8] sm:$0xff] }
 0x8b4   :  { %3473 = vmatprep.mubr.bf16.mxu1 %v6356_v0  ;;  %3516 = vmatprep.mubr.bf16.mxu0 %v6356_v0  ;;  %v2448_v47 = vld [vmem:[#allocation2 + $0xf8] sm:$0xff] }
 0x8b6   :  { %3444 = vmatpush1.bf16.msra.mxu1 %v5410_v59  ;;  %3487 = vmatpush1.bf16.msra.mxu0 %v5412_v60  ;;  %v2528_v59 = vld [vmem:[#allocation2 + $0x378] sm:$0xff]  ;;  %v5430_v60 = vcombine.low %v2535_v6, %v2543_v18  ;;  %v2423_v6 = vld [vmem:[#allocation2 + $0x30] sm:$0xff] }
 0x8b7   :  { %3445 = vmatprep.subr.bf16.mxu1 %v5395_v61  ;;  %3488 = vmatprep.subr.bf16.mxu0 %v5397_v62  ;;  %v5432_v61 = vcombine.low %v2536_v24, %v2544_v44  ;;  %v5415_v62 = vcombine.high %v2519_v48, %v2527_v55  ;;  %v5417_v63 = vcombine.high %v2520_v58, %v2528_v59  ;;  %v2431_v18 = vld [vmem:[#allocation2 + $0x70] sm:$0xff]  ;;  %v2424_v24 = vld [vmem:[#allocation2 + $0x38] sm:$0xff] }
 0x8b8   :  { %v2432_v44 = vld [vmem:[#allocation2 + $0x78] sm:$0xff] }
 0x8ba   :  { %3446 = vmatpush1.bf16.msra.mxu1 %v5394_v3  ;;  %3489 = vmatpush1.bf16.msra.mxu0 %v5396_v8  ;;  %v2512_v3 = vld [vmem:[#allocation2 + $0x2f8] sm:$0xff]  ;;  %v5414_v8 = vcombine.low %v2519_v48, %v2527_v55  ;;  %v5318_v48 = vcombine.low %v2423_v6, %v2431_v18  ;;  %v5320_v55 = vcombine.low %v2424_v24, %v2432_v44 }
 0x8bb   :  { %3447 = vmatprep.subr.bf16.mxu1 %v5379_v10  ;;  %3490 = vmatprep.subr.bf16.mxu0 %v5381_v11  ;;  %v5416_v10 = vcombine.low %v2520_v58, %v2528_v59  ;;  %v5399_v11 = vcombine.high %v2503_v1, %v2511_v7  ;;  %v5401_v17 = vcombine.high %v2504_v9, %v2512_v3  ;;  %v2545_v58 = vld [vmem:[%s7122_s9] sm:$0xff]  ;;  %v2563_v59 = vsub.s32 3, %v6528_v12 }
 0x8be   :  { %3448 = vmatpush1.bf16.msra.mxu1 %v5378_v22  ;;  %3491 = vmatpush1.bf16.msra.mxu0 %v5380_v25  ;;  %v2496_v22 = vld [vmem:[#allocation2 + $0x278] sm:$0xff]  ;;  %v5398_v25 = vcombine.low %v2503_v1, %v2511_v7  ;;  %v2564_v1 = vrot.slane %v2545_v58, %v2563_v59 }
 0x8bf   :  { %3449 = vmatprep.subr.bf16.mxu1 %v5363_v42  ;;  %3492 = vmatprep.subr.bf16.mxu0 %v5365_v28  ;;  %v5400_v42 = vcombine.low %v2504_v9, %v2512_v3  ;;  %v5383_v28 = vcombine.high %v2487_v41, %v2495_v20  ;;  %v5385_v5 = vcombine.high %v2488_v21, %v2496_v22 }
 0x8c2   :  { %3450 = vmatpush1.bf16.msra.mxu1 %v5362_v37  ;;  %3493 = vmatpush1.bf16.msra.mxu0 %v5364_v38  ;;  %v2480_v37 = vld [vmem:[#allocation2 + $0x1f8] sm:$0xff]  ;;  %v5382_v38 = vcombine.low %v2487_v41, %v2495_v20 }
 0x8c3   :  { %3451 = vmatprep.subr.bf16.mxu1 %v5347_v26  ;;  %3494 = vmatprep.subr.bf16.mxu0 %v5349_v4  ;;  %v5384_v26 = vcombine.low %v2488_v21, %v2496_v22  ;;  %v5367_v4 = vcombine.high %v2471_v33, %v2479_v31 }
 0x8c6   :  { %3452 = vmatpush1.bf16.msra.mxu1 %v5346_v19  ;;  %3495 = vmatpush1.bf16.msra.mxu0 %v5348_v39  ;;  %v5366_v19 = vcombine.low %v2471_v33, %v2479_v31  ;;  %v5368_v39 = vcombine.low %v2472_v32, %v2480_v37 }
 0x8c7   :  { %3453 = vmatprep.subr.bf16.mxu1 %v5331_v40  ;;  %3496 = vmatprep.subr.bf16.mxu0 %v5333_v15  ;;  %v5351_v40 = vcombine.high %v2455_v56, %v2463_v35  ;;  %v5353_v15 = vcombine.high %v2456_v49, %v2464_v36 }
 0x8ca   :  { %3454 = vmatpush1.bf16.msra.mxu1 %v5330_v34  ;;  %3497 = vmatpush1.bf16.msra.mxu0 %v5332_v57  ;;  %v5350_v34 = vcombine.low %v2455_v56, %v2463_v35  ;;  %v5352_v57 = vcombine.low %v2456_v49, %v2464_v36  ;;  %v2575_v56 = vsub.s32 6, %v6528_v12  ;;  %v2571_v35 = vsub.s32 5, %v6528_v12 }
 0x8cb   :  { %3455 = vmatprep.subr.bf16.mxu1 %v5315_v14  ;;  %3498 = vmatprep.subr.bf16.mxu0 %v5317_v43  ;;  %v5335_v14 = vcombine.high %v2439_v51, %v2447_v52  ;;  %v5337_v43 = vcombine.high %v2440_v54, %v2448_v47  ;;  %v2579_v49 = vsub.s32 7, %v6528_v12 }
 0x8ce   :  { %3456 = vmatpush1.bf16.msra.mxu1 %v5314_v45  ;;  %3499 = vmatpush1.bf16.msra.mxu0 %v5316_v46  ;;  %v5334_v45 = vcombine.low %v2439_v51, %v2447_v52  ;;  %v5336_v46 = vcombine.low %v2440_v54, %v2448_v47 }
 0x8cf   :  { %3527 = vmatprep.subr.bf16.mxu1 %v5431_v50  ;;  %3570 = vmatprep.subr.bf16.mxu0 %v5433_v30  ;;  %v5319_v50 = vcombine.high %v2423_v6, %v2431_v18  ;;  %v5321_v30 = vcombine.high %v2424_v24, %v2432_v44 }
 0x8d1   :  { %3474 = vmatmul.mubr.bf16.vlgmr.msra.gmra.mxu1 %v6889_v23  ;;  %3517 = vmatmul.mubr.bf16.vlgmr.msra.gmra.mxu0 %v6889_v23 }
 0x8d2   :  { %3528 = vmatpush1.bf16.msra.mxu1 %v5430_v60  ;;  %3571 = vmatpush1.bf16.msra.mxu0 %v5432_v61  ;;  %v2552_v60 = vrot.slane %v2545_v58, %v6531_v13  ;;  %v2560_v61 = vrot.slane %v2545_v58, %v6709_v53 }
 0x8d3   :  { %3529 = vmatprep.subr.bf16.mxu1 %v5415_v62  ;;  %3572 = vmatprep.subr.bf16.mxu0 %v5417_v63  ;;  %v2556_v62 = vrot.slane %v2545_v58, %v6541_v16 }
 0x8d4   :  { %3559 = vmatprep.mubr.bf16.mxu1 %v6356_v0  ;;  %3602 = vmatprep.mubr.bf16.mxu0 %v6356_v0  ;;  %v5369_v0 = vcombine.high %v2472_v32, %v2480_v37 }
 0x8d6   :  { %3530 = vmatpush1.bf16.msra.mxu1 %v5414_v8  ;;  %3573 = vmatpush1.bf16.msra.mxu0 %v5416_v10 }
 0x8d7   :  { %3531 = vmatprep.subr.bf16.mxu1 %v5399_v11  ;;  %3574 = vmatprep.subr.bf16.mxu0 %v5401_v17 }
 0x8da   :  { %3532 = vmatpush1.bf16.msra.mxu1 %v5398_v25  ;;  %3575 = vmatpush1.bf16.msra.mxu0 %v5400_v42 }
 0x8db   :  { %3533 = vmatprep.subr.bf16.mxu1 %v5383_v28  ;;  %3576 = vmatprep.subr.bf16.mxu0 %v5385_v5 }
 0x8de   :  { %3534 = vmatpush1.bf16.msra.mxu1 %v5382_v38  ;;  %3577 = vmatpush1.bf16.msra.mxu0 %v5384_v26 }
 0x8df   :  { %3535 = vmatprep.subr.bf16.mxu1 %v5367_v4  ;;  %3578 = vmatprep.subr.bf16.mxu0 %v5369_v0  ;;  %v2567_v0 = vsub.s32 4, %v6528_v12 }
 0x8e1   :  { %v2568_v36 = vrot.slane %v2545_v58, %v2567_v0 }
 0x8e2   :  { %3536 = vmatpush1.bf16.msra.mxu1 %v5366_v19  ;;  %3579 = vmatpush1.bf16.msra.mxu0 %v5368_v39  ;;  %v2576_v19 = vrot.slane %v2545_v58, %v2575_v56  ;;  %v2572_v39 = vrot.slane %v2545_v58, %v2571_v35 }
 0x8e3   :  { %3537 = vmatprep.subr.bf16.mxu1 %v5351_v40  ;;  %3580 = vmatprep.subr.bf16.mxu0 %v5353_v15  ;;  %v2580_v15 = vrot.slane %v2545_v58, %v2579_v49 }
 0x8e6   :  { %3538 = vmatpush1.bf16.msra.mxu1 %v5350_v34  ;;  %3581 = vmatpush1.bf16.msra.mxu0 %v5352_v57 }
 0x8e7   :  { %3539 = vmatprep.subr.bf16.mxu1 %v5335_v14  ;;  %3582 = vmatprep.subr.bf16.mxu0 %v5337_v43 }
 0x8ea   :  { %3540 = vmatpush1.bf16.msra.mxu1 %v5334_v45  ;;  %3583 = vmatpush1.bf16.msra.mxu0 %v5336_v46 }
 0x8eb   :  { %3541 = vmatprep.subr.bf16.mxu1 %v5319_v50  ;;  %3584 = vmatprep.subr.bf16.mxu0 %v5321_v30 }
 0x8ee   :  { %3542 = vmatpush1.bf16.msra.mxu1 %v5318_v48  ;;  %3585 = vmatpush1.bf16.msra.mxu0 %v5320_v55 }
 0x8f1   :  { %3560 = vmatmul.mubr.bf16.vlgmr.msra.gmra.mxu1 %v6889_v23  ;;  %3603 = vmatmul.mubr.bf16.vlgmr.msra.gmra.mxu0 %v6889_v23 }
 0x951   :  { %v3303_v63 = vpop.f32.mrf.mxu1  ;;  %v3346_v9 = vpop.f32.mrf.mxu0 }
 0x952   :  { %v6914_v7 = vadd.f32 %v3303_v63, %v2552_v60  ;;  %v6916_v23 = vadd.f32 %v3346_v9, %v2560_v61 }
 0x953   :  { %v3305_v3 = vpop.f32.mrf.mxu1  ;;  %v3348_v11 = vpop.f32.mrf.mxu0 }
 0x954   :  { %v3613_v8 = vmax.f32 %v6914_v7, 0.0  ;;  %v6919_v10 = vadd.f32 %v3305_v3, %v2556_v62  ;;  %v3615_v17 = vmax.f32 %v6916_v23, 0.0  ;;  %v6922_v41 = vadd.f32 %v3348_v11, %v2564_v1 }
 0x955   :  { %v3307_v20 = vpop.f32.mrf.mxu1  ;;  %v3350_v25 = vpop.f32.mrf.mxu0 }
 0x956   :  { %v3614_v21 = vmax.f32 %v6919_v10, 0.0  ;;  %v6925_v22 = vadd.f32 %v3307_v20, %v2552_v60  ;;  %v3616_v42 = vmax.f32 %v6922_v41, 0.0  ;;  %v6928_v28 = vadd.f32 %v3350_v25, %v2560_v61 }
 0x957   :  { %v3309_v5 = vpop.f32.mrf.mxu1  ;;  %v3352_v32 = vpop.f32.mrf.mxu0 }
 0x958   :  { %v3629_v33 = vmax.f32 %v6925_v22, 0.0  ;;  %v6931_v31 = vadd.f32 %v3309_v5, %v2556_v62  ;;  %v3631_v37 = vmax.f32 %v6928_v28, 0.0  ;;  %v6934_v38 = vadd.f32 %v3352_v32, %v2564_v1  ;;  %v2546_v1 = vld [vmem:[%s7122_s9 + $0x8] sm:$0xff] }
 0x959   :  { %v2584_v9 = vrot.slane %v2546_v1, %v6531_v13  ;;  %v2592_v3 = vrot.slane %v2546_v1, %v6709_v53  ;;  %v2588_v11 = vrot.slane %v2546_v1, %v6541_v16  ;;  %v2596_v25 = vrot.slane %v2546_v1, %v2563_v59 }
 0x95a   :  { %v3630_v26 = vmax.f32 %v6931_v31, 0.0  ;;  %v3632_v4 = vmax.f32 %v6934_v38, 0.0  ;;  %v2604_v2 = vrot.slane %v2546_v1, %v2571_v35 }
 0x971   :  { %v3389_v40 = vpop.f32.mrf.mxu1  ;;  %v3432_v52 = vpop.f32.mrf.mxu0 }
 0x972   :  { %v6942_v51 = vadd.f32 %v3389_v40, %v2568_v36  ;;  %v6944_v54 = vadd.f32 %v3432_v52, %v2576_v19 }
 0x973   :  { %v3391_v47 = vpop.f32.mrf.mxu1  ;;  %v3434_v14 = vpop.f32.mrf.mxu0 }
 0x974   :  { %v3617_v34 = vmax.f32 %v6942_v51, 0.0  ;;  %v6947_v57 = vadd.f32 %v3391_v47, %v2572_v39  ;;  %v3619_v43 = vmax.f32 %v6944_v54, 0.0  ;;  %v6950_v6 = vadd.f32 %v3434_v14, %v2580_v15 }
 0x975   :  { %v3393_v18 = vpop.f32.mrf.mxu1  ;;  %v3436_v45 = vpop.f32.mrf.mxu0 }
 0x976   :  { %v3618_v24 = vmax.f32 %v6947_v57, 0.0  ;;  %v6953_v44 = vadd.f32 %v3393_v18, %v2568_v36  ;;  %v3620_v46 = vmax.f32 %v6950_v6, 0.0  ;;  %v6956_v50 = vadd.f32 %v3436_v45, %v2576_v19 }
 0x977   :  { %v3395_v30 = vpop.f32.mrf.mxu1  ;;  %v3438_v58 = vpop.f32.mrf.mxu0 }
 0x978   :  { %v3633_v48 = vmax.f32 %v6953_v44, 0.0  ;;  %v6959_v55 = vadd.f32 %v3395_v30, %v2572_v39  ;;  %v3635_v60 = vmax.f32 %v6956_v50, 0.0  ;;  %v6962_v61 = vadd.f32 %v3438_v58, %v2580_v15 }
 0x97a   :  { %v3634_v62 = vmax.f32 %v6959_v55, 0.0  ;;  %v3636_v63 = vmax.f32 %v6962_v61, 0.0 }
 0x991   :  { %v3475_v20 = vpop.f32.mrf.mxu1  ;;  %v3518_v32 = vpop.f32.mrf.mxu0 }
 0x992   :  { %v6974_v5 = vadd.f32 %v3475_v20, %v2584_v9  ;;  %v6976_v36 = vadd.f32 %v3518_v32, %v2592_v3 }
 0x993   :  { %v3477_v19 = vpop.f32.mrf.mxu1  ;;  %v3520_v15 = vpop.f32.mrf.mxu0 }
 0x994   :  { %v6979_v40 = vadd.f32 %v3477_v19, %v2588_v11  ;;  %v6982_v53 = vadd.f32 %v3520_v15, %v2596_v25  ;;  %v2600_v15 = vrot.slane %v2546_v1, %v2567_v0 }
 0x995   :  { %v3479_v16 = vpop.f32.mrf.mxu1  ;;  %v3522_v59 = vpop.f32.mrf.mxu0 }
 0x996   :  { %v3622_v52 = vmax.f32 %v6979_v40, 0.0  ;;  %v6985_v12 = vadd.f32 %v3479_v16, %v2584_v9  ;;  %v6988_v14 = vadd.f32 %v3522_v59, %v2592_v3  ;;  %v2608_v16 = vrot.slane %v2546_v1, %v2575_v56 }
 0x997   :  { %v3481_v18 = vpop.f32.mrf.mxu1  ;;  %v3524_v58 = vpop.f32.mrf.mxu0  ;;  %v2612_v3 = vrot.slane %v2546_v1, %v2579_v49 }
 0x998   :  { %v6991_v30 = vadd.f32 %v3481_v18, %v2588_v11  ;;  %v6994_v32 = vadd.f32 %v3524_v58, %v2596_v25 }
 0x9b1   :  { %v3561_v13 = vpop.f32.mrf.mxu1  ;;  %v3604_v39 = vpop.f32.mrf.mxu0 }
 0x9b2   :  { %v6998_v59 = vadd.f32 %v3561_v13, %v2600_v15  ;;  %v7000_v45 = vadd.f32 %v3604_v39, %v2608_v16 }
 0x9b3   :  { %v3563_v11 = vpop.f32.mrf.mxu1  ;;  %v3606_v25 = vpop.f32.mrf.mxu0 }
 0x9b4   :  { %v7003_v20 = vadd.f32 %v3563_v11, %v2604_v2  ;;  %v7006_v47 = vadd.f32 %v3606_v25, %v2612_v3 }
 0x9b5   :  { %v3565_v0 = vpop.f32.mrf.mxu1  ;;  %v3608_v49 = vpop.f32.mrf.mxu0 }
 0x9b6   :  { %v3626_v56 = vmax.f32 %v7003_v20, 0.0  ;;  %v7009_v35 = vadd.f32 %v3565_v0, %v2600_v15  ;;  %v3628_v1 = vmax.f32 %v7006_v47, 0.0  ;;  %v7012_v39 = vadd.f32 %v3608_v49, %v2608_v16 }
 0x9b7   :  { %v3567_v13 = vpop.f32.mrf.mxu1  ;;  %v3610_v9 = vpop.f32.mrf.mxu0 }
 0x9b8   :  { %v3641_v18 = vmax.f32 %v7009_v35, 0.0  ;;  %v7015_v11 = vadd.f32 %v3567_v13, %v2604_v2  ;;  %v3643_v58 = vmax.f32 %v7012_v39, 0.0  ;;  %v7018_v25 = vadd.f32 %v3610_v9, %v2612_v3 }
 0x9ba   :  { %v3642_v19 = vmax.f32 %v7015_v11, 0.0  ;;  %v3644_v15 = vmax.f32 %v7018_v25, 0.0 }
 0x9bb   :  { %6344 = dma.done.wait [#allocation4 + $0x1], 16384 }
 0x9bc   :  { %6345 = vsyncadd [#allocation4 + $0x1], 4294950912  ;;  %v3650_v16 = vpack.c.bf16 %v3630_v26, %v3614_v21  ;;  %v3652_v2 = vpack.c.bf16 %v3632_v4, %v3616_v42  ;;  %v6056_v9 = vld [vmem:[#allocation3 + $0x78] sm:$0xff]   ;;  %v6060_v13 = vld [vmem:[#allocation3 + $0x70] sm:$0xff]   ;;  %v3656_v7 = vpack.c.bf16 %v3636_v63, %v3620_v46  ;;  %v7136_v51 = vmax.f32 %v6982_v53, 0.0  ;;  %s6368_s3 = smov [#allocation13]  }
 0x9bd   :  { %v6057_v3 = vld [vmem:[#allocation3 + $0xf8] sm:$0xff]   ;;  %5619 = vmatprep.subr.bf16.mxu1 %v6056_v9  ;;  %v6061_v10 = vld [vmem:[#allocation3 + $0xf0] sm:$0xff]   ;;  %v6064_v41 = vld [vmem:[#allocation3 + $0x68] sm:$0xff]   ;;  %vm5110_vm5 = vcmask 1041409   ;;  %s5209_s0 = sshll.u32 %s6368_s3, 4  ;;  %s5210_s0 = int_to_ptr.vmem [resolvable:$true] %s5209_s0 }
 0x9be   :  { %4728 = vmatprep.mubr.bf16.mxu1 %v3650_v16  ;;  %4769 = vmatprep.mubr.bf16.mxu0 %v3652_v2  ;;  %v6058_v0 = vld [vmem:[#allocation3 + $0x38] sm:$0xff]   ;;  %v6062_v31 = vld [vmem:[#allocation3 + $0x30] sm:$0xff]   ;;  %v6065_v42 = vld [vmem:[#allocation3 + $0xe8] sm:$0xff]   ;;  %s6316_s20 = scalar_lea.vmem %s5210_s0, 32  ;;  %p6321_p3 = scmp.lt.s32.totalorder %s5210_s0, %s5210_s0 }
 0x9bf   :  { %5641 = vmatprep.subr.bf16.mxu0 %v6057_v3  ;;  %v6059_v49 = vld [vmem:[#allocation3 + $0xb8] sm:$0xff]   ;;  %5620 = vmatpush3.bf16.msra.mxu1 %v6058_v0  ;;  %v6063_v21 = vld [vmem:[#allocation3 + $0xb0] sm:$0xff]   ;;  %v6066_v38 = vld [vmem:[#allocation3 + $0x28] sm:$0xff]   ;;  %p6317_p2 = scmp.ne.s32.totalorder %s5210_s0, %s6316_s20  ;;  %p6322_p4 = scmp.lt.s32.totalorder %s6316_s20, %s6316_s20 }
 0x9c0   :  { %5642 = vmatpush3.bf16.msra.mxu0 %v6059_v49  ;;  %5621 = vmatprep.subr.bf16.mxu1 %v6060_v13  ;;  %v6067_v26 = vld [vmem:[#allocation3 + $0xa8] sm:$0xff]   ;;  %v6068_v4 = vld [vmem:[#allocation3 + $0x60] sm:$0xff]   ;;  %v6072_v3 = vld [vmem:[#allocation3 + $0x58] sm:$0xff]  }
 0x9c1   :  { %5643 = vmatprep.subr.bf16.mxu0 %v6061_v10  ;;  %v6069_v16 = vld [vmem:[#allocation3 + $0xe0] sm:$0xff]   ;;  %v6073_v0 = vld [vmem:[#allocation3 + $0xd8] sm:$0xff]   ;;  %v6076_v10 = vld [vmem:[#allocation3 + $0x50] sm:$0xff]   ;;  %p6323_p5 = por %p6322_p4, %p6321_p3 }
 0x9c2   :  { %v6070_v2 = vld [vmem:[#allocation3 + $0x20] sm:$0xff]   ;;  %v6074_v49 = vld [vmem:[#allocation3 + $0x18] sm:$0xff]   ;;  %v6094_v22 = vld [vmem:[#allocation3 + $0x130] sm:$0xff]  }
 0x9c3   :  { %5622 = vmatpush3.bf16.msra.mxu1 %v6062_v31  ;;  %v6071_v9 = vld [vmem:[#allocation3 + $0xa0] sm:$0xff]   ;;  %v6075_v13 = vld [vmem:[#allocation3 + $0x98] sm:$0xff]   ;;  %v6077_v31 = vld [vmem:[#allocation3 + $0xd0] sm:$0xff]   ;;  %p6324_p6 = pnand %p6323_p5, %p6317_p2 }
 0x9c4   :  { %5644 = vmatpush3.bf16.msra.mxu0 %v6063_v21  ;;  %5623 = vmatprep.subr.bf16.mxu1 %v6064_v41  ;;  %v6078_v21 = vld [vmem:[#allocation3 + $0x10] sm:$0xff]   ;;  %v6091_v23 = vld [vmem:[#allocation3 + $0x1b8] sm:$0xff]   ;;  %v6098_v57 = vld [vmem:[#allocation3 + $0x128] sm:$0xff]  }
 0x9c5   :  { %5645 = vmatprep.subr.bf16.mxu0 %v6065_v42  ;;  %v6079_v41 = vld [vmem:[#allocation3 + $0x90] sm:$0xff]   ;;  %v6080_v42 = vld [vmem:[#allocation3 + $0x48] sm:$0xff]   ;;  %v6101_v46 = vld [vmem:[#allocation3 + $0x1e0] sm:$0xff]  }
 0x9c6   :  { %v6095_v28 = vld [vmem:[#allocation3 + $0x1b0] sm:$0xff]   ;;  %v6099_v6 = vld [vmem:[#allocation3 + $0x1a8] sm:$0xff]   ;;  %v6102_v55 = vld [vmem:[#allocation3 + $0x120] sm:$0xff]  }
 0x9c7   :  { %5624 = vmatpush3.bf16.msra.mxu1 %v6066_v38  ;;  %v6081_v38 = vld [vmem:[#allocation3 + $0xc8] sm:$0xff]   ;;  %v6103_v61 = vld [vmem:[#allocation3 + $0x1a0] sm:$0xff]   ;;  %v6105_v63 = vld [vmem:[#allocation3 + $0x1d8] sm:$0xff]  }
 0x9c8   :  { %5646 = vmatpush3.bf16.msra.mxu0 %v6067_v26  ;;  %5625 = vmatprep.subr.bf16.mxu1 %v6068_v4  ;;  %v6082_v26 = vld [vmem:[#allocation3 + $0x8] sm:$0xff]   ;;  %v6123_v54 = vld [vmem:[#allocation3 + $0x2b8] sm:$0xff]   ;;  %v6125_v50 = vld [vmem:[#allocation3 + $0x2f0] sm:$0xff]  }
 0x9c9   :  { %5647 = vmatprep.subr.bf16.mxu0 %v6069_v16  ;;  %v6083_v4 = vld [vmem:[#allocation3 + $0x88] sm:$0xff]   ;;  %v6084_v16 = vld [vmem:[#allocation3 + $0x40] sm:$0xff]   ;;  %v6158_v20 = vld [vmem:[#allocation3 + $0x330] sm:$0xff]  }
 0x9ca   :  { %v6128_v40 = vld [vmem:[#allocation3 + $0x268] sm:$0xff]   ;;  %v6164_v25 = vld [vmem:[#allocation3 + $0x360] sm:$0xff]  }
 0x9cb   :  { %5626 = vmatpush3.bf16.msra.mxu1 %v6070_v2  ;;  %v6085_v2 = vld [vmem:[#allocation3 + $0xc0] sm:$0xff]   ;;  %v6129_v53 = vld [vmem:[#allocation3 + $0x2e8] sm:$0xff]  }
 0x9cc   :  { %5648 = vmatpush3.bf16.msra.mxu0 %v6071_v9  ;;  %5627 = vmatprep.subr.bf16.mxu1 %v6072_v3  ;;  %v6086_v9 = vld [vmem:[#allocation3] sm:$0xff]   ;;  %v6161_v47 = vld [vmem:[#allocation3 + $0x3e8] sm:$0xff]  }
 0x9cd   :  { %5649 = vmatprep.subr.bf16.mxu0 %v6073_v0  ;;  %v6087_v3 = vld [vmem:[#allocation3 + $0x80] sm:$0xff]   ;;  %v3649_v0 = vpack.c.bf16 %v3629_v33, %v3613_v8  ;;  %v6092_v8 = vld [vmem:[#allocation3 + $0x170] sm:$0xff]   ;;  %v6096_v33 = vld [vmem:[#allocation3 + $0x168] sm:$0xff]  }
 0x9ce   :  { %v6163_v11 = vld [vmem:[#allocation3 + $0x3a8] sm:$0xff]  }
 0x9cf   :  { %5628 = vmatpush3.bf16.msra.mxu1 %v6074_v49  ;;  %v3651_v49 = vpack.c.bf16 %v3631_v37, %v3615_v17  ;;  %v6093_v17 = vld [vmem:[#allocation3 + $0x1f0] sm:$0xff]   ;;  %v6097_v37 = vld [vmem:[#allocation3 + $0x1e8] sm:$0xff]  }
 0x9d0   :  { %5650 = vmatpush3.bf16.msra.mxu0 %v6075_v13  ;;  %5629 = vmatprep.subr.bf16.mxu1 %v6076_v10  ;;  %v6088_v13 = vld [vmem:[#allocation3 + $0x178] sm:$0xff]  }
 0x9d1   :  { %5651 = vmatprep.subr.bf16.mxu0 %v6077_v31  ;;  %v6089_v10 = vld [vmem:[#allocation3 + $0x1f8] sm:$0xff]   ;;  %v3654_v31 = vpack.c.bf16 %v3634_v62, %v3618_v24  ;;  %v6100_v24 = vld [vmem:[#allocation3 + $0x160] sm:$0xff]  }
 0x9d2   :  { %v6104_v62 = vld [vmem:[#allocation3 + $0x158] sm:$0xff]  }
 0x9d3   :  { %5630 = vmatpush3.bf16.msra.mxu1 %v6078_v21  ;;  %v6090_v21 = vld [vmem:[#allocation3 + $0x138] sm:$0xff]  }
 0x9d4   :  { %5652 = vmatpush3.bf16.msra.mxu0 %v6079_v41  ;;  %5631 = vmatprep.subr.bf16.mxu1 %v6080_v42  ;;  %v6106_v41 = vld [vmem:[#allocation3 + $0x118] sm:$0xff]  }
 0x9d5   :  { %5653 = vmatprep.subr.bf16.mxu0 %v6081_v38  ;;  %v6107_v42 = vld [vmem:[#allocation3 + $0x198] sm:$0xff]   ;;  %v6108_v38 = vld [vmem:[#allocation3 + $0x150] sm:$0xff]  }
 0x9d7   :  { %5632 = vmatpush3.bf16.msra.mxu1 %v6082_v26  ;;  %v6109_v26 = vld [vmem:[#allocation3 + $0x1d0] sm:$0xff]  }
 0x9d8   :  { %5654 = vmatpush3.bf16.msra.mxu0 %v6083_v4  ;;  %5633 = vmatprep.subr.bf16.mxu1 %v6084_v16  ;;  %v6110_v4 = vld [vmem:[#allocation3 + $0x110] sm:$0xff]  }
 0x9d9   :  { %5655 = vmatprep.subr.bf16.mxu0 %v6085_v2  ;;  %v6111_v16 = vld [vmem:[#allocation3 + $0x190] sm:$0xff]   ;;  %v6112_v2 = vld [vmem:[#allocation3 + $0x148] sm:$0xff]  }
 0x9db   :  { %5634 = vmatpush3.bf16.msra.mxu1 %v6086_v9  ;;  %v6113_v9 = vld [vmem:[#allocation3 + $0x1c8] sm:$0xff]  }
 0x9dc   :  { %5656 = vmatpush3.bf16.msra.mxu0 %v6087_v3  ;;  %5663 = vmatprep.subr.bf16.mxu1 %v6088_v13  ;;  %v6114_v3 = vld [vmem:[#allocation3 + $0x108] sm:$0xff]   ;;  %v6117_v13 = vld [vmem:[#allocation3 + $0x1c0] sm:$0xff]  }
 0x9dd   :  { %5685 = vmatprep.subr.bf16.mxu0 %v6089_v10  ;;  %v6118_v10 = vld [vmem:[#allocation3 + $0x100] sm:$0xff]  }
 0x9de   :  { %4729 = vmatmul.mubr.bf16.vlgmr.msra.gmra.mxu1 %v3649_v0  ;;  %v6115_v0 = vld [vmem:[#allocation3 + $0x188] sm:$0xff]  }
 0x9df   :  { %4770 = vmatmul.mubr.bf16.vlgmr.msra.gmra.mxu0 %v3651_v49  ;;  %5664 = vmatpush3.bf16.msra.mxu1 %v6090_v21  ;;  %v6116_v49 = vld [vmem:[#allocation3 + $0x140] sm:$0xff]   ;;  %v3653_v21 = vpack.c.bf16 %v3633_v48, %v3617_v34  ;;  %v7137_v34 = vmax.f32 %v6994_v32, 0.0  ;;  %v6126_v48 = vld [vmem:[#allocation3 + $0x230] sm:$0xff]  }
 0x9e0   :  { %5686 = vmatpush3.bf16.msra.mxu0 %v6091_v23  ;;  %4810 = vmatprep.mubr.bf16.mxu1 %v3654_v31  ;;  %v6119_v31 = vld [vmem:[#allocation3 + $0x180] sm:$0xff]   ;;  %v6120_v23 = vld [vmem:[#allocation3 + $0x278] sm:$0xff]  }
 0x9e1   :  { %5665 = vmatprep.subr.bf16.mxu1 %v6092_v8  ;;  %4851 = vmatprep.mubr.bf16.mxu0 %v3656_v7  ;;  %v3655_v7 = vpack.c.bf16 %v3635_v60, %v3619_v43  ;;  %v6121_v8 = vld [vmem:[#allocation3 + $0x2f8] sm:$0xff]   ;;  %v3660_v44 = vpack.c.bf16 %v7137_v34, %v7136_v51  ;;  %v6124_v43 = vld [vmem:[#allocation3 + $0x270] sm:$0xff]   ;;  %v6132_v32 = vld [vmem:[#allocation3 + $0x260] sm:$0xff]  }
 0x9e2   :  { %5687 = vmatprep.subr.bf16.mxu0 %v6093_v17  ;;  %v7135_v17 = vmax.f32 %v6991_v30, 0.0  ;;  %v6127_v60 = vld [vmem:[#allocation3 + $0x2b0] sm:$0xff]   ;;  %v6131_v30 = vld [vmem:[#allocation3 + $0x2a8] sm:$0xff]   ;;  %v6168_v51 = vld [vmem:[#allocation3 + $0x358] sm:$0xff]  }
 0x9e3   :  { %5666 = vmatpush3.bf16.msra.mxu1 %v6094_v22  ;;  %v6169_v34 = vld [vmem:[#allocation3 + $0x3d8] sm:$0xff]  }
 0x9e4   :  { %5688 = vmatpush3.bf16.msra.mxu0 %v6095_v28  ;;  %5667 = vmatprep.subr.bf16.mxu1 %v6096_v33  ;;  %v3658_v22 = vpack.c.bf16 %v7135_v17, %v3622_v52  ;;  %v6122_v28 = vld [vmem:[#allocation3 + $0x238] sm:$0xff]   ;;  %v6130_v52 = vld [vmem:[#allocation3 + $0x228] sm:$0xff]   ;;  %v6133_v33 = vld [vmem:[#allocation3 + $0x2e0] sm:$0xff]  }
 0x9e5   :  { %5689 = vmatprep.subr.bf16.mxu0 %v6097_v37  ;;  %v6134_v37 = vld [vmem:[#allocation3 + $0x220] sm:$0xff]   ;;  %v6154_v17 = vld [vmem:[#allocation3 + $0x338] sm:$0xff]  }
 0x9e7   :  { %5668 = vmatpush3.bf16.msra.mxu1 %v6098_v57  ;;  %v6135_v57 = vld [vmem:[#allocation3 + $0x2a0] sm:$0xff]  }
 0x9e8   :  { %5690 = vmatpush3.bf16.msra.mxu0 %v6099_v6  ;;  %5669 = vmatprep.subr.bf16.mxu1 %v6100_v24  ;;  %v6136_v6 = vld [vmem:[#allocation3 + $0x258] sm:$0xff]  }
 0x9e9   :  { %5691 = vmatprep.subr.bf16.mxu0 %v6101_v46  ;;  %v6137_v24 = vld [vmem:[#allocation3 + $0x2d8] sm:$0xff]  }
 0x9ea   :  { %v6138_v46 = vld [vmem:[#allocation3 + $0x218] sm:$0xff]  }
 0x9eb   :  { %5670 = vmatpush3.bf16.msra.mxu1 %v6102_v55  ;;  %v6139_v55 = vld [vmem:[#allocation3 + $0x298] sm:$0xff]  }
 0x9ec   :  { %5692 = vmatpush3.bf16.msra.mxu0 %v6103_v61  ;;  %5671 = vmatprep.subr.bf16.mxu1 %v6104_v62  ;;  %v6140_v61 = vld [vmem:[#allocation3 + $0x250] sm:$0xff]  }
 0x9ed   :  { %5693 = vmatprep.subr.bf16.mxu0 %v6105_v63  ;;  %v6141_v62 = vld [vmem:[#allocation3 + $0x2d0] sm:$0xff]  }
 0x9ee   :  { %v6142_v63 = vld [vmem:[#allocation3 + $0x210] sm:$0xff]  }
 0x9ef   :  { %5672 = vmatpush3.bf16.msra.mxu1 %v6106_v41  ;;  %v6143_v41 = vld [vmem:[#allocation3 + $0x290] sm:$0xff]  }
 0x9f0   :  { %5694 = vmatpush3.bf16.msra.mxu0 %v6107_v42  ;;  %5673 = vmatprep.subr.bf16.mxu1 %v6108_v38  ;;  %v6144_v42 = vld [vmem:[#allocation3 + $0x248] sm:$0xff]  }
 0x9f1   :  { %5695 = vmatprep.subr.bf16.mxu0 %v6109_v26  ;;  %v6145_v38 = vld [vmem:[#allocation3 + $0x2c8] sm:$0xff]  }
 0x9f2   :  { %v6146_v26 = vld [vmem:[#allocation3 + $0x208] sm:$0xff]  }
 0x9f3   :  { %5674 = vmatpush3.bf16.msra.mxu1 %v6110_v4  ;;  %v6147_v4 = vld [vmem:[#allocation3 + $0x288] sm:$0xff]  }
 0x9f4   :  { %5696 = vmatpush3.bf16.msra.mxu0 %v6111_v16  ;;  %5675 = vmatprep.subr.bf16.mxu1 %v6112_v2  ;;  %v6148_v16 = vld [vmem:[#allocation3 + $0x240] sm:$0xff]  }
 0x9f5   :  { %5697 = vmatprep.subr.bf16.mxu0 %v6113_v9  ;;  %v6149_v2 = vld [vmem:[#allocation3 + $0x2c0] sm:$0xff]  }
 0x9f6   :  { %v6150_v9 = vld [vmem:[#allocation3 + $0x200] sm:$0xff]  }
 0x9f7   :  { %5676 = vmatpush3.bf16.msra.mxu1 %v6114_v3  ;;  %v6151_v3 = vld [vmem:[#allocation3 + $0x280] sm:$0xff]  }
 0x9f8   :  { %5698 = vmatpush3.bf16.msra.mxu0 %v6115_v0  ;;  %5677 = vmatprep.subr.bf16.mxu1 %v6116_v49  ;;  %v7138_v0 = vmax.f32 %v6974_v5, 0.0  ;;  %v7139_v49 = vmax.f32 %v6985_v12, 0.0  ;;  %v3664_v5 = vpack.c.bf16 %v3644_v15, %v3628_v1  ;;  %v6156_v12 = vld [vmem:[#allocation3 + $0x370] sm:$0xff]   ;;  %v6162_v1 = vld [vmem:[#allocation3 + $0x328] sm:$0xff]   ;;  %v6165_v15 = vld [vmem:[#allocation3 + $0x3e0] sm:$0xff]  }
 0x9f9   :  { %5699 = vmatprep.subr.bf16.mxu0 %v6117_v13 }
 0x9fa   :  { %v3657_v13 = vpack.c.bf16 %v7139_v49, %v7138_v0 }
 0x9fb   :  { %5678 = vmatpush3.bf16.msra.mxu1 %v6118_v10  ;;  %v7140_v10 = vmax.f32 %v6976_v36, 0.0  ;;  %v6155_v36 = vld [vmem:[#allocation3 + $0x3b8] sm:$0xff]  }
 0x9fc   :  { %5700 = vmatpush3.bf16.msra.mxu0 %v6119_v31  ;;  %5707 = vmatprep.subr.bf16.mxu1 %v6120_v23  ;;  %v7141_v31 = vmax.f32 %v6988_v14, 0.0  ;;  %v6153_v23 = vld [vmem:[#allocation3 + $0x3f8] sm:$0xff]   ;;  %v6157_v14 = vld [vmem:[#allocation3 + $0x3f0] sm:$0xff]  }
 0x9fd   :  { %5729 = vmatprep.subr.bf16.mxu0 %v6121_v8  ;;  %v3662_v8 = vpack.c.bf16 %v3642_v19, %v3626_v56  ;;  %v6159_v19 = vld [vmem:[#allocation3 + $0x3b0] sm:$0xff]   ;;  %v6160_v56 = vld [vmem:[#allocation3 + $0x368] sm:$0xff]  }
 0x9fe   :  { %4811 = vmatmul.mubr.bf16.vlgmr.msra.gmra.mxu1 %v3653_v21  ;;  %v3659_v21 = vpack.c.bf16 %v7141_v31, %v7140_v10 }
 0x9ff   :  { %4852 = vmatmul.mubr.bf16.vlgmr.msra.gmra.mxu0 %v3655_v7  ;;  %5708 = vmatpush3.bf16.msra.mxu1 %v6122_v28  ;;  %v6152_v7 = vld [vmem:[#allocation3 + $0x378] sm:$0xff]   ;;  %v6167_v28 = vld [vmem:[#allocation3 + $0x3a0] sm:$0xff]  }
 0xa00   :  { %5730 = vmatpush3.bf16.msra.mxu0 %v6123_v54  ;;  %4892 = vmatprep.mubr.bf16.mxu1 %v3658_v22  ;;  %v6166_v22 = vld [vmem:[#allocation3 + $0x320] sm:$0xff]   ;;  %v6171_v54 = vld [vmem:[#allocation3 + $0x398] sm:$0xff]  }
 0xa01   :  { %5709 = vmatprep.subr.bf16.mxu1 %v6124_v43  ;;  %4933 = vmatprep.mubr.bf16.mxu0 %v3660_v44  ;;  %v6170_v44 = vld [vmem:[#allocation3 + $0x318] sm:$0xff]   ;;  %v6172_v43 = vld [vmem:[#allocation3 + $0x350] sm:$0xff]  }
 0xa02   :  { %5731 = vmatprep.subr.bf16.mxu0 %v6125_v50  ;;  %v6173_v50 = vld [vmem:[#allocation3 + $0x3d0] sm:$0xff]  }
 0xa03   :  { %5710 = vmatpush3.bf16.msra.mxu1 %v6126_v48  ;;  %v6174_v48 = vld [vmem:[#allocation3 + $0x310] sm:$0xff]  }
 0xa04   :  { %5732 = vmatpush3.bf16.msra.mxu0 %v6127_v60  ;;  %5711 = vmatprep.subr.bf16.mxu1 %v6128_v40  ;;  %v6175_v60 = vld [vmem:[#allocation3 + $0x390] sm:$0xff]   ;;  %v6176_v40 = vld [vmem:[#allocation3 + $0x348] sm:$0xff]  }
 0xa05   :  { %5733 = vmatprep.subr.bf16.mxu0 %v6129_v53  ;;  %v6177_v53 = vld [vmem:[#allocation3 + $0x3c8] sm:$0xff]  }
 0xa07   :  { %5712 = vmatpush3.bf16.msra.mxu1 %v6130_v52  ;;  %v6178_v52 = vld [vmem:[#allocation3 + $0x308] sm:$0xff]  }
 0xa08   :  { %5734 = vmatpush3.bf16.msra.mxu0 %v6131_v30  ;;  %5713 = vmatprep.subr.bf16.mxu1 %v6132_v32  ;;  %v6179_v30 = vld [vmem:[#allocation3 + $0x388] sm:$0xff]   ;;  %v6180_v32 = vld [vmem:[#allocation3 + $0x340] sm:$0xff]  }
 0xa09   :  { %5735 = vmatprep.subr.bf16.mxu0 %v6133_v33  ;;  %v6181_v33 = vld [vmem:[#allocation3 + $0x3c0] sm:$0xff]  }
 0xa0b   :  { %5714 = vmatpush3.bf16.msra.mxu1 %v6134_v37  ;;  %v6182_v37 = vld [vmem:[#allocation3 + $0x300] sm:$0xff]  }
 0xa0c   :  { %5736 = vmatpush3.bf16.msra.mxu0 %v6135_v57  ;;  %5715 = vmatprep.subr.bf16.mxu1 %v6136_v6  ;;  %v6183_v57 = vld [vmem:[#allocation3 + $0x380] sm:$0xff]   ;;  %v7142_v6 = vmax.f32 %v6998_v59, 0.0 }
 0xa0d   :  { %5737 = vmatprep.subr.bf16.mxu0 %v6137_v24 }
 0xa0e   :  { %v3661_v24 = vpack.c.bf16 %v3641_v18, %v7142_v6 }
 0xa0f   :  { %5716 = vmatpush3.bf16.msra.mxu1 %v6138_v46  ;;  %v7143_v46 = vmax.f32 %v7000_v45, 0.0 }
 0xa10   :  { %5738 = vmatpush3.bf16.msra.mxu0 %v6139_v55  ;;  %5717 = vmatprep.subr.bf16.mxu1 %v6140_v61  ;;  %v7144_v61 = vmov 0.0  }
 0xa11   :  { %5739 = vmatprep.subr.bf16.mxu0 %v6141_v62  ;;  %v3663_v55 = vpack.c.bf16 %v3643_v58, %v7143_v46 }
 0xa13   :  { %5718 = vmatpush3.bf16.msra.mxu1 %v6142_v63 }
 0xa14   :  { %5740 = vmatpush3.bf16.msra.mxu0 %v6143_v41  ;;  %5719 = vmatprep.subr.bf16.mxu1 %v6144_v42 }
 0xa15   :  { %5741 = vmatprep.subr.bf16.mxu0 %v6145_v38 }
 0xa17   :  { %5720 = vmatpush3.bf16.msra.mxu1 %v6146_v26 }
 0xa18   :  { %5742 = vmatpush3.bf16.msra.mxu0 %v6147_v4  ;;  %5721 = vmatprep.subr.bf16.mxu1 %v6148_v16 }
 0xa19   :  { %5743 = vmatprep.subr.bf16.mxu0 %v6149_v2 }
 0xa1b   :  { %5722 = vmatpush3.bf16.msra.mxu1 %v6150_v9 }
 0xa1c   :  { %5744 = vmatpush3.bf16.msra.mxu0 %v6151_v3  ;;  %5751 = vmatprep.subr.bf16.mxu1 %v6152_v7  ;;  %v5434_v3 = vld [vmem:[%s7124_s11] ss:$0 sm:$0xff] }
 0xa1d   :  { %5773 = vmatprep.subr.bf16.mxu0 %v6153_v23 }
 0xa1e   :  { %4893 = vmatmul.mubr.bf16.vlgmr.msra.gmra.mxu1 %v3657_v13 }
 0xa1f   :  { %4934 = vmatmul.mubr.bf16.vlgmr.msra.gmra.mxu0 %v3659_v21  ;;  %5752 = vmatpush3.bf16.msra.mxu1 %v6154_v17 }
 0xa20   :  { %5774 = vmatpush3.bf16.msra.mxu0 %v6155_v36  ;;  %4974 = vmatprep.mubr.bf16.mxu1 %v3662_v8 }
 0xa21   :  { %5753 = vmatprep.subr.bf16.mxu1 %v6156_v12  ;;  %5015 = vmatprep.mubr.bf16.mxu0 %v3664_v5 }
 0xa22   :  { %5775 = vmatprep.subr.bf16.mxu0 %v6157_v14 }
 0xa23   :  { %5754 = vmatpush3.bf16.msra.mxu1 %v6158_v20 }
 0xa24   :  { %5776 = vmatpush3.bf16.msra.mxu0 %v6159_v19  ;;  %5755 = vmatprep.subr.bf16.mxu1 %v6160_v56 }
 0xa25   :  { %5777 = vmatprep.subr.bf16.mxu0 %v6161_v47 }
 0xa27   :  { %5756 = vmatpush3.bf16.msra.mxu1 %v6162_v1 }
 0xa28   :  { %5778 = vmatpush3.bf16.msra.mxu0 %v6163_v11  ;;  %5757 = vmatprep.subr.bf16.mxu1 %v6164_v25 }
 0xa29   :  { %5779 = vmatprep.subr.bf16.mxu0 %v6165_v15 }
 0xa2b   :  { %5758 = vmatpush3.bf16.msra.mxu1 %v6166_v22 }
 0xa2c   :  { %5780 = vmatpush3.bf16.msra.mxu0 %v6167_v28  ;;  %5759 = vmatprep.subr.bf16.mxu1 %v6168_v51 }
 0xa2d   :  { %5781 = vmatprep.subr.bf16.mxu0 %v6169_v34 }
 0xa2f   :  { %5760 = vmatpush3.bf16.msra.mxu1 %v6170_v44 }
 0xa30   :  { %5782 = vmatpush3.bf16.msra.mxu0 %v6171_v54  ;;  %5761 = vmatprep.subr.bf16.mxu1 %v6172_v43 }
 0xa31   :  { %5783 = vmatprep.subr.bf16.mxu0 %v6173_v50 }
 0xa33   :  { %5762 = vmatpush3.bf16.msra.mxu1 %v6174_v48 }
 0xa34   :  { %5784 = vmatpush3.bf16.msra.mxu0 %v6175_v60  ;;  %5763 = vmatprep.subr.bf16.mxu1 %v6176_v40 }
 0xa35   :  { %5785 = vmatprep.subr.bf16.mxu0 %v6177_v53 }
 0xa37   :  { %5764 = vmatpush3.bf16.msra.mxu1 %v6178_v52 }
 0xa38   :  { %5786 = vmatpush3.bf16.msra.mxu0 %v6179_v30  ;;  %5765 = vmatprep.subr.bf16.mxu1 %v6180_v32 }
 0xa39   :  { %5787 = vmatprep.subr.bf16.mxu0 %v6181_v33 }
 0xa3b   :  { %5766 = vmatpush3.bf16.msra.mxu1 %v6182_v37 }
 0xa3c   :  { %5788 = vmatpush3.bf16.msra.mxu0 %v6183_v57  ;;  %5912 = vmatprep.subr.bf16.mxu1 %v7144_v61 }
 0xa3e   :  { %4975 = vmatmul.mubr.bf16.vlgmr.msra.gmra.mxu1 %v3661_v24 }
 0xa3f   :  { %5016 = vmatmul.mubr.bf16.vlgmr.msra.gmra.mxu0 %v3663_v55  ;;  %5928 = vmatprep.mubr.msk.bf16.mxu1 %vm6360_vm8, %v7144_v61 }
 0xa9e   :  { %v5635_v62 = vpop.f32.mrf.mxu1 }
 0xa9f   :  { %v5657_v63 = vpop.f32.mrf.mxu0 }
 0xaa0   :  { %v5636_v59 = vpop.f32.mrf.mxu1 }
 0xaa1   :  { %v5658_v41 = vpop.f32.mrf.mxu0  ;;  %v5637_v9 = vadd.f32 %v5636_v59, %v5635_v62 }
 0xaa2   :  { %v5638_v35 = vpop.f32.mrf.mxu1  ;;  %v5659_v10 = vadd.f32 %v5658_v41, %v5657_v63 }
 0xaa3   :  { %v5660_v18 = vpop.f32.mrf.mxu0  ;;  %v4731_v13 = vadd.f32 %v5637_v9, %v5434_v3  ;;  %v6187_v9 = vld [vmem:[#allocation11 + $0x20] sm:$0xff]  }
 0xaa4   :  { %v5639_v42 = vpop.f32.mrf.mxu1 }
 0xaa5   :  { %v5661_v45 = vpop.f32.mrf.mxu0  ;;  %v5640_v31 = vadd.f32 %v5639_v42, %v5638_v35  ;;  %v4772_v8 = vadd.f32 %v5659_v10, %v4731_v13  ;;  %v6191_v13 = vld [vmem:[#allocation11] sm:$0xff]  }
 0xaa6   :  { %v5662_v12 = vadd.f32 %v5661_v45, %v5660_v18 }
 0xaa7   :  { %v4734_v17 = vadd.f32 %v5640_v31, %v5434_v3  ;;  %v6188_v3 = vld [vmem:[#allocation11 + $0x18] sm:$0xff]  }
 0xaa9   :  { %v4775_v56 = vadd.f32 %v5662_v12, %v4734_v17  ;;  %v5564_v12 = vld [vmem:[%s7126_s13] ss:$0 sm:$0xff] }
 0xabe   :  { %v5679_v38 = vpop.f32.mrf.mxu1 }
 0xabf   :  { %v5701_v26 = vpop.f32.mrf.mxu0 }
 0xac0   :  { %v5680_v39 = vpop.f32.mrf.mxu1 }
 0xac1   :  { %v5702_v58 = vpop.f32.mrf.mxu0  ;;  %v5681_v23 = vadd.f32 %v5680_v39, %v5679_v38 }
 0xac2   :  { %v5682_v4 = vpop.f32.mrf.mxu1  ;;  %v5703_v20 = vadd.f32 %v5702_v58, %v5701_v26 }
 0xac3   :  { %v5704_v16 = vpop.f32.mrf.mxu0  ;;  %v4813_v14 = vadd.f32 %v5681_v23, %v4772_v8 }
 0xac4   :  { %v5683_v2 = vpop.f32.mrf.mxu1 }
 0xac5   :  { %v5705_v49 = vpop.f32.mrf.mxu0  ;;  %v5684_v19 = vadd.f32 %v5683_v2, %v5682_v4  ;;  %v4854_v25 = vadd.f32 %v5703_v20, %v4813_v14  ;;  %v6184_v2 = vld [vmem:[#allocation11 + $0x38] sm:$0xff]  }
 0xac6   :  { %v5706_v22 = vadd.f32 %v5705_v49, %v5704_v16  ;;  %5913 = vmatpush3.bf16.msra.mxu1 %v6184_v2  ;;  %v6190_v49 = vld [vmem:[#allocation11 + $0x8] sm:$0xff]  }
 0xac7   :  { %v4816_v15 = vadd.f32 %v5684_v19, %v4775_v56  ;;  %5914 = vmatprep.subr.bf16.mxu1 %v7144_v61 }
 0xac9   :  { %v4857_v43 = vadd.f32 %v5706_v22, %v4816_v15 }
 0xade   :  { %v5723_v0 = vpop.f32.mrf.mxu1 }
 0xadf   :  { %v5745_v21 = vpop.f32.mrf.mxu0 }
 0xae0   :  { %v5724_v7 = vpop.f32.mrf.mxu1 }
 0xae1   :  { %v5746_v5 = vpop.f32.mrf.mxu0  ;;  %v5725_v47 = vadd.f32 %v5724_v7, %v5723_v0  ;;  %v6189_v0 = vld [vmem:[#allocation11 + $0x10] sm:$0xff]  }
 0xae2   :  { %v5726_v36 = vpop.f32.mrf.mxu1  ;;  %v5747_v51 = vadd.f32 %v5746_v5, %v5745_v21  ;;  %v5563_v5 = vld [vmem:[%s7125_s12] ss:$0 sm:$0xff] }
 0xae3   :  { %v5748_v1 = vpop.f32.mrf.mxu0  ;;  %v4895_v28 = vadd.f32 %v5725_v47, %v4854_v25 }
 0xae4   :  { %v5727_v11 = vpop.f32.mrf.mxu1 }
 0xae5   :  { %v5728_v34 = vadd.f32 %v5727_v11, %v5726_v36  ;;  %v5749_v44 = vpop.f32.mrf.mxu0  ;;  %v4936_v60 = vadd.f32 %v5747_v51, %v4895_v28 }
 0xae6   :  { %v5750_v32 = vadd.f32 %v5749_v44, %v5748_v1 }
 0xae7   :  { %v4898_v40 = vadd.f32 %v5728_v34, %v4857_v43 }
 0xae9   :  { %v4939_v24 = vadd.f32 %v5750_v32, %v4898_v40 }
 0xafe   :  { %v5767_v54 = vpop.f32.mrf.mxu1 }
 0xaff   :  { %v5789_v50 = vpop.f32.mrf.mxu0 }
 0xb00   :  { %v5768_v48 = vpop.f32.mrf.mxu1 }
 0xb01   :  { %v5769_v53 = vadd.f32 %v5768_v48, %v5767_v54  ;;  %v5790_v52 = vpop.f32.mrf.mxu0 }
 0xb02   :  { %v5770_v30 = vpop.f32.mrf.mxu1  ;;  %v5791_v37 = vadd.f32 %v5790_v52, %v5789_v50 }
 0xb03   :  { %v4977_v33 = vadd.f32 %v5769_v53, %v4936_v60  ;;  %v5792_v57 = vpop.f32.mrf.mxu0 }
 0xb04   :  { %v5771_v6 = vpop.f32.mrf.mxu1 }
 0xb05   :  { %v5772_v46 = vadd.f32 %v5771_v6, %v5770_v30  ;;  %v5793_v55 = vpop.f32.mrf.mxu0  ;;  %v5018_v62 = vadd.f32 %v5791_v37, %v4977_v33  ;;  %v5565_v37 = vld [vmem:[%s7128_s15] ss:$0 sm:$0xff] }
 0xb06   :  { %v5794_v59 = vadd.f32 %v5793_v55, %v5792_v57 }
 0xb07   :  { %v4980_v63 = vadd.f32 %v5772_v46, %v4939_v24  ;;  %v5024_v41 = vadd.f32 %v5018_v62, %v6881_v27  ;;  %v6185_v27 = vld [vmem:[#allocation11 + $0x30] sm:$0xff]  }
 0xb08   :  { %5915 = vmatpush3.bf16.msra.mxu1 %v6185_v27 }
 0xb09   :  { %5028 = vadd.xlane.f32.xlu0 %v5024_v41  ;;  %v5021_v35 = vadd.f32 %v5794_v59, %v4980_v63  ;;  %5916 = vmatprep.subr.bf16.mxu1 %v7144_v61 }
 0xb0b   :  { %v5025_v18 = vadd.f32 %v5021_v35, %v6883_v29  ;;  %v6186_v29 = vld [vmem:[#allocation11 + $0x28] sm:$0xff]  }
 0xb0c   :  { %5917 = vmatpush3.bf16.msra.mxu1 %v6186_v29 }
 0xb0d   :  { %5030 = vadd.xlane.f32.xlu0 %v5025_v18  ;;  %5918 = vmatprep.subr.bf16.mxu1 %v7144_v61 }
 0xb10   :  { %5919 = vmatpush3.bf16.msra.mxu1 %v6187_v9 }
 0xb11   :  { %5920 = vmatprep.subr.bf16.mxu1 %v7144_v61 }
 0xb14   :  { %5921 = vmatpush3.bf16.msra.mxu1 %v6188_v3 }
 0xb15   :  { %5922 = vmatprep.subr.bf16.mxu1 %v7144_v61 }
 0xb18   :  { %5923 = vmatpush3.bf16.msra.mxu1 %v6189_v0 }
 0xb19   :  { %5924 = vmatprep.subr.bf16.mxu1 %v7144_v61 }
 0xb1c   :  { %5925 = vmatpush3.bf16.msra.mxu1 %v6190_v49 }
 0xb1d   :  { %5926 = vmatprep.subr.bf16.mxu1 %v7144_v61 }
 0xb20   :  { %5927 = vmatpush3.bf16.msra.mxu1 %v6191_v13 }
 0xb92   :  { %v5029_v42 = vpop.xlane.xlu0 %5028 }
 0xb93   :  { %v5032_v38 = vmul.f32 0.0078125, %v5029_v42 }
 0xb95   :  { %v5034_v45 = vsub.f32 %v5024_v41, %v5032_v38 }
 0xb96   :  { %v5031_v26 = vpop.xlane.xlu0 %5030 }
 0xb97   :  { %v5033_v39 = vmul.f32 0.0078125, %v5031_v26  ;;  %v5036_v58 = vmul.f32 %v5034_v45, %v5034_v45 }
 0xb99   :  { %v5035_v4 = vsub.f32 %v5025_v18, %v5033_v39  ;;  %5038 = vadd.xlane.f32.xlu1 %v5036_v58 }
 0xb9b   :  { %v5037_v16 = vmul.f32 %v5035_v4, %v5035_v4 }
 0xb9d   :  { %5040 = vadd.xlane.f32.xlu1 %v5037_v16 }
 0xc22   :  { %v5039_v10 = vpop.xlane.xlu1 %5038 }
 0xc23   :  { %v5042_v31 = vmul.f32 0.0078125, %v5039_v10 }
 0xc25   :  { %v5044_v21 = vadd.f32 1e-05, %v5042_v31 }
 0xc26   :  { %v5041_v7 = vpop.xlane.xlu1 %5040 }
 0xc27   :  { %6192 = vrsqrt.f32 %v5044_v21  ;;  %v5043_v23 = vmul.f32 0.0078125, %v5041_v7 }
 0xc29   :  { %v5045_v8 = vadd.f32 1e-05, %v5043_v23 }
 0xc2b   :  { %6194 = vrsqrt.f32 %v5045_v8 }
 0xc34   :  { %v6193_v17 = vpop.eup %6192 }
 0xc35   :  { %v5048_v36 = vmul.f32 %v6193_v17, %v5034_v45 }
 0xc37   :  { %v5056_v61 = vmul.f32 %v5563_v5, %v5048_v36 }
 0xc38   :  { %v6195_v14 = vpop.eup %6194 }
 0xc39   :  { %v5064_v20 = vadd.f32 %v5564_v12, %v5056_v61  ;;  %v5049_v19 = vmul.f32 %v6195_v14, %v5035_v4 }
 0xc3b   :  { %v5057_v56 = vmul.f32 %v5563_v5, %v5049_v19  ;;  %v5066_v47 = vrot.slane %v5064_v20, 4 }
 0xc3d   :  { %v5065_v1 = vadd.f32 %v5564_v12, %v5057_v56  ;;  %v5067_v11 = vadd.f32 %v5066_v47, %v5064_v20 }
 0xc3f   :  { %v5068_v25 = vrot.slane %v5067_v11, 2  ;;  %v5072_v15 = vrot.slane %v5065_v1, 4 }
 0xc41   :  { %v5069_v22 = vadd.f32 %v5068_v25, %v5067_v11  ;;  %v5073_v28 = vadd.f32 %v5072_v15, %v5065_v1 }
 0xc43   :  { %v5070_v51 = vrot.slane %v5069_v22, 1  ;;  %v5074_v34 = vrot.slane %v5073_v28, 2 }
 0xc45   :  { %v5071_v44 = vadd.f32 %v5070_v51, %v5069_v22  ;;  %v5075_v54 = vadd.f32 %v5074_v34, %v5073_v28 }
 0xc47   :  { %v5076_v43 = vrot.slane %v5075_v54, 1  ;;  %v5079_v50 = vmul.f32 0.125, %v5071_v44 }
 0xc49   :  { %v5077_v48 = vadd.f32 %v5076_v43, %v5075_v54  ;;  %v5081_v40 = vpack.c.bf16 %v5079_v50, %v5079_v50 }
 0xc4b   :  { %v5080_v60 = vmul.f32 0.125, %v5077_v48  ;;  %v5108_v52 = vunpack.c.l.b16 %v5081_v40 }
 0xc4d   :  { %v5082_v53 = vpack.c.bf16 %v5080_v60, %v5080_v60 }
 0xc4f   :  { %v5109_v30 = vunpack.c.l.b16 %v5082_v53 }
 0xc51   :  { %v5111_v32 = vsel %vm5110_vm5, %v5109_v30, %v5108_v52 }
 0xc52   :  { %v5112_v33 = vpack.c.b16 %v5111_v32, %v5111_v32 }
 0xc54   :  { %5929 = vmatmul.mubr.bf16.vlgmr.msra.gmra.mxu1 %v5112_v33 }
 0xd14   :  { %v5196_v57 = vpop.f32.mrf.mxu1 }
 0xd15   :  { %v5197_v6 = vadd.f32 %v5565_v37, %v5196_v57 }
 0xd16   :  { %v5930_v24 = vpop.f32.mrf.mxu1 }
 0xd17   :  { %5202 = vst [vmem:[#allocation13] sm:$0x3] %v5197_v6 }
 0xd18   :  { %v5199_v46 = vpop.f32.mrf.mxu1 }
 0xd19   :  { %6327 = shalt.err (!%p6324_p6)
}
 0xd1a   :  { %5212 = dma.vmem_to_hbm [thread:$0]  %s5210_s0, 32, %s7129_s16, [#allocation7]   ;;  %v5931_v55 = vpop.f32.mrf.mxu1 }
 0xd1b   :  { %6346 = dma.done.wait [#allocation7], 32  }
 0xd1c   :  { %6347 = vsyncadd [#allocation7], 4294967264 }
 0xd1d   :  { %5216 = vsyncpa [#allocation6], 1 }
 0xd1e   :  { %5217 = vsyncpa [#allocation9], 1 }
 0xd1f   :  { %5218 = vsyncpa [#allocation12], 1 }
 0xd20   :  { %5219 = vsyncpa [#allocation7], 1 }
 0xd21   :  { %5220 = vsyncmov [#allocation4] }
 0xd24   :  { %s5221_s15 = vpop.sfrf %5220 }
 0xd25   :  { %p5574_p7 = scmp.ne.s32.totalorder %s5221_s15, 0 }
 0xd27   :  { %5225 = shalt.err (%p5574_p7)  }
 0xd28   :  { %5227 = vsyncmov [#allocation4 + $0x1] }
 0xd2b   :  { %s5228_s21 = vpop.sfrf %5227 }
 0xd2c   :  { %p5575_p8 = scmp.ne.s32.totalorder %s5228_s21, 0 }
 0xd2e   :  { %5232 = shalt.err (%p5575_p8)  }

</bundles_post_ra>
